<compile_context>
chip_gen: v7x
topology: tpu7x:2x2x1
jax: 0.10.0
libtpu: 0.0.40
codegen_flags: <defaults>
</compile_context>

<pallas_src>
import math
import jax
import jax.numpy as jnp
from jax.experimental import pallas as pl
from jax.experimental.pallas import tpu as pltpu


def _round_up(x, m):
    return ((x + m - 1) // m) * m


def _tile_bytes(shape, itemsize=4):
    """VMEM bytes for one buffer of `shape` with (sublane,128) tile rounding."""
    shape = tuple(shape)
    if len(shape) == 1:
        shape = (1,) + shape
    lead = 1
    for d in shape[:-2]:
        lead *= d
    sub = max(8, 32 // itemsize)          # 8 for f32, 16 for bf16
    return lead * _round_up(shape[-2], sub) * _round_up(shape[-1], 128) * itemsize


def _make_kernel(t_chunk, num_full, rem, hp):
    """Build the GRU kernel for a fixed chunking (all args are trace-time ints)."""

    def kernel(x_ref, wi_ref, wh_ref, bi_ref, bhn_ref, w2_ref, b2_ref,
               out_ref, h_ref, gi_ref):
        c = pl.program_id(1)                     # time-chunk index (inner axis)
        b_tile = h_ref.shape[0]
        i_dim = x_ref.shape[-1]

        @pl.when(c == 0)
        def _():
            h_ref[...] = jnp.zeros_like(h_ref)

        # ---- Hoisted input-gate matmul for the whole time chunk ------------
        # (t_chunk, b_tile, I) -> (t_chunk*b_tile, I) is layout-free because
        # b_tile % 8 == 0 (whole sublane tiles) and the lane dim is untouched.
        x_2d = x_ref[...].reshape(t_chunk * b_tile, i_dim)
        gi_ref[...] = (
            jnp.dot(x_2d.astype(wi_ref.dtype), wi_ref[...],
                    preferred_element_type=jnp.float32) + bi_ref[...]
        ).reshape(t_chunk, b_tile, 3 * hp)

        # Hoist the (1,Hp)->(b_tile,Hp) broadcast out of the unrolled loop.
        bhn_b = jnp.broadcast_to(bhn_ref[...], (b_tile, hp))

        def cell(i, h):
            gi = gi_ref[i]                                        # (b_tile, 3*Hp)
            gh = jnp.dot(h.astype(wh_ref.dtype), wh_ref[...],
                         preferred_element_type=jnp.float32)
            r = jax.nn.sigmoid(gi[:, :hp] + gh[:, :hp])
            z = jax.nn.sigmoid(gi[:, hp:2 * hp] + gh[:, hp:2 * hp])
            n = jnp.tanh(gi[:, 2 * hp:] + r * (gh[:, 2 * hp:] + bhn_b))
            return (1.0 - z) * n + z * h

        h0 = h_ref[...]
        if rem == 0:
            h_ref[...] = jax.lax.fori_loop(0, t_chunk, cell, h0, unroll=True)
        else:
            if num_full > 0:
                @pl.when(c < num_full)
                def _():
                    h_ref[...] = jax.lax.fori_loop(0, t_chunk, cell, h0,
                                                   unroll=True)

            @pl.when(c == num_full)
            def _():
                h_ref[...] = jax.lax.fori_loop(0, rem, cell, h0, unroll=True)

        @pl.when(c == pl.num_programs(1) - 1)
        def _():
            # Dropout(p=0.3) is identity in eval mode.
            # TODO(synk): training-mode dropout would need pltpu.prng_random_bits.
            out_ref[...] = (
                jnp.dot(h_ref[...].astype(w2_ref.dtype), w2_ref[...],
                        preferred_element_type=jnp.float32) + b2_ref[...]
            ).astype(out_ref.dtype)

    return kernel


def fuse_params(p, *, weight_dtype=jnp.float32):
    """One-time param prep: fuse the 6 gate weights into 2 lane-padded blocks,
    fold biases, lane-pad the classifier. weight_dtype=jnp.bfloat16 halves
    weight HBM/VMEM traffic on v6e/v7x (accumulation stays f32)."""
    I = p["wir"].shape[0]
    H = p["whr"].shape[0]
    C = p["w2"].shape[1]
    Hp = _round_up(H, 128)
    Cp = _round_up(C, 128)

    def pad2(a, r, c):
        return jnp.zeros((r, c), jnp.float32).at[:a.shape[0], :a.shape[1]].set(a)

    wi = jnp.concatenate([pad2(p["wir"], I, Hp),
                          pad2(p["wiz"], I, Hp),
                          pad2(p["win"], I, Hp)], axis=1)            # (I, 3*Hp)
    wh = jnp.concatenate([pad2(p["whr"], Hp, Hp),
                          pad2(p["whz"], Hp, Hp),
                          pad2(p["whn"], Hp, Hp)], axis=1)           # (Hp, 3*Hp)
    bi = jnp.concatenate([pad2(p["bir"] + p["bhr"], 1, Hp),
                          pad2(p["biz"] + p["bhz"], 1, Hp),
                          pad2(p["bin"], 1, Hp)], axis=1)            # (1, 3*Hp)
    bhn = pad2(p["bhn"], 1, Hp)                                      # (1, Hp)
    w2 = pad2(p["w2"], Hp, Cp)                                       # (Hp, Cp)
    b2 = pad2(p["b2"], 1, Cp)                                        # (1, Cp)
    return {"wi": wi.astype(weight_dtype), "wh": wh.astype(weight_dtype),
            "bi": bi, "bhn": bhn,
            "w2": w2.astype(weight_dtype), "b2": b2,
            "H": H, "C": C, "Hp": Hp, "Cp": Cp}


def single_gru_forward(x, fp, *, t_chunk=32):
    """x: (B, T, I) float32, batch_first like the PyTorch module."""
    B, T, I = x.shape
    Hp, Cp, C = fp["Hp"], fp["Cp"], fp["C"]
    w_itemsize = jnp.dtype(fp["wi"].dtype).itemsize

    # ---- batch tiling -------------------------------------------------------
    B8 = _round_up(B, 8)                 # f32 sublane multiple
    b_tile = min(B8, 256)                # v6e/v7x MXU is 256 wide (v5e fine too)
    if B8 > 8 and B8 // b_tile < 2:
        # Prefer >= 2 batch tiles so v7x's second TensorCore gets a shard.
        b_tile = max(8, _round_up(B8 // 2, 8))
    Bp = _round_up(B8, b_tile)
    n_b_tiles = Bp // b_tile

    # ---- time chunking: snap to a divisor of T when one is close -----------
    t_chunk = max(1, min(t_chunk, T))
    if T % t_chunk:
        for d in range(t_chunk, 0, -1):
            if T % d == 0 and d >= max(1, t_chunk // 2):
                t_chunk = d
                break

    # ---- VMEM budget (with (8,128) tile rounding) ---------------------------
    try:
        vmem_cap = int(pltpu.get_tpu_info().vmem_capacity_bytes * 0.75)
    except Exception:
        vmem_cap = 48 * 2 ** 20          # safe for v7x's 64 MiB per TensorCore

    weight_bytes = (_tile_bytes(fp["wi"].shape, w_itemsize)
                    + _tile_bytes(fp["wh"].shape, w_itemsize)
                    + _tile_bytes(fp["w2"].shape, w_itemsize)
                    + _tile_bytes(fp["bi"].shape) + _tile_bytes(fp["bhn"].shape)
                    + _tile_bytes(fp["b2"].shape))

    def vmem_need(tc, n_w_buf):
        return (2 * _tile_bytes((tc, b_tile, I))         # x chunk, double-buffered
                + n_w_buf * weight_bytes                 # weight blocks
                + 2 * _tile_bytes((b_tile, Cp))          # out block
                + _tile_bytes((b_tile, Hp))              # h scratch
                + _tile_bytes((tc, b_tile, 3 * Hp)))     # hoisted GI scratch

    while t_chunk > 1 and vmem_need(t_chunk, 2) > vmem_cap:
        t_chunk = max(1, t_chunk // 2)

    num_full, rem = divmod(T, t_chunk)
    num_chunks = num_full + (1 if rem else 0)
    Tp = num_chunks * t_chunk

    # ---- x layout: time-major (Tp, Bp, I); skip padding when shapes align,
    # otherwise use fusable transpose+pad (no materialized at[].set()).
    x_tm = jnp.transpose(x, (1, 0, 2)).astype(jnp.float32)
    if Tp != T or Bp != B:
        x_p = jnp.pad(x_tm, ((0, Tp - T), (0, Bp - B), (0, 0)))
    else:
        x_p = x_tm

    kernel = _make_kernel(t_chunk, num_full, rem, Hp)

    def call(single_buffer_weights):
        n_w_buf = 1 if single_buffer_weights else 2

        def wspec(shape):
            # Grid-invariant weight blocks: single-buffer to halve their VMEM.
            if single_buffer_weights:
                return pl.BlockSpec(shape, lambda b, c: (0, 0),
                                    pipeline_mode=pl.Buffered(1))
            return pl.BlockSpec(shape, lambda b, c: (0, 0))

        grid_spec = pltpu.PrefetchScalarGridSpec(
            num_scalar_prefetch=0,
            # Batch outer / time inner: h_ref carry requires the time axis to
            # stay innermost and "arbitrary".
            grid=(n_b_tiles, num_chunks),
            in_specs=[
                pl.BlockSpec((t_chunk, b_tile, I), lambda b, c: (c, b, 0)),  # x
                wspec((I, 3 * Hp)),        # fused input-gate weights
                wspec((Hp, 3 * Hp)),       # fused hidden-gate weights
                wspec((1, 3 * Hp)),        # fused (pre-folded) biases
                wspec((1, Hp)),            # b_hn
                wspec((Hp, Cp)),           # classifier weight
                wspec((1, Cp)),            # classifier bias
            ],
            out_specs=pl.BlockSpec((b_tile, Cp), lambda b, c: (b, 0)),
            scratch_shapes=[pltpu.VMEM((b_tile, Hp), jnp.float32),
                            pltpu.VMEM((t_chunk, b_tile, 3 * Hp), jnp.float32)],
        )

        vmem_limit = int(min(max(vmem_need(t_chunk, n_w_buf) * 3 // 2 + (2 << 20),
                                 16 * 2 ** 20),
                             vmem_cap))

        return pl.pallas_call(
            kernel,
            out_shape=jax.ShapeDtypeStruct((Bp, Cp), jnp.float32),
            grid_spec=grid_spec,
            compiler_params=pltpu.CompilerParams(
                # TODO(synk): on v7x, try pltpu.CORE_PARALLEL on the batch axis
                # for an explicit per-TensorCore split at large B.
                dimension_semantics=("parallel", "arbitrary"),
                vmem_limit_bytes=vmem_limit),
        )(x_p, fp["wi"], fp["wh"], fp["bi"], fp["bhn"], fp["w2"], fp["b2"])

    try:
        y_full = call(True)
    except Exception:
        # pl.Buffered(1) unsupported on this jax version — fall back to the
        # previously-working default double-buffered weight blocks.
        y_full = call(False)

    return y_full[:B, :C]


def init_params(key, input_size, hidden_size, num_classes):
    """Deterministic init mirroring PyTorch shapes (uniform(-1/sqrt(H), 1/sqrt(H)))."""
    ks = jax.random.split(key, 16)
    s = 1.0 / math.sqrt(hidden_size)
    u = lambda k, shape: jax.random.uniform(k, shape, jnp.float32, minval=-s, maxval=s)
    # Stored transposed relative to PyTorch (so the kernel does x @ W directly).
    params = {
        "wir": u(ks[0], (input_size, hidden_size)),
        "wiz": u(ks[1], (input_size, hidden_size)),
        "win": u(ks[2], (input_size, hidden_size)),
        "whr": u(ks[3], (hidden_size, hidden_size)),
        "whz": u(ks[4], (hidden_size, hidden_size)),
        "whn": u(ks[5], (hidden_size, hidden_size)),
        "bir": u(ks[6], (1, hidden_size)),
        "biz": u(ks[7], (1, hidden_size)),
        "bin": u(ks[8], (1, hidden_size)),
        "bhr": u(ks[9], (1, hidden_size)),
        "bhz": u(ks[10], (1, hidden_size)),
        "bhn": u(ks[11], (1, hidden_size)),
        "w2": jax.random.uniform(ks[12], (hidden_size, num_classes), jnp.float32,
                                 minval=-1.0 / math.sqrt(num_classes),
                                 maxval=1.0 / math.sqrt(num_classes)),
        "b2": jax.random.uniform(ks[13], (1, num_classes), jnp.float32,
                                 minval=-1.0 / math.sqrt(num_classes),
                                 maxval=1.0 / math.sqrt(num_classes)),
    }
    return params


def reference_forward(x, p):
    """Pure-JAX reference (lax.scan GRU) for correctness checking."""
    B, T, I = x.shape
    H = p["whr"].shape[0]

    def step(h, x_t):
        r = jax.nn.sigmoid(x_t @ p["wir"] + p["bir"] + h @ p["whr"] + p["bhr"])
        z = jax.nn.sigmoid(x_t @ p["wiz"] + p["biz"] + h @ p["whz"] + p["bhz"])
        n = jnp.tanh(x_t @ p["win"] + p["bin"] + r * (h @ p["whn"] + p["bhn"]))
        h_new = (1.0 - z) * n + z * h
        return h_new, None

    h0 = jnp.zeros((B, H), jnp.float32)
    h_final, _ = jax.lax.scan(step, h0, jnp.transpose(x, (1, 0, 2)))
    return h_final @ p["w2"] + p["b2"]


if __name__ == "__main__":
    B, T, I, H, C = 4, 8, 16, 32, 8

    key = jax.random.PRNGKey(0)
    k_x, k_p = jax.random.split(key)
    x = jax.random.normal(k_x, (B, T, I), jnp.float32)
    params = init_params(k_p, I, H, C)
    # TODO(synk): pass weight_dtype=jnp.bfloat16 at production sizes on v6e/v7x
    # (halves weight traffic, ~2x MXU); kept f32 here to hold tight tolerance.
    fused = fuse_params(params)

    y = single_gru_forward(x, fused)
    y = jax.block_until_ready(y)

    y_ref = reference_forward(x, params)
    assert y.shape == (B, C)
    # Tolerance covers MXU f32 matmul pass/reassociation differences vs XLA
    # (fused weights + padded K reorder the reductions slightly).
    assert jnp.allclose(y, y_ref, atol=2e-3, rtol=2e-3), "mismatch vs JAX reference"

    print("KERNEL_OK")
</pallas_src>

<mosaic_0001>
module attributes {stable_mosaic.version = 11 : i64} {
  func.func @kernel(%arg0: i32, %arg1: i32, %arg2: memref<8x8x16xf32, #tpu.memory_space<vmem>>, %arg3: memref<16x384xf32, #tpu.memory_space<vmem>>, %arg4: memref<128x384xf32, #tpu.memory_space<vmem>>, %arg5: memref<1x384xf32, #tpu.memory_space<vmem>>, %arg6: memref<1x128xf32, #tpu.memory_space<vmem>>, %arg7: memref<128x128xf32, #tpu.memory_space<vmem>>, %arg8: memref<1x128xf32, #tpu.memory_space<vmem>>, %arg9: memref<8x128xf32, #tpu.memory_space<vmem>>, %arg10: memref<8x128xf32, #tpu.memory_space<vmem>>, %arg11: memref<8x8x384xf32, #tpu.memory_space<vmem>>) attributes {dimension_semantics = [#tpu.dimension_semantics<parallel>, #tpu.dimension_semantics<arbitrary>], iteration_bounds = array<i64: 1, 1>, scalar_prefetch = 0 : i64, scratch_operands = 2 : i64, tpu.core_type = #tpu.core_type<tc>, window_params = [{transform_indices = @transform_0, window_bounds = array<i64: 8, 8, 16>}, {pipeline_mode = #tpu.pipeline_mode<synchronous>, transform_indices = @transform_1, window_bounds = array<i64: 16, 384>}, {pipeline_mode = #tpu.pipeline_mode<synchronous>, transform_indices = @transform_2, window_bounds = array<i64: 128, 384>}, {pipeline_mode = #tpu.pipeline_mode<synchronous>, transform_indices = @transform_3, window_bounds = array<i64: 1, 384>}, {pipeline_mode = #tpu.pipeline_mode<synchronous>, transform_indices = @transform_4, window_bounds = array<i64: 1, 128>}, {pipeline_mode = #tpu.pipeline_mode<synchronous>, transform_indices = @transform_5, window_bounds = array<i64: 128, 128>}, {pipeline_mode = #tpu.pipeline_mode<synchronous>, transform_indices = @transform_6, window_bounds = array<i64: 1, 128>}, {transform_indices = @transform_7, window_bounds = array<i64: 8, 128>}]} {
    %c0_i32 = arith.constant 0 : i32
    %0 = arith.cmpi eq, %arg1, %c0_i32 : i32
    %1 = arith.extui %0 : i1 to i32
    %c0_i32_0 = arith.constant 0 : i32
    %2 = arith.cmpi ne, %1, %c0_i32_0 : i32
    scf.if %2 {
      %cst_83 = arith.constant 0.000000e+00 : f32
      %276 = vector.broadcast %cst_83 : f32 to vector<8x128xf32>
      %c0_84 = arith.constant 0 : index
      %c0_85 = arith.constant 0 : index
      %277 = vector.load %arg10[%c0_84, %c0_85] : memref<8x128xf32, #tpu.memory_space<vmem>>, vector<8x128xf32>
      tpu.vector_store %arg10[%c0_84, %c0_85], %276 {strides = array<i32>} : memref<8x128xf32, #tpu.memory_space<vmem>>, vector<8x128xf32>,
    } else {
    }
    %c0 = arith.constant 0 : index
    %c0_1 = arith.constant 0 : index
    %c0_2 = arith.constant 0 : index
    %3 = vector.load %arg2[%c0, %c0_1, %c0_2] : memref<8x8x16xf32, #tpu.memory_space<vmem>>, vector<8x8x16xf32>
    %4 = vector.shape_cast %3 : vector<8x8x16xf32> to vector<64x16xf32>
    %c0_3 = arith.constant 0 : index
    %c0_4 = arith.constant 0 : index
    %5 = vector.load %arg3[%c0_3, %c0_4] : memref<16x384xf32, #tpu.memory_space<vmem>>, vector<16x384xf32>
    %cst = arith.constant dense<0.000000e+00> : vector<64x384xf32>
    %6 = tpu.matmul %4, %5, %cst {dimension_numbers = #tpu.dot_dimension_numbers<[1], [0], [0], [1], [0, 0, 1, 1], [], []>} : vector<64x16xf32>, vector<16x384xf32>, vector<64x384xf32> -> vector<64x384xf32>
    %c0_5 = arith.constant 0 : index
    %c0_6 = arith.constant 0 : index
    %7 = vector.load %arg5[%c0_5, %c0_6] : memref<1x384xf32, #tpu.memory_space<vmem>>, vector<1x384xf32>
    %8 = vector.broadcast %7 : vector<1x384xf32> to vector<64x384xf32>
    %9 = arith.addf %6, %8 : vector<64x384xf32>
    %10 = vector.shape_cast %9 : vector<64x384xf32> to vector<8x8x384xf32>
    %c0_7 = arith.constant 0 : index
    %c0_8 = arith.constant 0 : index
    %c0_9 = arith.constant 0 : index
    %11 = vector.load %arg11[%c0_7, %c0_8, %c0_9] : memref<8x8x384xf32, #tpu.memory_space<vmem>>, vector<8x8x384xf32>
    tpu.vector_store %arg11[%c0_7, %c0_8, %c0_9], %10 {strides = array<i32>} : memref<8x8x384xf32, #tpu.memory_space<vmem>>, vector<8x8x384xf32>,
    %c0_10 = arith.constant 0 : index
    %c0_11 = arith.constant 0 : index
    %12 = vector.load %arg6[%c0_10, %c0_11] : memref<1x128xf32, #tpu.memory_space<vmem>>, vector<1x128xf32>
    %13 = vector.shape_cast %12 : vector<1x128xf32> to vector<1x128xf32>
    %14 = vector.broadcast %13 : vector<1x128xf32> to vector<8x128xf32>
    %c0_12 = arith.constant 0 : index
    %c0_13 = arith.constant 0 : index
    %15 = vector.load %arg10[%c0_12, %c0_13] : memref<8x128xf32, #tpu.memory_space<vmem>>, vector<8x128xf32>
    %c0_i32_14 = arith.constant 0 : i32
    %16 = arith.index_cast %c0_i32_14 : i32 to index
    %c0_15 = arith.constant 0 : index
    %c0_16 = arith.constant 0 : index
    %17 = vector.load %arg11[%16, %c0_15, %c0_16] : memref<8x8x384xf32, #tpu.memory_space<vmem>>, vector<1x8x384xf32>
    %18 = vector.shape_cast %17 : vector<1x8x384xf32> to vector<8x384xf32>
    %c0_17 = arith.constant 0 : index
    %c0_18 = arith.constant 0 : index
    %19 = vector.load %arg4[%c0_17, %c0_18] : memref<128x384xf32, #tpu.memory_space<vmem>>, vector<128x384xf32>
    %cst_19 = arith.constant dense<0.000000e+00> : vector<8x384xf32>
    %20 = tpu.matmul %15, %19, %cst_19 {dimension_numbers = #tpu.dot_dimension_numbers<[1], [0], [0], [1], [0, 0, 1, 1], [], []>} : vector<8x128xf32>, vector<128x384xf32>, vector<8x384xf32> -> vector<8x384xf32>
    %21 = vector.extract_strided_slice %18 {offsets = [0, 0], sizes = [8, 128], strides = [1, 1]} : vector<8x384xf32> to vector<8x128xf32>
    %22 = vector.extract_strided_slice %20 {offsets = [0, 0], sizes = [8, 128], strides = [1, 1]} : vector<8x384xf32> to vector<8x128xf32>
    %23 = arith.addf %21, %22 : vector<8x128xf32>
    %24 = arith.negf %23 : vector<8x128xf32>
    %25 = math.exp %24 : vector<8x128xf32>
    %cst_20 = arith.constant 1.000000e+00 : f32
    %26 = vector.broadcast %cst_20 : f32 to vector<8x128xf32>
    %27 = arith.addf %26, %25 : vector<8x128xf32>
    %28 = arith.divf %26, %27 : vector<8x128xf32>
    %29 = vector.extract_strided_slice %18 {offsets = [0, 128], sizes = [8, 128], strides = [1, 1]} : vector<8x384xf32> to vector<8x128xf32>
    %30 = vector.extract_strided_slice %20 {offsets = [0, 128], sizes = [8, 128], strides = [1, 1]} : vector<8x384xf32> to vector<8x128xf32>
    %31 = arith.addf %29, %30 : vector<8x128xf32>
    %32 = arith.negf %31 : vector<8x128xf32>
    %33 = math.exp %32 : vector<8x128xf32>
    %cst_21 = arith.constant 1.000000e+00 : f32
    %34 = vector.broadcast %cst_21 : f32 to vector<8x128xf32>
    %35 = arith.addf %34, %33 : vector<8x128xf32>
    %36 = arith.divf %34, %35 : vector<8x128xf32>
    %37 = vector.extract_strided_slice %18 {offsets = [0, 256], sizes = [8, 128], strides = [1, 1]} : vector<8x384xf32> to vector<8x128xf32>
    %38 = vector.extract_strided_slice %20 {offsets = [0, 256], sizes = [8, 128], strides = [1, 1]} : vector<8x384xf32> to vector<8x128xf32>
    %39 = arith.addf %38, %14 : vector<8x128xf32>
    %40 = arith.mulf %28, %39 : vector<8x128xf32>
    %41 = arith.addf %37, %40 : vector<8x128xf32>
    %42 = math.tanh %41 : vector<8x128xf32>
    %cst_22 = arith.constant 1.000000e+00 : f32
    %43 = vector.broadcast %cst_22 : f32 to vector<8x128xf32>
    %44 = arith.subf %43, %36 : vector<8x128xf32>
    %45 = arith.mulf %44, %42 : vector<8x128xf32>
    %46 = arith.mulf %36, %15 : vector<8x128xf32>
    %47 = arith.addf %45, %46 : vector<8x128xf32>
    %c1_i32 = arith.constant 1 : i32
    %48 = arith.index_cast %c1_i32 : i32 to index
    %c0_23 = arith.constant 0 : index
    %c0_24 = arith.constant 0 : index
    %49 = vector.load %arg11[%48, %c0_23, %c0_24] : memref<8x8x384xf32, #tpu.memory_space<vmem>>, vector<1x8x384xf32>
    %50 = vector.shape_cast %49 : vector<1x8x384xf32> to vector<8x384xf32>
    %c0_25 = arith.constant 0 : index
    %c0_26 = arith.constant 0 : index
    %51 = vector.load %arg4[%c0_25, %c0_26] : memref<128x384xf32, #tpu.memory_space<vmem>>, vector<128x384xf32>
    %cst_27 = arith.constant dense<0.000000e+00> : vector<8x384xf32>
    %52 = tpu.matmul %47, %51, %cst_27 {dimension_numbers = #tpu.dot_dimension_numbers<[1], [0], [0], [1], [0, 0, 1, 1], [], []>} : vector<8x128xf32>, vector<128x384xf32>, vector<8x384xf32> -> vector<8x384xf32>
    %53 = vector.extract_strided_slice %50 {offsets = [0, 0], sizes = [8, 128], strides = [1, 1]} : vector<8x384xf32> to vector<8x128xf32>
    %54 = vector.extract_strided_slice %52 {offsets = [0, 0], sizes = [8, 128], strides = [1, 1]} : vector<8x384xf32> to vector<8x128xf32>
    %55 = arith.addf %53, %54 : vector<8x128xf32>
    %56 = arith.negf %55 : vector<8x128xf32>
    %57 = math.exp %56 : vector<8x128xf32>
    %cst_28 = arith.constant 1.000000e+00 : f32
    %58 = vector.broadcast %cst_28 : f32 to vector<8x128xf32>
    %59 = arith.addf %58, %57 : vector<8x128xf32>
    %60 = arith.divf %58, %59 : vector<8x128xf32>
    %61 = vector.extract_strided_slice %50 {offsets = [0, 128], sizes = [8, 128], strides = [1, 1]} : vector<8x384xf32> to vector<8x128xf32>
    %62 = vector.extract_strided_slice %52 {offsets = [0, 128], sizes = [8, 128], strides = [1, 1]} : vector<8x384xf32> to vector<8x128xf32>
    %63 = arith.addf %61, %62 : vector<8x128xf32>
    %64 = arith.negf %63 : vector<8x128xf32>
    %65 = math.exp %64 : vector<8x128xf32>
    %cst_29 = arith.constant 1.000000e+00 : f32
    %66 = vector.broadcast %cst_29 : f32 to vector<8x128xf32>
    %67 = arith.addf %66, %65 : vector<8x128xf32>
    %68 = arith.divf %66, %67 : vector<8x128xf32>
    %69 = vector.extract_strided_slice %50 {offsets = [0, 256], sizes = [8, 128], strides = [1, 1]} : vector<8x384xf32> to vector<8x128xf32>
    %70 = vector.extract_strided_slice %52 {offsets = [0, 256], sizes = [8, 128], strides = [1, 1]} : vector<8x384xf32> to vector<8x128xf32>
    %71 = arith.addf %70, %14 : vector<8x128xf32>
    %72 = arith.mulf %60, %71 : vector<8x128xf32>
    %73 = arith.addf %69, %72 : vector<8x128xf32>
    %74 = math.tanh %73 : vector<8x128xf32>
    %cst_30 = arith.constant 1.000000e+00 : f32
    %75 = vector.broadcast %cst_30 : f32 to vector<8x128xf32>
    %76 = arith.subf %75, %68 : vector<8x128xf32>
    %77 = arith.mulf %76, %74 : vector<8x128xf32>
    %78 = arith.mulf %68, %47 : vector<8x128xf32>
    %79 = arith.addf %77, %78 : vector<8x128xf32>
    %c2_i32 = arith.constant 2 : i32
    %80 = arith.index_cast %c2_i32 : i32 to index
    %c0_31 = arith.constant 0 : index
    %c0_32 = arith.constant 0 : index
    %81 = vector.load %arg11[%80, %c0_31, %c0_32] : memref<8x8x384xf32, #tpu.memory_space<vmem>>, vector<1x8x384xf32>
    %82 = vector.shape_cast %81 : vector<1x8x384xf32> to vector<8x384xf32>
    %c0_33 = arith.constant 0 : index
    %c0_34 = arith.constant 0 : index
    %83 = vector.load %arg4[%c0_33, %c0_34] : memref<128x384xf32, #tpu.memory_space<vmem>>, vector<128x384xf32>
    %cst_35 = arith.constant dense<0.000000e+00> : vector<8x384xf32>
    %84 = tpu.matmul %79, %83, %cst_35 {dimension_numbers = #tpu.dot_dimension_numbers<[1], [0], [0], [1], [0, 0, 1, 1], [], []>} : vector<8x128xf32>, vector<128x384xf32>, vector<8x384xf32> -> vector<8x384xf32>
    %85 = vector.extract_strided_slice %82 {offsets = [0, 0], sizes = [8, 128], strides = [1, 1]} : vector<8x384xf32> to vector<8x128xf32>
    %86 = vector.extract_strided_slice %84 {offsets = [0, 0], sizes = [8, 128], strides = [1, 1]} : vector<8x384xf32> to vector<8x128xf32>
    %87 = arith.addf %85, %86 : vector<8x128xf32>
    %88 = arith.negf %87 : vector<8x128xf32>
    %89 = math.exp %88 : vector<8x128xf32>
    %cst_36 = arith.constant 1.000000e+00 : f32
    %90 = vector.broadcast %cst_36 : f32 to vector<8x128xf32>
    %91 = arith.addf %90, %89 : vector<8x128xf32>
    %92 = arith.divf %90, %91 : vector<8x128xf32>
    %93 = vector.extract_strided_slice %82 {offsets = [0, 128], sizes = [8, 128], strides = [1, 1]} : vector<8x384xf32> to vector<8x128xf32>
    %94 = vector.extract_strided_slice %84 {offsets = [0, 128], sizes = [8, 128], strides = [1, 1]} : vector<8x384xf32> to vector<8x128xf32>
    %95 = arith.addf %93, %94 : vector<8x128xf32>
    %96 = arith.negf %95 : vector<8x128xf32>
    %97 = math.exp %96 : vector<8x128xf32>
    %cst_37 = arith.constant 1.000000e+00 : f32
    %98 = vector.broadcast %cst_37 : f32 to vector<8x128xf32>
    %99 = arith.addf %98, %97 : vector<8x128xf32>
    %100 = arith.divf %98, %99 : vector<8x128xf32>
    %101 = vector.extract_strided_slice %82 {offsets = [0, 256], sizes = [8, 128], strides = [1, 1]} : vector<8x384xf32> to vector<8x128xf32>
    %102 = vector.extract_strided_slice %84 {offsets = [0, 256], sizes = [8, 128], strides = [1, 1]} : vector<8x384xf32> to vector<8x128xf32>
    %103 = arith.addf %102, %14 : vector<8x128xf32>
    %104 = arith.mulf %92, %103 : vector<8x128xf32>
    %105 = arith.addf %101, %104 : vector<8x128xf32>
    %106 = math.tanh %105 : vector<8x128xf32>
    %cst_38 = arith.constant 1.000000e+00 : f32
    %107 = vector.broadcast %cst_38 : f32 to vector<8x128xf32>
    %108 = arith.subf %107, %100 : vector<8x128xf32>
    %109 = arith.mulf %108, %106 : vector<8x128xf32>
    %110 = arith.mulf %100, %79 : vector<8x128xf32>
    %111 = arith.addf %109, %110 : vector<8x128xf32>
    %c3_i32 = arith.constant 3 : i32
    %112 = arith.index_cast %c3_i32 : i32 to index
    %c0_39 = arith.constant 0 : index
    %c0_40 = arith.constant 0 : index
    %113 = vector.load %arg11[%112, %c0_39, %c0_40] : memref<8x8x384xf32, #tpu.memory_space<vmem>>, vector<1x8x384xf32>
    %114 = vector.shape_cast %113 : vector<1x8x384xf32> to vector<8x384xf32>
    %c0_41 = arith.constant 0 : index
    %c0_42 = arith.constant 0 : index
    %115 = vector.load %arg4[%c0_41, %c0_42] : memref<128x384xf32, #tpu.memory_space<vmem>>, vector<128x384xf32>
    %cst_43 = arith.constant dense<0.000000e+00> : vector<8x384xf32>
    %116 = tpu.matmul %111, %115, %cst_43 {dimension_numbers = #tpu.dot_dimension_numbers<[1], [0], [0], [1], [0, 0, 1, 1], [], []>} : vector<8x128xf32>, vector<128x384xf32>, vector<8x384xf32> -> vector<8x384xf32>
    %117 = vector.extract_strided_slice %114 {offsets = [0, 0], sizes = [8, 128], strides = [1, 1]} : vector<8x384xf32> to vector<8x128xf32>
    %118 = vector.extract_strided_slice %116 {offsets = [0, 0], sizes = [8, 128], strides = [1, 1]} : vector<8x384xf32> to vector<8x128xf32>
    %119 = arith.addf %117, %118 : vector<8x128xf32>
    %120 = arith.negf %119 : vector<8x128xf32>
    %121 = math.exp %120 : vector<8x128xf32>
    %cst_44 = arith.constant 1.000000e+00 : f32
    %122 = vector.broadcast %cst_44 : f32 to vector<8x128xf32>
    %123 = arith.addf %122, %121 : vector<8x128xf32>
    %124 = arith.divf %122, %123 : vector<8x128xf32>
    %125 = vector.extract_strided_slice %114 {offsets = [0, 128], sizes = [8, 128], strides = [1, 1]} : vector<8x384xf32> to vector<8x128xf32>
    %126 = vector.extract_strided_slice %116 {offsets = [0, 128], sizes = [8, 128], strides = [1, 1]} : vector<8x384xf32> to vector<8x128xf32>
    %127 = arith.addf %125, %126 : vector<8x128xf32>
    %128 = arith.negf %127 : vector<8x128xf32>
    %129 = math.exp %128 : vector<8x128xf32>
    %cst_45 = arith.constant 1.000000e+00 : f32
    %130 = vector.broadcast %cst_45 : f32 to vector<8x128xf32>
    %131 = arith.addf %130, %129 : vector<8x128xf32>
    %132 = arith.divf %130, %131 : vector<8x128xf32>
    %133 = vector.extract_strided_slice %114 {offsets = [0, 256], sizes = [8, 128], strides = [1, 1]} : vector<8x384xf32> to vector<8x128xf32>
    %134 = vector.extract_strided_slice %116 {offsets = [0, 256], sizes = [8, 128], strides = [1, 1]} : vector<8x384xf32> to vector<8x128xf32>
    %135 = arith.addf %134, %14 : vector<8x128xf32>
    %136 = arith.mulf %124, %135 : vector<8x128xf32>
    %137 = arith.addf %133, %136 : vector<8x128xf32>
    %138 = math.tanh %137 : vector<8x128xf32>
    %cst_46 = arith.constant 1.000000e+00 : f32
    %139 = vector.broadcast %cst_46 : f32 to vector<8x128xf32>
    %140 = arith.subf %139, %132 : vector<8x128xf32>
    %141 = arith.mulf %140, %138 : vector<8x128xf32>
    %142 = arith.mulf %132, %111 : vector<8x128xf32>
    %143 = arith.addf %141, %142 : vector<8x128xf32>
    %c4_i32 = arith.constant 4 : i32
    %144 = arith.index_cast %c4_i32 : i32 to index
    %c0_47 = arith.constant 0 : index
    %c0_48 = arith.constant 0 : index
    %145 = vector.load %arg11[%144, %c0_47, %c0_48] : memref<8x8x384xf32, #tpu.memory_space<vmem>>, vector<1x8x384xf32>
    %146 = vector.shape_cast %145 : vector<1x8x384xf32> to vector<8x384xf32>
    %c0_49 = arith.constant 0 : index
    %c0_50 = arith.constant 0 : index
    %147 = vector.load %arg4[%c0_49, %c0_50] : memref<128x384xf32, #tpu.memory_space<vmem>>, vector<128x384xf32>
    %cst_51 = arith.constant dense<0.000000e+00> : vector<8x384xf32>
    %148 = tpu.matmul %143, %147, %cst_51 {dimension_numbers = #tpu.dot_dimension_numbers<[1], [0], [0], [1], [0, 0, 1, 1], [], []>} : vector<8x128xf32>, vector<128x384xf32>, vector<8x384xf32> -> vector<8x384xf32>
    %149 = vector.extract_strided_slice %146 {offsets = [0, 0], sizes = [8, 128], strides = [1, 1]} : vector<8x384xf32> to vector<8x128xf32>
    %150 = vector.extract_strided_slice %148 {offsets = [0, 0], sizes = [8, 128], strides = [1, 1]} : vector<8x384xf32> to vector<8x128xf32>
    %151 = arith.addf %149, %150 : vector<8x128xf32>
    %152 = arith.negf %151 : vector<8x128xf32>
    %153 = math.exp %152 : vector<8x128xf32>
    %cst_52 = arith.constant 1.000000e+00 : f32
    %154 = vector.broadcast %cst_52 : f32 to vector<8x128xf32>
    %155 = arith.addf %154, %153 : vector<8x128xf32>
    %156 = arith.divf %154, %155 : vector<8x128xf32>
    %157 = vector.extract_strided_slice %146 {offsets = [0, 128], sizes = [8, 128], strides = [1, 1]} : vector<8x384xf32> to vector<8x128xf32>
    %158 = vector.extract_strided_slice %148 {offsets = [0, 128], sizes = [8, 128], strides = [1, 1]} : vector<8x384xf32> to vector<8x128xf32>
    %159 = arith.addf %157, %158 : vector<8x128xf32>
    %160 = arith.negf %159 : vector<8x128xf32>
    %161 = math.exp %160 : vector<8x128xf32>
    %cst_53 = arith.constant 1.000000e+00 : f32
    %162 = vector.broadcast %cst_53 : f32 to vector<8x128xf32>
    %163 = arith.addf %162, %161 : vector<8x128xf32>
    %164 = arith.divf %162, %163 : vector<8x128xf32>
    %165 = vector.extract_strided_slice %146 {offsets = [0, 256], sizes = [8, 128], strides = [1, 1]} : vector<8x384xf32> to vector<8x128xf32>
    %166 = vector.extract_strided_slice %148 {offsets = [0, 256], sizes = [8, 128], strides = [1, 1]} : vector<8x384xf32> to vector<8x128xf32>
    %167 = arith.addf %166, %14 : vector<8x128xf32>
    %168 = arith.mulf %156, %167 : vector<8x128xf32>
    %169 = arith.addf %165, %168 : vector<8x128xf32>
    %170 = math.tanh %169 : vector<8x128xf32>
    %cst_54 = arith.constant 1.000000e+00 : f32
    %171 = vector.broadcast %cst_54 : f32 to vector<8x128xf32>
    %172 = arith.subf %171, %164 : vector<8x128xf32>
    %173 = arith.mulf %172, %170 : vector<8x128xf32>
    %174 = arith.mulf %164, %143 : vector<8x128xf32>
    %175 = arith.addf %173, %174 : vector<8x128xf32>
    %c5_i32 = arith.constant 5 : i32
    %176 = arith.index_cast %c5_i32 : i32 to index
    %c0_55 = arith.constant 0 : index
    %c0_56 = arith.constant 0 : index
    %177 = vector.load %arg11[%176, %c0_55, %c0_56] : memref<8x8x384xf32, #tpu.memory_space<vmem>>, vector<1x8x384xf32>
    %178 = vector.shape_cast %177 : vector<1x8x384xf32> to vector<8x384xf32>
    %c0_57 = arith.constant 0 : index
    %c0_58 = arith.constant 0 : index
    %179 = vector.load %arg4[%c0_57, %c0_58] : memref<128x384xf32, #tpu.memory_space<vmem>>, vector<128x384xf32>
    %cst_59 = arith.constant dense<0.000000e+00> : vector<8x384xf32>
    %180 = tpu.matmul %175, %179, %cst_59 {dimension_numbers = #tpu.dot_dimension_numbers<[1], [0], [0], [1], [0, 0, 1, 1], [], []>} : vector<8x128xf32>, vector<128x384xf32>, vector<8x384xf32> -> vector<8x384xf32>
    %181 = vector.extract_strided_slice %178 {offsets = [0, 0], sizes = [8, 128], strides = [1, 1]} : vector<8x384xf32> to vector<8x128xf32>
    %182 = vector.extract_strided_slice %180 {offsets = [0, 0], sizes = [8, 128], strides = [1, 1]} : vector<8x384xf32> to vector<8x128xf32>
    %183 = arith.addf %181, %182 : vector<8x128xf32>
    %184 = arith.negf %183 : vector<8x128xf32>
    %185 = math.exp %184 : vector<8x128xf32>
    %cst_60 = arith.constant 1.000000e+00 : f32
    %186 = vector.broadcast %cst_60 : f32 to vector<8x128xf32>
    %187 = arith.addf %186, %185 : vector<8x128xf32>
    %188 = arith.divf %186, %187 : vector<8x128xf32>
    %189 = vector.extract_strided_slice %178 {offsets = [0, 128], sizes = [8, 128], strides = [1, 1]} : vector<8x384xf32> to vector<8x128xf32>
    %190 = vector.extract_strided_slice %180 {offsets = [0, 128], sizes = [8, 128], strides = [1, 1]} : vector<8x384xf32> to vector<8x128xf32>
    %191 = arith.addf %189, %190 : vector<8x128xf32>
    %192 = arith.negf %191 : vector<8x128xf32>
    %193 = math.exp %192 : vector<8x128xf32>
    %cst_61 = arith.constant 1.000000e+00 : f32
    %194 = vector.broadcast %cst_61 : f32 to vector<8x128xf32>
    %195 = arith.addf %194, %193 : vector<8x128xf32>
    %196 = arith.divf %194, %195 : vector<8x128xf32>
    %197 = vector.extract_strided_slice %178 {offsets = [0, 256], sizes = [8, 128], strides = [1, 1]} : vector<8x384xf32> to vector<8x128xf32>
    %198 = vector.extract_strided_slice %180 {offsets = [0, 256], sizes = [8, 128], strides = [1, 1]} : vector<8x384xf32> to vector<8x128xf32>
    %199 = arith.addf %198, %14 : vector<8x128xf32>
    %200 = arith.mulf %188, %199 : vector<8x128xf32>
    %201 = arith.addf %197, %200 : vector<8x128xf32>
    %202 = math.tanh %201 : vector<8x128xf32>
    %cst_62 = arith.constant 1.000000e+00 : f32
    %203 = vector.broadcast %cst_62 : f32 to vector<8x128xf32>
    %204 = arith.subf %203, %196 : vector<8x128xf32>
    %205 = arith.mulf %204, %202 : vector<8x128xf32>
    %206 = arith.mulf %196, %175 : vector<8x128xf32>
    %207 = arith.addf %205, %206 : vector<8x128xf32>
    %c6_i32 = arith.constant 6 : i32
    %208 = arith.index_cast %c6_i32 : i32 to index
    %c0_63 = arith.constant 0 : index
    %c0_64 = arith.constant 0 : index
    %209 = vector.load %arg11[%208, %c0_63, %c0_64] : memref<8x8x384xf32, #tpu.memory_space<vmem>>, vector<1x8x384xf32>
    %210 = vector.shape_cast %209 : vector<1x8x384xf32> to vector<8x384xf32>
    %c0_65 = arith.constant 0 : index
    %c0_66 = arith.constant 0 : index
    %211 = vector.load %arg4[%c0_65, %c0_66] : memref<128x384xf32, #tpu.memory_space<vmem>>, vector<128x384xf32>
    %cst_67 = arith.constant dense<0.000000e+00> : vector<8x384xf32>
    %212 = tpu.matmul %207, %211, %cst_67 {dimension_numbers = #tpu.dot_dimension_numbers<[1], [0], [0], [1], [0, 0, 1, 1], [], []>} : vector<8x128xf32>, vector<128x384xf32>, vector<8x384xf32> -> vector<8x384xf32>
    %213 = vector.extract_strided_slice %210 {offsets = [0, 0], sizes = [8, 128], strides = [1, 1]} : vector<8x384xf32> to vector<8x128xf32>
    %214 = vector.extract_strided_slice %212 {offsets = [0, 0], sizes = [8, 128], strides = [1, 1]} : vector<8x384xf32> to vector<8x128xf32>
    %215 = arith.addf %213, %214 : vector<8x128xf32>
    %216 = arith.negf %215 : vector<8x128xf32>
    %217 = math.exp %216 : vector<8x128xf32>
    %cst_68 = arith.constant 1.000000e+00 : f32
    %218 = vector.broadcast %cst_68 : f32 to vector<8x128xf32>
    %219 = arith.addf %218, %217 : vector<8x128xf32>
    %220 = arith.divf %218, %219 : vector<8x128xf32>
    %221 = vector.extract_strided_slice %210 {offsets = [0, 128], sizes = [8, 128], strides = [1, 1]} : vector<8x384xf32> to vector<8x128xf32>
    %222 = vector.extract_strided_slice %212 {offsets = [0, 128], sizes = [8, 128], strides = [1, 1]} : vector<8x384xf32> to vector<8x128xf32>
    %223 = arith.addf %221, %222 : vector<8x128xf32>
    %224 = arith.negf %223 : vector<8x128xf32>
    %225 = math.exp %224 : vector<8x128xf32>
    %cst_69 = arith.constant 1.000000e+00 : f32
    %226 = vector.broadcast %cst_69 : f32 to vector<8x128xf32>
    %227 = arith.addf %226, %225 : vector<8x128xf32>
    %228 = arith.divf %226, %227 : vector<8x128xf32>
    %229 = vector.extract_strided_slice %210 {offsets = [0, 256], sizes = [8, 128], strides = [1, 1]} : vector<8x384xf32> to vector<8x128xf32>
    %230 = vector.extract_strided_slice %212 {offsets = [0, 256], sizes = [8, 128], strides = [1, 1]} : vector<8x384xf32> to vector<8x128xf32>
    %231 = arith.addf %230, %14 : vector<8x128xf32>
    %232 = arith.mulf %220, %231 : vector<8x128xf32>
    %233 = arith.addf %229, %232 : vector<8x128xf32>
    %234 = math.tanh %233 : vector<8x128xf32>
    %cst_70 = arith.constant 1.000000e+00 : f32
    %235 = vector.broadcast %cst_70 : f32 to vector<8x128xf32>
    %236 = arith.subf %235, %228 : vector<8x128xf32>
    %237 = arith.mulf %236, %234 : vector<8x128xf32>
    %238 = arith.mulf %228, %207 : vector<8x128xf32>
    %239 = arith.addf %237, %238 : vector<8x128xf32>
    %c7_i32 = arith.constant 7 : i32
    %240 = arith.index_cast %c7_i32 : i32 to index
    %c0_71 = arith.constant 0 : index
    %c0_72 = arith.constant 0 : index
    %241 = vector.load %arg11[%240, %c0_71, %c0_72] : memref<8x8x384xf32, #tpu.memory_space<vmem>>, vector<1x8x384xf32>
    %242 = vector.shape_cast %241 : vector<1x8x384xf32> to vector<8x384xf32>
    %c0_73 = arith.constant 0 : index
    %c0_74 = arith.constant 0 : index
    %243 = vector.load %arg4[%c0_73, %c0_74] : memref<128x384xf32, #tpu.memory_space<vmem>>, vector<128x384xf32>
    %cst_75 = arith.constant dense<0.000000e+00> : vector<8x384xf32>
    %244 = tpu.matmul %239, %243, %cst_75 {dimension_numbers = #tpu.dot_dimension_numbers<[1], [0], [0], [1], [0, 0, 1, 1], [], []>} : vector<8x128xf32>, vector<128x384xf32>, vector<8x384xf32> -> vector<8x384xf32>
    %245 = vector.extract_strided_slice %242 {offsets = [0, 0], sizes = [8, 128], strides = [1, 1]} : vector<8x384xf32> to vector<8x128xf32>
    %246 = vector.extract_strided_slice %244 {offsets = [0, 0], sizes = [8, 128], strides = [1, 1]} : vector<8x384xf32> to vector<8x128xf32>
    %247 = arith.addf %245, %246 : vector<8x128xf32>
    %248 = arith.negf %247 : vector<8x128xf32>
    %249 = math.exp %248 : vector<8x128xf32>
    %cst_76 = arith.constant 1.000000e+00 : f32
    %250 = vector.broadcast %cst_76 : f32 to vector<8x128xf32>
    %251 = arith.addf %250, %249 : vector<8x128xf32>
    %252 = arith.divf %250, %251 : vector<8x128xf32>
    %253 = vector.extract_strided_slice %242 {offsets = [0, 128], sizes = [8, 128], strides = [1, 1]} : vector<8x384xf32> to vector<8x128xf32>
    %254 = vector.extract_strided_slice %244 {offsets = [0, 128], sizes = [8, 128], strides = [1, 1]} : vector<8x384xf32> to vector<8x128xf32>
    %255 = arith.addf %253, %254 : vector<8x128xf32>
    %256 = arith.negf %255 : vector<8x128xf32>
    %257 = math.exp %256 : vector<8x128xf32>
    %cst_77 = arith.constant 1.000000e+00 : f32
    %258 = vector.broadcast %cst_77 : f32 to vector<8x128xf32>
    %259 = arith.addf %258, %257 : vector<8x128xf32>
    %260 = arith.divf %258, %259 : vector<8x128xf32>
    %261 = vector.extract_strided_slice %242 {offsets = [0, 256], sizes = [8, 128], strides = [1, 1]} : vector<8x384xf32> to vector<8x128xf32>
    %262 = vector.extract_strided_slice %244 {offsets = [0, 256], sizes = [8, 128], strides = [1, 1]} : vector<8x384xf32> to vector<8x128xf32>
    %263 = arith.addf %262, %14 : vector<8x128xf32>
    %264 = arith.mulf %252, %263 : vector<8x128xf32>
    %265 = arith.addf %261, %264 : vector<8x128xf32>
    %266 = math.tanh %265 : vector<8x128xf32>
    %cst_78 = arith.constant 1.000000e+00 : f32
    %267 = vector.broadcast %cst_78 : f32 to vector<8x128xf32>
    %268 = arith.subf %267, %260 : vector<8x128xf32>
    %269 = arith.mulf %268, %266 : vector<8x128xf32>
    %270 = arith.mulf %260, %239 : vector<8x128xf32>
    %271 = arith.addf %269, %270 : vector<8x128xf32>
    %c8_i32 = arith.constant 8 : i32
    %c0_79 = arith.constant 0 : index
    %c0_80 = arith.constant 0 : index
    %272 = vector.load %arg10[%c0_79, %c0_80] : memref<8x128xf32, #tpu.memory_space<vmem>>, vector<8x128xf32>
    tpu.vector_store %arg10[%c0_79, %c0_80], %271 {strides = array<i32>} : memref<8x128xf32, #tpu.memory_space<vmem>>, vector<8x128xf32>,
    %c0_i32_81 = arith.constant 0 : i32
    %273 = arith.cmpi eq, %arg1, %c0_i32_81 : i32
    %274 = arith.extui %273 : i1 to i32
    %c0_i32_82 = arith.constant 0 : i32
    %275 = arith.cmpi ne, %274, %c0_i32_82 : i32
    scf.if %275 {
      %c0_83 = arith.constant 0 : index
      %c0_84 = arith.constant 0 : index
      %276 = vector.load %arg10[%c0_83, %c0_84] : memref<8x128xf32, #tpu.memory_space<vmem>>, vector<8x128xf32>
      %c0_85 = arith.constant 0 : index
      %c0_86 = arith.constant 0 : index
      %277 = vector.load %arg7[%c0_85, %c0_86] : memref<128x128xf32, #tpu.memory_space<vmem>>, vector<128x128xf32>
      %cst_87 = arith.constant dense<0.000000e+00> : vector<8x128xf32>
      %278 = tpu.matmul %276, %277, %cst_87 {dimension_numbers = #tpu.dot_dimension_numbers<[1], [0], [0], [1], [0, 0, 1, 1], [], []>} : vector<8x128xf32>, vector<128x128xf32>, vector<8x128xf32> -> vector<8x128xf32>
      %c0_88 = arith.constant 0 : index
      %c0_89 = arith.constant 0 : index
      %279 = vector.load %arg8[%c0_88, %c0_89] : memref<1x128xf32, #tpu.memory_space<vmem>>, vector<1x128xf32>
      %280 = vector.broadcast %279 : vector<1x128xf32> to vector<8x128xf32>
      %281 = arith.addf %278, %280 : vector<8x128xf32>
      %c0_90 = arith.constant 0 : index
      %c0_91 = arith.constant 0 : index
      %282 = vector.load %arg9[%c0_90, %c0_91] : memref<8x128xf32, #tpu.memory_space<vmem>>, vector<8x128xf32>
      tpu.vector_store %arg9[%c0_90, %c0_91], %281 {strides = array<i32>} : memref<8x128xf32, #tpu.memory_space<vmem>>, vector<8x128xf32>,
    } else {
    }
    return
  }
  func.func @transform_0(%arg0: i32, %arg1: i32) -> (i32, i32, i32) {
    %c0_i32 = arith.constant 0 : i32
    %c0_i32_0 = arith.constant 0 : i32
    return %arg1, %arg0, %c0_i32 : i32, i32, i32
  }
  func.func @transform_1(%arg0: i32, %arg1: i32) -> (i32, i32) {
    %c0_i32 = arith.constant 0 : i32
    %c0_i32_0 = arith.constant 0 : i32
    %c0_i32_1 = arith.constant 0 : i32
    return %c0_i32, %c0_i32_0 : i32, i32
  }
  func.func @transform_2(%arg0: i32, %arg1: i32) -> (i32, i32) {
    %c0_i32 = arith.constant 0 : i32
    %c0_i32_0 = arith.constant 0 : i32
    %c0_i32_1 = arith.constant 0 : i32
    return %c0_i32, %c0_i32_0 : i32, i32
  }
  func.func @transform_3(%arg0: i32, %arg1: i32) -> (i32, i32) {
    %c0_i32 = arith.constant 0 : i32
    %c0_i32_0 = arith.constant 0 : i32
    %c0_i32_1 = arith.constant 0 : i32
    return %c0_i32, %c0_i32_0 : i32, i32
  }
  func.func @transform_4(%arg0: i32, %arg1: i32) -> (i32, i32) {
    %c0_i32 = arith.constant 0 : i32
    %c0_i32_0 = arith.constant 0 : i32
    %c0_i32_1 = arith.constant 0 : i32
    return %c0_i32, %c0_i32_0 : i32, i32
  }
  func.func @transform_5(%arg0: i32, %arg1: i32) -> (i32, i32) {
    %c0_i32 = arith.constant 0 : i32
    %c0_i32_0 = arith.constant 0 : i32
    %c0_i32_1 = arith.constant 0 : i32
    return %c0_i32, %c0_i32_0 : i32, i32
  }
  func.func @transform_6(%arg0: i32, %arg1: i32) -> (i32, i32) {
    %c0_i32 = arith.constant 0 : i32
    %c0_i32_0 = arith.constant 0 : i32
    %c0_i32_1 = arith.constant 0 : i32
    return %c0_i32, %c0_i32_0 : i32, i32
  }
  func.func @transform_7(%arg0: i32, %arg1: i32) -> (i32, i32) {
    %c0_i32 = arith.constant 0 : i32
    %c0_i32_0 = arith.constant 0 : i32
    return %arg0, %c0_i32 : i32, i32
  }
}

module attributes {stable_mosaic.version = 11 : i64} {
  func.func @kernel(%arg0: i32, %arg1: i32, %arg2: memref<8x8x16xf32, #tpu.memory_space<vmem>>, %arg3: memref<16x384xf32, #tpu.memory_space<vmem>>, %arg4: memref<128x384xf32, #tpu.memory_space<vmem>>, %arg5: memref<1x384xf32, #tpu.memory_space<vmem>>, %arg6: memref<1x128xf32, #tpu.memory_space<vmem>>, %arg7: memref<128x128xf32, #tpu.memory_space<vmem>>, %arg8: memref<1x128xf32, #tpu.memory_space<vmem>>, %arg9: memref<8x128xf32, #tpu.memory_space<vmem>>, %arg10: memref<8x128xf32, #tpu.memory_space<vmem>>, %arg11: memref<8x8x384xf32, #tpu.memory_space<vmem>>) attributes {dimension_semantics = [#tpu.dimension_semantics<parallel>, #tpu.dimension_semantics<arbitrary>], iteration_bounds = array<i64: 1, 1>, scalar_prefetch = 0 : i64, scratch_operands = 2 : i64, tpu.core_type = #tpu.core_type<tc>, window_params = [{transform_indices = @transform_0, window_bounds = array<i64: 8, 8, 16>}, {pipeline_mode = #tpu.pipeline_mode<synchronous>, transform_indices = @transform_1, window_bounds = array<i64: 16, 384>}, {pipeline_mode = #tpu.pipeline_mode<synchronous>, transform_indices = @transform_2, window_bounds = array<i64: 128, 384>}, {pipeline_mode = #tpu.pipeline_mode<synchronous>, transform_indices = @transform_3, window_bounds = array<i64: 1, 384>}, {pipeline_mode = #tpu.pipeline_mode<synchronous>, transform_indices = @transform_4, window_bounds = array<i64: 1, 128>}, {pipeline_mode = #tpu.pipeline_mode<synchronous>, transform_indices = @transform_5, window_bounds = array<i64: 128, 128>}, {pipeline_mode = #tpu.pipeline_mode<synchronous>, transform_indices = @transform_6, window_bounds = array<i64: 1, 128>}, {transform_indices = @transform_7, window_bounds = array<i64: 8, 128>}]} {
    %c0_i32 = arith.constant 0 : i32
    %0 = arith.cmpi eq, %arg1, %c0_i32 : i32
    %1 = arith.extui %0 : i1 to i32
    %c0_i32_0 = arith.constant 0 : i32
    %2 = arith.cmpi ne, %1, %c0_i32_0 : i32
    scf.if %2 {
      %cst_83 = arith.constant 0.000000e+00 : f32
      %276 = vector.broadcast %cst_83 : f32 to vector<8x128xf32>
      %c0_84 = arith.constant 0 : index
      %c0_85 = arith.constant 0 : index
      %277 = vector.load %arg10[%c0_84, %c0_85] : memref<8x128xf32, #tpu.memory_space<vmem>>, vector<8x128xf32>
      tpu.vector_store %arg10[%c0_84, %c0_85], %276 {strides = array<i32>} : memref<8x128xf32, #tpu.memory_space<vmem>>, vector<8x128xf32>,
    } else {
    }
    %c0 = arith.constant 0 : index
    %c0_1 = arith.constant 0 : index
    %c0_2 = arith.constant 0 : index
    %3 = vector.load %arg2[%c0, %c0_1, %c0_2] : memref<8x8x16xf32, #tpu.memory_space<vmem>>, vector<8x8x16xf32>
    %4 = vector.shape_cast %3 : vector<8x8x16xf32> to vector<64x16xf32>
    %c0_3 = arith.constant 0 : index
    %c0_4 = arith.constant 0 : index
    %5 = vector.load %arg3[%c0_3, %c0_4] : memref<16x384xf32, #tpu.memory_space<vmem>>, vector<16x384xf32>
    %cst = arith.constant dense<0.000000e+00> : vector<64x384xf32>
    %6 = tpu.matmul %4, %5, %cst {dimension_numbers = #tpu.dot_dimension_numbers<[1], [0], [0], [1], [0, 0, 1, 1], [], []>} : vector<64x16xf32>, vector<16x384xf32>, vector<64x384xf32> -> vector<64x384xf32>
    %c0_5 = arith.constant 0 : index
    %c0_6 = arith.constant 0 : index
    %7 = vector.load %arg5[%c0_5, %c0_6] : memref<1x384xf32, #tpu.memory_space<vmem>>, vector<1x384xf32>
    %8 = vector.broadcast %7 : vector<1x384xf32> to vector<64x384xf32>
    %9 = arith.addf %6, %8 : vector<64x384xf32>
    %10 = vector.shape_cast %9 : vector<64x384xf32> to vector<8x8x384xf32>
    %c0_7 = arith.constant 0 : index
    %c0_8 = arith.constant 0 : index
    %c0_9 = arith.constant 0 : index
    %11 = vector.load %arg11[%c0_7, %c0_8, %c0_9] : memref<8x8x384xf32, #tpu.memory_space<vmem>>, vector<8x8x384xf32>
    tpu.vector_store %arg11[%c0_7, %c0_8, %c0_9], %10 {strides = array<i32>} : memref<8x8x384xf32, #tpu.memory_space<vmem>>, vector<8x8x384xf32>,
    %c0_10 = arith.constant 0 : index
    %c0_11 = arith.constant 0 : index
    %12 = vector.load %arg6[%c0_10, %c0_11] : memref<1x128xf32, #tpu.memory_space<vmem>>, vector<1x128xf32>
    %13 = vector.shape_cast %12 : vector<1x128xf32> to vector<1x128xf32>
    %14 = vector.broadcast %13 : vector<1x128xf32> to vector<8x128xf32>
    %c0_12 = arith.constant 0 : index
    %c0_13 = arith.constant 0 : index
    %15 = vector.load %arg10[%c0_12, %c0_13] : memref<8x128xf32, #tpu.memory_space<vmem>>, vector<8x128xf32>
    %c0_i32_14 = arith.constant 0 : i32
    %16 = arith.index_cast %c0_i32_14 : i32 to index
    %c0_15 = arith.constant 0 : index
    %c0_16 = arith.constant 0 : index
    %17 = vector.load %arg11[%16, %c0_15, %c0_16] : memref<8x8x384xf32, #tpu.memory_space<vmem>>, vector<1x8x384xf32>
    %18 = vector.shape_cast %17 : vector<1x8x384xf32> to vector<8x384xf32>
    %c0_17 = arith.constant 0 : index
    %c0_18 = arith.constant 0 : index
    %19 = vector.load %arg4[%c0_17, %c0_18] : memref<128x384xf32, #tpu.memory_space<vmem>>, vector<128x384xf32>
    %cst_19 = arith.constant dense<0.000000e+00> : vector<8x384xf32>
    %20 = tpu.matmul %15, %19, %cst_19 {dimension_numbers = #tpu.dot_dimension_numbers<[1], [0], [0], [1], [0, 0, 1, 1], [], []>} : vector<8x128xf32>, vector<128x384xf32>, vector<8x384xf32> -> vector<8x384xf32>
    %21 = vector.extract_strided_slice %18 {offsets = [0, 0], sizes = [8, 128], strides = [1, 1]} : vector<8x384xf32> to vector<8x128xf32>
    %22 = vector.extract_strided_slice %20 {offsets = [0, 0], sizes = [8, 128], strides = [1, 1]} : vector<8x384xf32> to vector<8x128xf32>
    %23 = arith.addf %21, %22 : vector<8x128xf32>
    %24 = arith.negf %23 : vector<8x128xf32>
    %25 = math.exp %24 : vector<8x128xf32>
    %cst_20 = arith.constant 1.000000e+00 : f32
    %26 = vector.broadcast %cst_20 : f32 to vector<8x128xf32>
    %27 = arith.addf %26, %25 : vector<8x128xf32>
    %28 = arith.divf %26, %27 : vector<8x128xf32>
    %29 = vector.extract_strided_slice %18 {offsets = [0, 128], sizes = [8, 128], strides = [1, 1]} : vector<8x384xf32> to vector<8x128xf32>
    %30 = vector.extract_strided_slice %20 {offsets = [0, 128], sizes = [8, 128], strides = [1, 1]} : vector<8x384xf32> to vector<8x128xf32>
    %31 = arith.addf %29, %30 : vector<8x128xf32>
    %32 = arith.negf %31 : vector<8x128xf32>
    %33 = math.exp %32 : vector<8x128xf32>
    %cst_21 = arith.constant 1.000000e+00 : f32
    %34 = vector.broadcast %cst_21 : f32 to vector<8x128xf32>
    %35 = arith.addf %34, %33 : vector<8x128xf32>
    %36 = arith.divf %34, %35 : vector<8x128xf32>
    %37 = vector.extract_strided_slice %18 {offsets = [0, 256], sizes = [8, 128], strides = [1, 1]} : vector<8x384xf32> to vector<8x128xf32>
    %38 = vector.extract_strided_slice %20 {offsets = [0, 256], sizes = [8, 128], strides = [1, 1]} : vector<8x384xf32> to vector<8x128xf32>
    %39 = arith.addf %38, %14 : vector<8x128xf32>
    %40 = arith.mulf %28, %39 : vector<8x128xf32>
    %41 = arith.addf %37, %40 : vector<8x128xf32>
    %42 = math.tanh %41 : vector<8x128xf32>
    %cst_22 = arith.constant 1.000000e+00 : f32
    %43 = vector.broadcast %cst_22 : f32 to vector<8x128xf32>
    %44 = arith.subf %43, %36 : vector<8x128xf32>
    %45 = arith.mulf %44, %42 : vector<8x128xf32>
    %46 = arith.mulf %36, %15 : vector<8x128xf32>
    %47 = arith.addf %45, %46 : vector<8x128xf32>
    %c1_i32 = arith.constant 1 : i32
    %48 = arith.index_cast %c1_i32 : i32 to index
    %c0_23 = arith.constant 0 : index
    %c0_24 = arith.constant 0 : index
    %49 = vector.load %arg11[%48, %c0_23, %c0_24] : memref<8x8x384xf32, #tpu.memory_space<vmem>>, vector<1x8x384xf32>
    %50 = vector.shape_cast %49 : vector<1x8x384xf32> to vector<8x384xf32>
    %c0_25 = arith.constant 0 : index
    %c0_26 = arith.constant 0 : index
    %51 = vector.load %arg4[%c0_25, %c0_26] : memref<128x384xf32, #tpu.memory_space<vmem>>, vector<128x384xf32>
    %cst_27 = arith.constant dense<0.000000e+00> : vector<8x384xf32>
    %52 = tpu.matmul %47, %51, %cst_27 {dimension_numbers = #tpu.dot_dimension_numbers<[1], [0], [0], [1], [0, 0, 1, 1], [], []>} : vector<8x128xf32>, vector<128x384xf32>, vector<8x384xf32> -> vector<8x384xf32>
    %53 = vector.extract_strided_slice %50 {offsets = [0, 0], sizes = [8, 128], strides = [1, 1]} : vector<8x384xf32> to vector<8x128xf32>
    %54 = vector.extract_strided_slice %52 {offsets = [0, 0], sizes = [8, 128], strides = [1, 1]} : vector<8x384xf32> to vector<8x128xf32>
    %55 = arith.addf %53, %54 : vector<8x128xf32>
    %56 = arith.negf %55 : vector<8x128xf32>
    %57 = math.exp %56 : vector<8x128xf32>
    %cst_28 = arith.constant 1.000000e+00 : f32
    %58 = vector.broadcast %cst_28 : f32 to vector<8x128xf32>
    %59 = arith.addf %58, %57 : vector<8x128xf32>
    %60 = arith.divf %58, %59 : vector<8x128xf32>
    %61 = vector.extract_strided_slice %50 {offsets = [0, 128], sizes = [8, 128], strides = [1, 1]} : vector<8x384xf32> to vector<8x128xf32>
    %62 = vector.extract_strided_slice %52 {offsets = [0, 128], sizes = [8, 128], strides = [1, 1]} : vector<8x384xf32> to vector<8x128xf32>
    %63 = arith.addf %61, %62 : vector<8x128xf32>
    %64 = arith.negf %63 : vector<8x128xf32>
    %65 = math.exp %64 : vector<8x128xf32>
    %cst_29 = arith.constant 1.000000e+00 : f32
    %66 = vector.broadcast %cst_29 : f32 to vector<8x128xf32>
    %67 = arith.addf %66, %65 : vector<8x128xf32>
    %68 = arith.divf %66, %67 : vector<8x128xf32>
    %69 = vector.extract_strided_slice %50 {offsets = [0, 256], sizes = [8, 128], strides = [1, 1]} : vector<8x384xf32> to vector<8x128xf32>
    %70 = vector.extract_strided_slice %52 {offsets = [0, 256], sizes = [8, 128], strides = [1, 1]} : vector<8x384xf32> to vector<8x128xf32>
    %71 = arith.addf %70, %14 : vector<8x128xf32>
    %72 = arith.mulf %60, %71 : vector<8x128xf32>
    %73 = arith.addf %69, %72 : vector<8x128xf32>
    %74 = math.tanh %73 : vector<8x128xf32>
    %cst_30 = arith.constant 1.000000e+00 : f32
    %75 = vector.broadcast %cst_30 : f32 to vector<8x128xf32>
    %76 = arith.subf %75, %68 : vector<8x128xf32>
    %77 = arith.mulf %76, %74 : vector<8x128xf32>
    %78 = arith.mulf %68, %47 : vector<8x128xf32>
    %79 = arith.addf %77, %78 : vector<8x128xf32>
    %c2_i32 = arith.constant 2 : i32
    %80 = arith.index_cast %c2_i32 : i32 to index
    %c0_31 = arith.constant 0 : index
    %c0_32 = arith.constant 0 : index
    %81 = vector.load %arg11[%80, %c0_31, %c0_32] : memref<8x8x384xf32, #tpu.memory_space<vmem>>, vector<1x8x384xf32>
    %82 = vector.shape_cast %81 : vector<1x8x384xf32> to vector<8x384xf32>
    %c0_33 = arith.constant 0 : index
    %c0_34 = arith.constant 0 : index
    %83 = vector.load %arg4[%c0_33, %c0_34] : memref<128x384xf32, #tpu.memory_space<vmem>>, vector<128x384xf32>
    %cst_35 = arith.constant dense<0.000000e+00> : vector<8x384xf32>
    %84 = tpu.matmul %79, %83, %cst_35 {dimension_numbers = #tpu.dot_dimension_numbers<[1], [0], [0], [1], [0, 0, 1, 1], [], []>} : vector<8x128xf32>, vector<128x384xf32>, vector<8x384xf32> -> vector<8x384xf32>
    %85 = vector.extract_strided_slice %82 {offsets = [0, 0], sizes = [8, 128], strides = [1, 1]} : vector<8x384xf32> to vector<8x128xf32>
    %86 = vector.extract_strided_slice %84 {offsets = [0, 0], sizes = [8, 128], strides = [1, 1]} : vector<8x384xf32> to vector<8x128xf32>
    %87 = arith.addf %85, %86 : vector<8x128xf32>
    %88 = arith.negf %87 : vector<8x128xf32>
    %89 = math.exp %88 : vector<8x128xf32>
    %cst_36 = arith.constant 1.000000e+00 : f32
    %90 = vector.broadcast %cst_36 : f32 to vector<8x128xf32>
    %91 = arith.addf %90, %89 : vector<8x128xf32>
    %92 = arith.divf %90, %91 : vector<8x128xf32>
    %93 = vector.extract_strided_slice %82 {offsets = [0, 128], sizes = [8, 128], strides = [1, 1]} : vector<8x384xf32> to vector<8x128xf32>
    %94 = vector.extract_strided_slice %84 {offsets = [0, 128], sizes = [8, 128], strides = [1, 1]} : vector<8x384xf32> to vector<8x128xf32>
    %95 = arith.addf %93, %94 : vector<8x128xf32>
    %96 = arith.negf %95 : vector<8x128xf32>
    %97 = math.exp %96 : vector<8x128xf32>
    %cst_37 = arith.constant 1.000000e+00 : f32
    %98 = vector.broadcast %cst_37 : f32 to vector<8x128xf32>
    %99 = arith.addf %98, %97 : vector<8x128xf32>
    %100 = arith.divf %98, %99 : vector<8x128xf32>
    %101 = vector.extract_strided_slice %82 {offsets = [0, 256], sizes = [8, 128], strides = [1, 1]} : vector<8x384xf32> to vector<8x128xf32>
    %102 = vector.extract_strided_slice %84 {offsets = [0, 256], sizes = [8, 128], strides = [1, 1]} : vector<8x384xf32> to vector<8x128xf32>
    %103 = arith.addf %102, %14 : vector<8x128xf32>
    %104 = arith.mulf %92, %103 : vector<8x128xf32>
    %105 = arith.addf %101, %104 : vector<8x128xf32>
    %106 = math.tanh %105 : vector<8x128xf32>
    %cst_38 = arith.constant 1.000000e+00 : f32
    %107 = vector.broadcast %cst_38 : f32 to vector<8x128xf32>
    %108 = arith.subf %107, %100 : vector<8x128xf32>
    %109 = arith.mulf %108, %106 : vector<8x128xf32>
    %110 = arith.mulf %100, %79 : vector<8x128xf32>
    %111 = arith.addf %109, %110 : vector<8x128xf32>
    %c3_i32 = arith.constant 3 : i32
    %112 = arith.index_cast %c3_i32 : i32 to index
    %c0_39 = arith.constant 0 : index
    %c0_40 = arith.constant 0 : index
    %113 = vector.load %arg11[%112, %c0_39, %c0_40] : memref<8x8x384xf32, #tpu.memory_space<vmem>>, vector<1x8x384xf32>
    %114 = vector.shape_cast %113 : vector<1x8x384xf32> to vector<8x384xf32>
    %c0_41 = arith.constant 0 : index
    %c0_42 = arith.constant 0 : index
    %115 = vector.load %arg4[%c0_41, %c0_42] : memref<128x384xf32, #tpu.memory_space<vmem>>, vector<128x384xf32>
    %cst_43 = arith.constant dense<0.000000e+00> : vector<8x384xf32>
    %116 = tpu.matmul %111, %115, %cst_43 {dimension_numbers = #tpu.dot_dimension_numbers<[1], [0], [0], [1], [0, 0, 1, 1], [], []>} : vector<8x128xf32>, vector<128x384xf32>, vector<8x384xf32> -> vector<8x384xf32>
    %117 = vector.extract_strided_slice %114 {offsets = [0, 0], sizes = [8, 128], strides = [1, 1]} : vector<8x384xf32> to vector<8x128xf32>
    %118 = vector.extract_strided_slice %116 {offsets = [0, 0], sizes = [8, 128], strides = [1, 1]} : vector<8x384xf32> to vector<8x128xf32>
    %119 = arith.addf %117, %118 : vector<8x128xf32>
    %120 = arith.negf %119 : vector<8x128xf32>
    %121 = math.exp %120 : vector<8x128xf32>
    %cst_44 = arith.constant 1.000000e+00 : f32
    %122 = vector.broadcast %cst_44 : f32 to vector<8x128xf32>
    %123 = arith.addf %122, %121 : vector<8x128xf32>
    %124 = arith.divf %122, %123 : vector<8x128xf32>
    %125 = vector.extract_strided_slice %114 {offsets = [0, 128], sizes = [8, 128], strides = [1, 1]} : vector<8x384xf32> to vector<8x128xf32>
    %126 = vector.extract_strided_slice %116 {offsets = [0, 128], sizes = [8, 128], strides = [1, 1]} : vector<8x384xf32> to vector<8x128xf32>
    %127 = arith.addf %125, %126 : vector<8x128xf32>
    %128 = arith.negf %127 : vector<8x128xf32>
    %129 = math.exp %128 : vector<8x128xf32>
    %cst_45 = arith.constant 1.000000e+00 : f32
    %130 = vector.broadcast %cst_45 : f32 to vector<8x128xf32>
    %131 = arith.addf %130, %129 : vector<8x128xf32>
    %132 = arith.divf %130, %131 : vector<8x128xf32>
    %133 = vector.extract_strided_slice %114 {offsets = [0, 256], sizes = [8, 128], strides = [1, 1]} : vector<8x384xf32> to vector<8x128xf32>
    %134 = vector.extract_strided_slice %116 {offsets = [0, 256], sizes = [8, 128], strides = [1, 1]} : vector<8x384xf32> to vector<8x128xf32>
    %135 = arith.addf %134, %14 : vector<8x128xf32>
    %136 = arith.mulf %124, %135 : vector<8x128xf32>
    %137 = arith.addf %133, %136 : vector<8x128xf32>
    %138 = math.tanh %137 : vector<8x128xf32>
    %cst_46 = arith.constant 1.000000e+00 : f32
    %139 = vector.broadcast %cst_46 : f32 to vector<8x128xf32>
    %140 = arith.subf %139, %132 : vector<8x128xf32>
    %141 = arith.mulf %140, %138 : vector<8x128xf32>
    %142 = arith.mulf %132, %111 : vector<8x128xf32>
    %143 = arith.addf %141, %142 : vector<8x128xf32>
    %c4_i32 = arith.constant 4 : i32
    %144 = arith.index_cast %c4_i32 : i32 to index
    %c0_47 = arith.constant 0 : index
    %c0_48 = arith.constant 0 : index
    %145 = vector.load %arg11[%144, %c0_47, %c0_48] : memref<8x8x384xf32, #tpu.memory_space<vmem>>, vector<1x8x384xf32>
    %146 = vector.shape_cast %145 : vector<1x8x384xf32> to vector<8x384xf32>
    %c0_49 = arith.constant 0 : index
    %c0_50 = arith.constant 0 : index
    %147 = vector.load %arg4[%c0_49, %c0_50] : memref<128x384xf32, #tpu.memory_space<vmem>>, vector<128x384xf32>
    %cst_51 = arith.constant dense<0.000000e+00> : vector<8x384xf32>
    %148 = tpu.matmul %143, %147, %cst_51 {dimension_numbers = #tpu.dot_dimension_numbers<[1], [0], [0], [1], [0, 0, 1, 1], [], []>} : vector<8x128xf32>, vector<128x384xf32>, vector<8x384xf32> -> vector<8x384xf32>
    %149 = vector.extract_strided_slice %146 {offsets = [0, 0], sizes = [8, 128], strides = [1, 1]} : vector<8x384xf32> to vector<8x128xf32>
    %150 = vector.extract_strided_slice %148 {offsets = [0, 0], sizes = [8, 128], strides = [1, 1]} : vector<8x384xf32> to vector<8x128xf32>
    %151 = arith.addf %149, %150 : vector<8x128xf32>
    %152 = arith.negf %151 : vector<8x128xf32>
    %153 = math.exp %152 : vector<8x128xf32>
    %cst_52 = arith.constant 1.000000e+00 : f32
    %154 = vector.broadcast %cst_52 : f32 to vector<8x128xf32>
    %155 = arith.addf %154, %153 : vector<8x128xf32>
    %156 = arith.divf %154, %155 : vector<8x128xf32>
    %157 = vector.extract_strided_slice %146 {offsets = [0, 128], sizes = [8, 128], strides = [1, 1]} : vector<8x384xf32> to vector<8x128xf32>
    %158 = vector.extract_strided_slice %148 {offsets = [0, 128], sizes = [8, 128], strides = [1, 1]} : vector<8x384xf32> to vector<8x128xf32>
    %159 = arith.addf %157, %158 : vector<8x128xf32>
    %160 = arith.negf %159 : vector<8x128xf32>
    %161 = math.exp %160 : vector<8x128xf32>
    %cst_53 = arith.constant 1.000000e+00 : f32
    %162 = vector.broadcast %cst_53 : f32 to vector<8x128xf32>
    %163 = arith.addf %162, %161 : vector<8x128xf32>
    %164 = arith.divf %162, %163 : vector<8x128xf32>
    %165 = vector.extract_strided_slice %146 {offsets = [0, 256], sizes = [8, 128], strides = [1, 1]} : vector<8x384xf32> to vector<8x128xf32>
    %166 = vector.extract_strided_slice %148 {offsets = [0, 256], sizes = [8, 128], strides = [1, 1]} : vector<8x384xf32> to vector<8x128xf32>
    %167 = arith.addf %166, %14 : vector<8x128xf32>
    %168 = arith.mulf %156, %167 : vector<8x128xf32>
    %169 = arith.addf %165, %168 : vector<8x128xf32>
    %170 = math.tanh %169 : vector<8x128xf32>
    %cst_54 = arith.constant 1.000000e+00 : f32
    %171 = vector.broadcast %cst_54 : f32 to vector<8x128xf32>
    %172 = arith.subf %171, %164 : vector<8x128xf32>
    %173 = arith.mulf %172, %170 : vector<8x128xf32>
    %174 = arith.mulf %164, %143 : vector<8x128xf32>
    %175 = arith.addf %173, %174 : vector<8x128xf32>
    %c5_i32 = arith.constant 5 : i32
    %176 = arith.index_cast %c5_i32 : i32 to index
    %c0_55 = arith.constant 0 : index
    %c0_56 = arith.constant 0 : index
    %177 = vector.load %arg11[%176, %c0_55, %c0_56] : memref<8x8x384xf32, #tpu.memory_space<vmem>>, vector<1x8x384xf32>
    %178 = vector.shape_cast %177 : vector<1x8x384xf32> to vector<8x384xf32>
    %c0_57 = arith.constant 0 : index
    %c0_58 = arith.constant 0 : index
    %179 = vector.load %arg4[%c0_57, %c0_58] : memref<128x384xf32, #tpu.memory_space<vmem>>, vector<128x384xf32>
    %cst_59 = arith.constant dense<0.000000e+00> : vector<8x384xf32>
    %180 = tpu.matmul %175, %179, %cst_59 {dimension_numbers = #tpu.dot_dimension_numbers<[1], [0], [0], [1], [0, 0, 1, 1], [], []>} : vector<8x128xf32>, vector<128x384xf32>, vector<8x384xf32> -> vector<8x384xf32>
    %181 = vector.extract_strided_slice %178 {offsets = [0, 0], sizes = [8, 128], strides = [1, 1]} : vector<8x384xf32> to vector<8x128xf32>
    %182 = vector.extract_strided_slice %180 {offsets = [0, 0], sizes = [8, 128], strides = [1, 1]} : vector<8x384xf32> to vector<8x128xf32>
    %183 = arith.addf %181, %182 : vector<8x128xf32>
    %184 = arith.negf %183 : vector<8x128xf32>
    %185 = math.exp %184 : vector<8x128xf32>
    %cst_60 = arith.constant 1.000000e+00 : f32
    %186 = vector.broadcast %cst_60 : f32 to vector<8x128xf32>
    %187 = arith.addf %186, %185 : vector<8x128xf32>
    %188 = arith.divf %186, %187 : vector<8x128xf32>
    %189 = vector.extract_strided_slice %178 {offsets = [0, 128], sizes = [8, 128], strides = [1, 1]} : vector<8x384xf32> to vector<8x128xf32>
    %190 = vector.extract_strided_slice %180 {offsets = [0, 128], sizes = [8, 128], strides = [1, 1]} : vector<8x384xf32> to vector<8x128xf32>
    %191 = arith.addf %189, %190 : vector<8x128xf32>
    %192 = arith.negf %191 : vector<8x128xf32>
    %193 = math.exp %192 : vector<8x128xf32>
    %cst_61 = arith.constant 1.000000e+00 : f32
    %194 = vector.broadcast %cst_61 : f32 to vector<8x128xf32>
    %195 = arith.addf %194, %193 : vector<8x128xf32>
    %196 = arith.divf %194, %195 : vector<8x128xf32>
    %197 = vector.extract_strided_slice %178 {offsets = [0, 256], sizes = [8, 128], strides = [1, 1]} : vector<8x384xf32> to vector<8x128xf32>
    %198 = vector.extract_strided_slice %180 {offsets = [0, 256], sizes = [8, 128], strides = [1, 1]} : vector<8x384xf32> to vector<8x128xf32>
    %199 = arith.addf %198, %14 : vector<8x128xf32>
    %200 = arith.mulf %188, %199 : vector<8x128xf32>
    %201 = arith.addf %197, %200 : vector<8x128xf32>
    %202 = math.tanh %201 : vector<8x128xf32>
    %cst_62 = arith.constant 1.000000e+00 : f32
    %203 = vector.broadcast %cst_62 : f32 to vector<8x128xf32>
    %204 = arith.subf %203, %196 : vector<8x128xf32>
    %205 = arith.mulf %204, %202 : vector<8x128xf32>
    %206 = arith.mulf %196, %175 : vector<8x128xf32>
    %207 = arith.addf %205, %206 : vector<8x128xf32>
    %c6_i32 = arith.constant 6 : i32
    %208 = arith.index_cast %c6_i32 : i32 to index
    %c0_63 = arith.constant 0 : index
    %c0_64 = arith.constant 0 : index
    %209 = vector.load %arg11[%208, %c0_63, %c0_64] : memref<8x8x384xf32, #tpu.memory_space<vmem>>, vector<1x8x384xf32>
    %210 = vector.shape_cast %209 : vector<1x8x384xf32> to vector<8x384xf32>
    %c0_65 = arith.constant 0 : index
    %c0_66 = arith.constant 0 : index
    %211 = vector.load %arg4[%c0_65, %c0_66] : memref<128x384xf32, #tpu.memory_space<vmem>>, vector<128x384xf32>
    %cst_67 = arith.constant dense<0.000000e+00> : vector<8x384xf32>
    %212 = tpu.matmul %207, %211, %cst_67 {dimension_numbers = #tpu.dot_dimension_numbers<[1], [0], [0], [1], [0, 0, 1, 1], [], []>} : vector<8x128xf32>, vector<128x384xf32>, vector<8x384xf32> -> vector<8x384xf32>
    %213 = vector.extract_strided_slice %210 {offsets = [0, 0], sizes = [8, 128], strides = [1, 1]} : vector<8x384xf32> to vector<8x128xf32>
    %214 = vector.extract_strided_slice %212 {offsets = [0, 0], sizes = [8, 128], strides = [1, 1]} : vector<8x384xf32> to vector<8x128xf32>
    %215 = arith.addf %213, %214 : vector<8x128xf32>
    %216 = arith.negf %215 : vector<8x128xf32>
    %217 = math.exp %216 : vector<8x128xf32>
    %cst_68 = arith.constant 1.000000e+00 : f32
    %218 = vector.broadcast %cst_68 : f32 to vector<8x128xf32>
    %219 = arith.addf %218, %217 : vector<8x128xf32>
    %220 = arith.divf %218, %219 : vector<8x128xf32>
    %221 = vector.extract_strided_slice %210 {offsets = [0, 128], sizes = [8, 128], strides = [1, 1]} : vector<8x384xf32> to vector<8x128xf32>
    %222 = vector.extract_strided_slice %212 {offsets = [0, 128], sizes = [8, 128], strides = [1, 1]} : vector<8x384xf32> to vector<8x128xf32>
    %223 = arith.addf %221, %222 : vector<8x128xf32>
    %224 = arith.negf %223 : vector<8x128xf32>
    %225 = math.exp %224 : vector<8x128xf32>
    %cst_69 = arith.constant 1.000000e+00 : f32
    %226 = vector.broadcast %cst_69 : f32 to vector<8x128xf32>
    %227 = arith.addf %226, %225 : vector<8x128xf32>
    %228 = arith.divf %226, %227 : vector<8x128xf32>
    %229 = vector.extract_strided_slice %210 {offsets = [0, 256], sizes = [8, 128], strides = [1, 1]} : vector<8x384xf32> to vector<8x128xf32>
    %230 = vector.extract_strided_slice %212 {offsets = [0, 256], sizes = [8, 128], strides = [1, 1]} : vector<8x384xf32> to vector<8x128xf32>
    %231 = arith.addf %230, %14 : vector<8x128xf32>
    %232 = arith.mulf %220, %231 : vector<8x128xf32>
    %233 = arith.addf %229, %232 : vector<8x128xf32>
    %234 = math.tanh %233 : vector<8x128xf32>
    %cst_70 = arith.constant 1.000000e+00 : f32
    %235 = vector.broadcast %cst_70 : f32 to vector<8x128xf32>
    %236 = arith.subf %235, %228 : vector<8x128xf32>
    %237 = arith.mulf %236, %234 : vector<8x128xf32>
    %238 = arith.mulf %228, %207 : vector<8x128xf32>
    %239 = arith.addf %237, %238 : vector<8x128xf32>
    %c7_i32 = arith.constant 7 : i32
    %240 = arith.index_cast %c7_i32 : i32 to index
    %c0_71 = arith.constant 0 : index
    %c0_72 = arith.constant 0 : index
    %241 = vector.load %arg11[%240, %c0_71, %c0_72] : memref<8x8x384xf32, #tpu.memory_space<vmem>>, vector<1x8x384xf32>
    %242 = vector.shape_cast %241 : vector<1x8x384xf32> to vector<8x384xf32>
    %c0_73 = arith.constant 0 : index
    %c0_74 = arith.constant 0 : index
    %243 = vector.load %arg4[%c0_73, %c0_74] : memref<128x384xf32, #tpu.memory_space<vmem>>, vector<128x384xf32>
    %cst_75 = arith.constant dense<0.000000e+00> : vector<8x384xf32>
    %244 = tpu.matmul %239, %243, %cst_75 {dimension_numbers = #tpu.dot_dimension_numbers<[1], [0], [0], [1], [0, 0, 1, 1], [], []>} : vector<8x128xf32>, vector<128x384xf32>, vector<8x384xf32> -> vector<8x384xf32>
    %245 = vector.extract_strided_slice %242 {offsets = [0, 0], sizes = [8, 128], strides = [1, 1]} : vector<8x384xf32> to vector<8x128xf32>
    %246 = vector.extract_strided_slice %244 {offsets = [0, 0], sizes = [8, 128], strides = [1, 1]} : vector<8x384xf32> to vector<8x128xf32>
    %247 = arith.addf %245, %246 : vector<8x128xf32>
    %248 = arith.negf %247 : vector<8x128xf32>
    %249 = math.exp %248 : vector<8x128xf32>
    %cst_76 = arith.constant 1.000000e+00 : f32
    %250 = vector.broadcast %cst_76 : f32 to vector<8x128xf32>
    %251 = arith.addf %250, %249 : vector<8x128xf32>
    %252 = arith.divf %250, %251 : vector<8x128xf32>
    %253 = vector.extract_strided_slice %242 {offsets = [0, 128], sizes = [8, 128], strides = [1, 1]} : vector<8x384xf32> to vector<8x128xf32>
    %254 = vector.extract_strided_slice %244 {offsets = [0, 128], sizes = [8, 128], strides = [1, 1]} : vector<8x384xf32> to vector<8x128xf32>
    %255 = arith.addf %253, %254 : vector<8x128xf32>
    %256 = arith.negf %255 : vector<8x128xf32>
    %257 = math.exp %256 : vector<8x128xf32>
    %cst_77 = arith.constant 1.000000e+00 : f32
    %258 = vector.broadcast %cst_77 : f32 to vector<8x128xf32>
    %259 = arith.addf %258, %257 : vector<8x128xf32>
    %260 = arith.divf %258, %259 : vector<8x128xf32>
    %261 = vector.extract_strided_slice %242 {offsets = [0, 256], sizes = [8, 128], strides = [1, 1]} : vector<8x384xf32> to vector<8x128xf32>
    %262 = vector.extract_strided_slice %244 {offsets = [0, 256], sizes = [8, 128], strides = [1, 1]} : vector<8x384xf32> to vector<8x128xf32>
    %263 = arith.addf %262, %14 : vector<8x128xf32>
    %264 = arith.mulf %252, %263 : vector<8x128xf32>
    %265 = arith.addf %261, %264 : vector<8x128xf32>
    %266 = math.tanh %265 : vector<8x128xf32>
    %cst_78 = arith.constant 1.000000e+00 : f32
    %267 = vector.broadcast %cst_78 : f32 to vector<8x128xf32>
    %268 = arith.subf %267, %260 : vector<8x128xf32>
    %269 = arith.mulf %268, %266 : vector<8x128xf32>
    %270 = arith.mulf %260, %239 : vector<8x128xf32>
    %271 = arith.addf %269, %270 : vector<8x128xf32>
    %c8_i32 = arith.constant 8 : i32
    %c0_79 = arith.constant 0 : index
    %c0_80 = arith.constant 0 : index
    %272 = vector.load %arg10[%c0_79, %c0_80] : memref<8x128xf32, #tpu.memory_space<vmem>>, vector<8x128xf32>
    tpu.vector_store %arg10[%c0_79, %c0_80], %271 {strides = array<i32>} : memref<8x128xf32, #tpu.memory_space<vmem>>, vector<8x128xf32>,
    %c0_i32_81 = arith.constant 0 : i32
    %273 = arith.cmpi eq, %arg1, %c0_i32_81 : i32
    %274 = arith.extui %273 : i1 to i32
    %c0_i32_82 = arith.constant 0 : i32
    %275 = arith.cmpi ne, %274, %c0_i32_82 : i32
    scf.if %275 {
      %c0_83 = arith.constant 0 : index
      %c0_84 = arith.constant 0 : index
      %276 = vector.load %arg10[%c0_83, %c0_84] : memref<8x128xf32, #tpu.memory_space<vmem>>, vector<8x128xf32>
      %c0_85 = arith.constant 0 : index
      %c0_86 = arith.constant 0 : index
      %277 = vector.load %arg7[%c0_85, %c0_86] : memref<128x128xf32, #tpu.memory_space<vmem>>, vector<128x128xf32>
      %cst_87 = arith.constant dense<0.000000e+00> : vector<8x128xf32>
      %278 = tpu.matmul %276, %277, %cst_87 {dimension_numbers = #tpu.dot_dimension_numbers<[1], [0], [0], [1], [0, 0, 1, 1], [], []>} : vector<8x128xf32>, vector<128x128xf32>, vector<8x128xf32> -> vector<8x128xf32>
      %c0_88 = arith.constant 0 : index
      %c0_89 = arith.constant 0 : index
      %279 = vector.load %arg8[%c0_88, %c0_89] : memref<1x128xf32, #tpu.memory_space<vmem>>, vector<1x128xf32>
      %280 = vector.broadcast %279 : vector<1x128xf32> to vector<8x128xf32>
      %281 = arith.addf %278, %280 : vector<8x128xf32>
      %c0_90 = arith.constant 0 : index
      %c0_91 = arith.constant 0 : index
      %282 = vector.load %arg9[%c0_90, %c0_91] : memref<8x128xf32, #tpu.memory_space<vmem>>, vector<8x128xf32>
      tpu.vector_store %arg9[%c0_90, %c0_91], %281 {strides = array<i32>} : memref<8x128xf32, #tpu.memory_space<vmem>>, vector<8x128xf32>,
    } else {
    }
    return
  }
  func.func @transform_0(%arg0: i32, %arg1: i32) -> (i32, i32, i32) {
    %c0_i32 = arith.constant 0 : i32
    %c0_i32_0 = arith.constant 0 : i32
    return %arg1, %arg0, %c0_i32 : i32, i32, i32
  }
  func.func @transform_1(%arg0: i32, %arg1: i32) -> (i32, i32) {
    %c0_i32 = arith.constant 0 : i32
    %c0_i32_0 = arith.constant 0 : i32
    %c0_i32_1 = arith.constant 0 : i32
    return %c0_i32, %c0_i32_0 : i32, i32
  }
  func.func @transform_2(%arg0: i32, %arg1: i32) -> (i32, i32) {
    %c0_i32 = arith.constant 0 : i32
    %c0_i32_0 = arith.constant 0 : i32
    %c0_i32_1 = arith.constant 0 : i32
    return %c0_i32, %c0_i32_0 : i32, i32
  }
  func.func @transform_3(%arg0: i32, %arg1: i32) -> (i32, i32) {
    %c0_i32 = arith.constant 0 : i32
    %c0_i32_0 = arith.constant 0 : i32
    %c0_i32_1 = arith.constant 0 : i32
    return %c0_i32, %c0_i32_0 : i32, i32
  }
  func.func @transform_4(%arg0: i32, %arg1: i32) -> (i32, i32) {
    %c0_i32 = arith.constant 0 : i32
    %c0_i32_0 = arith.constant 0 : i32
    %c0_i32_1 = arith.constant 0 : i32
    return %c0_i32, %c0_i32_0 : i32, i32
  }
  func.func @transform_5(%arg0: i32, %arg1: i32) -> (i32, i32) {
    %c0_i32 = arith.constant 0 : i32
    %c0_i32_0 = arith.constant 0 : i32
    %c0_i32_1 = arith.constant 0 : i32
    return %c0_i32, %c0_i32_0 : i32, i32
  }
  func.func @transform_6(%arg0: i32, %arg1: i32) -> (i32, i32) {
    %c0_i32 = arith.constant 0 : i32
    %c0_i32_0 = arith.constant 0 : i32
    %c0_i32_1 = arith.constant 0 : i32
    return %c0_i32, %c0_i32_0 : i32, i32
  }
  func.func @transform_7(%arg0: i32, %arg1: i32) -> (i32, i32) {
    %c0_i32 = arith.constant 0 : i32
    %c0_i32_0 = arith.constant 0 : i32
    return %arg0, %c0_i32 : i32, i32
  }
}

</mosaic_0001>

<bundles_post_ra>
// kernel: tpu_custom_call.1
= control target key start
LH: loop header
LB: loop body
LE: loop exit
PB: predicated region body
PF: predicated region fallthrough
CT: control target
= control target key end

     0   :  { %12 = vsyncpa [#allocation5], 0  ;;  %s3702_s0 = inlined_call_operand.hbm [shape: f32[8,8,16], index: 0, kind: input, shape index: {}]   ;;  %s3703_s1 = inlined_call_operand.hbm [shape: f32[16,384], index: 1, kind: input, shape index: {}]   ;;  %s3704_s2 = inlined_call_operand.hbm [shape: f32[128,384], index: 2, kind: input, shape index: {}]   ;;  %s3705_s3 = inlined_call_operand.vmem [shape: f32[1,384], index: 3, kind: input, shape index: {}]   ;;  %s3706_s4 = inlined_call_operand.vmem [shape: f32[1,128], index: 4, kind: input, shape index: {}]   ;;  %s3707_s5 = inlined_call_operand.hbm [shape: f32[128,128], index: 5, kind: input, shape index: {}]   ;;  %s3708_s6 = inlined_call_operand.vmem [shape: f32[1,128], index: 6, kind: input, shape index: {}]   ;;  %s3709_s7 = inlined_call_operand.hbm [shape: f32[8,128], index: 7, kind: output, shape index: {}]  }
   0x1   :  { %13 = vsyncpa [#allocation8], 0 }
   0x2   :  { %14 = vsyncpa [#allocation11], 0 }
   0x3   :  { %15 = vsyncpa [#allocation6], 0  ;;  %s3142_s24 = smov [#allocation7]   ;;  %s3024_s28 = scalar_lea.hbm %s3703_s1, 768 }
   0x4   :  { %s33_s25 = sshll.u32 %s3142_s24, 4  ;;  %p3025_p0 = scmp.ne.s32.totalorder %s3703_s1, %s3024_s28  ;;  %s34_s25 = int_to_ptr.vmem [resolvable:$true] %s33_s25 }
   0x5   :  { %p3028_p1 = scmp.lt.u32.totalorder %s3024_s28, %s3703_s1 }
   0x7   :  { %p3030_p2 = pnand %p3028_p1, %p3025_p0 }
   0x9   :  { %3033 = shalt.err (!%p3030_p2)
}
   0xa   :  { %s3034_s10 = scalar_lea.vmem %s34_s25, 768  ;;  %p3039_p4 = scmp.lt.s32.totalorder %s34_s25, %s34_s25 }
   0xb   :  { %p3035_p3 = scmp.ne.s32.totalorder %s34_s25, %s3034_s10  ;;  %p3040_p5 = scmp.lt.s32.totalorder %s3034_s10, %s3034_s10 }
   0xd   :  { %p3041_p6 = por %p3040_p5, %p3039_p4 }
   0xf   :  { %p3042_p7 = pnand %p3041_p6, %p3035_p3 }
  0x11   :  { %3045 = shalt.err (!%p3042_p7)
}
  0x12   :  { %s3143_s11 = smov 384   ;;  %s3144_s12 = smov 24  }
  0x13   :  { %39 = dma.hbm_to_vmem [thread:$0]  %s3703_s1, 768, %s34_s25, [#allocation8], %s3143_s11, %s3143_s11, %s3144_s12  }
  0x14   :  { %s3145_s15 = smov [#allocation4]   ;;  %s3046_s19 = scalar_lea.hbm %s3702_s0, 1024 }
  0x15   :  { %s21_s16 = sshll.u32 %s3145_s15, 4  ;;  %p3047_p8 = scmp.ne.s32.totalorder %s3702_s0, %s3046_s19  ;;  %s22_s16 = int_to_ptr.vmem [resolvable:$true] %s21_s16 }
  0x16   :  { %p3050_p9 = scmp.lt.u32.totalorder %s3046_s19, %s3702_s0 }
  0x18   :  { %p3052_p10 = pnand %p3050_p9, %p3047_p8 }
  0x1a   :  { %3055 = shalt.err (!%p3052_p10)
}
  0x1b   :  { %s3056_s24 = scalar_lea.vmem %s22_s16, 1024  ;;  %p3061_p12 = scmp.lt.s32.totalorder %s22_s16, %s22_s16 }
  0x1c   :  { %p3057_p11 = scmp.ne.s32.totalorder %s22_s16, %s3056_s24  ;;  %p3062_p13 = scmp.lt.s32.totalorder %s3056_s24, %s3056_s24 }
  0x1e   :  { %p3063_p0 = por %p3062_p13, %p3061_p12 }
  0x20   :  { %p3064_p1 = pnand %p3063_p0, %p3057_p11 }
  0x22   :  { %3067 = shalt.err (!%p3064_p1)
}
  0x23   :  { %s3146_s1 = smov 128   ;;  %s3147_s25 = smov 8  }
  0x24   :  { %27 = dma.hbm_to_vmem [thread:$0]  %s3702_s0, 1024, %s22_s16, [#allocation5], %s3146_s1, %s3146_s1, %s3147_s25  }
  0x25   :  { %s3148_s28 = smov [#allocation9]   ;;  %s3149_s30 = smov [#allocation10]  }
  0x26   :  { %s45_s29 = sshll.u32 %s3148_s28, 4  ;;  %s61_s8 = sshll.u32 %s3149_s30, 4  ;;  %s46_s29 = int_to_ptr.vmem [resolvable:$true] %s45_s29  ;;  %s3224_s8 = int_to_ptr.vmem [resolvable:$true] %s61_s8 }
  0x27   :  { %s3068_s13 = scalar_lea.hbm %s3704_s2, 6144 }
  0x28   :  { %p3069_p2 = scmp.ne.s32.totalorder %s3704_s2, %s3068_s13  ;;  %p3072_p3 = scmp.lt.u32.totalorder %s3068_s13, %s3704_s2 }
  0x2a   :  { %p3074_p4 = pnand %p3072_p3, %p3069_p2 }
  0x2c   :  { %3077 = shalt.err (!%p3074_p4)
}
  0x2d   :  { %s3078_s0 = scalar_lea.vmem %s46_s29, 6144  ;;  %p3083_p6 = scmp.lt.s32.totalorder %s46_s29, %s46_s29 }
  0x2e   :  { %p3079_p5 = scmp.ne.s32.totalorder %s46_s29, %s3078_s0  ;;  %p3084_p7 = scmp.lt.s32.totalorder %s3078_s0, %s3078_s0 }
  0x30   :  { %p3085_p8 = por %p3084_p7, %p3083_p6 }
  0x32   :  { %p3086_p9 = pnand %p3085_p8, %p3079_p5 }
  0x34   :  { %3089 = shalt.err (!%p3086_p9)
}
  0x35   :  { %51 = dma.hbm_to_vmem [thread:$0]  %s3704_s2, 6144, %s46_s29, [#allocation8], %s3143_s11, %s3143_s11, %s3144_s12  }
  0x36   :  { %s3090_s22 = scalar_lea.hbm %s3707_s5, 2048 }
  0x37   :  { %p3091_p10 = scmp.ne.s32.totalorder %s3707_s5, %s3090_s22  ;;  %p3094_p11 = scmp.lt.u32.totalorder %s3090_s22, %s3707_s5 }
  0x39   :  { %p3096_p12 = pnand %p3094_p11, %p3091_p10 }
  0x3b   :  { %3099 = shalt.err (!%p3096_p12)
}
  0x3c   :  { %s3100_s28 = scalar_lea.vmem %s3224_s8, 2048  ;;  %p3105_p0 = scmp.lt.s32.totalorder %s3224_s8, %s3224_s8 }
  0x3d   :  { %p3101_p13 = scmp.ne.s32.totalorder %s3224_s8, %s3100_s28  ;;  %p3106_p1 = scmp.lt.s32.totalorder %s3100_s28, %s3100_s28 }
  0x3f   :  { %p3107_p2 = por %p3106_p1, %p3105_p0 }
  0x41   :  { %p3108_p3 = pnand %p3107_p2, %p3101_p13 }
  0x43   :  { %3111 = shalt.err (!%p3108_p3)
}
  0x44   :  { %67 = dma.hbm_to_vmem [thread:$0]  %s3707_s5, 2048, %s3224_s8, [#allocation11], %s3146_s1, %s3146_s1, %s3147_s25  }
  0x45   :  { %3134 = dma.done.wait [#allocation5], 1024  }
  0x46   :  { %3135 = vsyncadd [#allocation5], 4294966272 }
  0x47   :  { %3136 = dma.done.wait [#allocation8], 6912  }
  0x48   :  { %3137 = vsyncadd [#allocation8], 4294960384 }
  0x49   :  { %3138 = dma.done.wait [#allocation11], 2048  }
  0x4a   :  { %3139 = vsyncadd [#allocation11], 4294965248  ;;  %v3150_v0 = vmov 0.0   ;;  %v96_v1 = vld [vmem:[#allocation7 + $0x8] sm:$0xff]  ;;  %v99_v2 = vld [vmem:[#allocation7 + $0x20] sm:$0xff]  ;;  %vm118_vm0 = vcmask 130048  }
  0x4b   :  { %207 = vmatprep.mubr.f32.mxu0 %v3150_v0  ;;  %v95_v3 = vld [vmem:[#allocation7] sm:$0xff]  ;;  %v2420_v4 = vpack.c.bf16 %v99_v2, %v96_v1  ;;  %v98_v5 = vld [vmem:[#allocation7 + $0x18] sm:$0xff]  ;;  %v400_v9 = vld [vmem:[#allocation9 + $0x20] sm:$0xff]  ;;  %v3151_v48 = vmov 0.0|0.0   ;;  %vm3152_vm1 = vmmov 0   ;;  %s3153_s29 = smov [#allocation12]  }
  0x4c   :  { %v87_v6 = vld [vmem:[#allocation4] sm:$0xff]  ;;  %v397_v7 = vld [vmem:[#allocation9 + $0x8] sm:$0xff]  ;;  %v2422_v8 = vpack.c.bf16 %v98_v5, %v95_v3  ;;  %v396_v10 = vld [vmem:[#allocation9] sm:$0xff]  ;;  %s1881_s30 = sshll.u32 %s3153_s29, 4  ;;  %s1882_s30 = int_to_ptr.vmem [resolvable:$true] %s1881_s30 }
  0x4d   :  { %v399_v11 = vld [vmem:[#allocation9 + $0x18] sm:$0xff]  ;;  %2093 = vmatprep.mubr.msk.f32.mxu1 %vm118_vm0, %v87_v6  ;;  %2421 = vmatprep.subr.bf16.mxu0 %v2420_v4  ;;  %v3263_v12 = vpack.c.bf16 %v400_v9, %v397_v7  ;;  %v406_v14 = vld [vmem:[#allocation9 + $0x50] sm:$0xff]  ;;  %v405_v18 = vld [vmem:[#allocation9 + $0x48] sm:$0xff]  ;;  %s3112_s8 = scalar_lea.vmem %s1882_s30, 128  ;;  %p3117_p5 = scmp.lt.s32.totalorder %s1882_s30, %s1882_s30 }
  0x4e   :  { %v403_v13 = vld [vmem:[#allocation9 + $0x38] sm:$0xff]  ;;  %2423 = vmatpush1.bf16.msra.mxu0 %v2422_v8  ;;  %v3265_v15 = vpack.c.bf16 %v399_v11, %v396_v10  ;;  %v402_v17 = vld [vmem:[#allocation9 + $0x30] sm:$0xff]  ;;  %v409_v19 = vld [vmem:[#allocation9 + $0x68] sm:$0xff]  ;;  %p3113_p4 = scmp.ne.s32.totalorder %s1882_s30, %s3112_s8  ;;  %p3118_p6 = scmp.lt.s32.totalorder %s3112_s8, %s3112_s8 }
  0x4f   :  { %2429 = vmatprep.subr.bf16.mxu0 %v3263_v12  ;;  %v3268_v16 = vpack.c.bf16 %v406_v14, %v403_v13  ;;  %v412_v20 = vld [vmem:[#allocation9 + $0x80] sm:$0xff]  ;;  %v88_v21 = vld [vmem:[#allocation4 + $0x8] sm:$0xff]  ;;  %v3273_v22 = vpack.c.bf16 %v405_v18, %v402_v17  ;;  %v418_v27 = vld [vmem:[#allocation9 + $0xb0] sm:$0xff] }
  0x50   :  { %v3276_v23 = vpack.c.bf16 %v412_v20, %v409_v19  ;;  %v408_v24 = vld [vmem:[#allocation9 + $0x60] sm:$0xff]  ;;  %v411_v25 = vld [vmem:[#allocation9 + $0x78] sm:$0xff]  ;;  %v414_v34 = vld [vmem:[#allocation9 + $0x90] sm:$0xff]  ;;  %p3119_p7 = por %p3118_p6, %p3117_p5 }
  0x51   :  { %1892 = vmatmul.mubr.msk.f32.vlgmr.msra.gmra.mrb[0].mxu0 %vm118_vm0, %v87_v6  ;;  %v415_v26 = vld [vmem:[#allocation9 + $0x98] sm:$0xff]  ;;  %v97_v28 = vld [vmem:[#allocation7 + $0x10] sm:$0xff]  ;;  %v3281_v31 = vpack.c.bf16 %v411_v25, %v408_v24  ;;  %v417_v35 = vld [vmem:[#allocation9 + $0xa8] sm:$0xff] }
  0x52   :  { %2431 = vmatpush1.bf16.msra.mxu0 %v3265_v15  ;;  %213 = vmatprep.mubr.f32.mxu0 %v3150_v0  ;;  %v100_v29 = vld [vmem:[#allocation7 + $0x28] sm:$0xff]  ;;  %v89_v30 = vld [vmem:[#allocation4 + $0x10] sm:$0xff]  ;;  %v3284_v33 = vpack.c.bf16 %v418_v27, %v415_v26  ;;  %v398_v36 = vld [vmem:[#allocation9 + $0x10] sm:$0xff]  ;;  %v3291_v42 = vpack.c.bf16 %v417_v35, %v414_v34  ;;  %v103_v35 = vlaneseq  ;;  %p3120_p8 = pnand %p3119_p7, %p3113_p4 }
  0x53   :  { %2433 = vmatprep.subr.bf16.mxu0 %v3268_v16  ;;  %v2424_v32 = vpack.c.bf16 %v100_v29, %v97_v28  ;;  %v421_v37 = vld [vmem:[#allocation9 + $0xc8] sm:$0xff]  ;;  %v424_v38 = vld [vmem:[#allocation9 + $0xe0] sm:$0xff]  ;;  %v407_v44 = vld [vmem:[#allocation9 + $0x58] sm:$0xff] }
  0x54   :  { %v401_v39 = vld [vmem:[#allocation9 + $0x28] sm:$0xff]  ;;  %v404_v43 = vld [vmem:[#allocation9 + $0x40] sm:$0xff]  ;;  %v3294_v45 = vpack.c.bf16 %v424_v38, %v421_v37  ;;  %v423_v47 = vld [vmem:[#allocation9 + $0xd8] sm:$0xff] }
  0x55   :  { %1893 = vmatmul.mubr.msk.f32.gmra.mrb[2].mxu0 %vm118_vm0, %v88_v21  ;;  %2425 = vmatprep.subr.bf16.mxu1 %v2424_v32  ;;  %v3287_v40 = vpack.c.bf16 %v401_v39, %v398_v36  ;;  %v90_v41 = vld [vmem:[#allocation4 + $0x18] sm:$0xff]  ;;  %v420_v46 = vld [vmem:[#allocation9 + $0xc0] sm:$0xff]  ;;  %v427_v49 = vld [vmem:[#allocation9 + $0xf8] sm:$0xff]  ;;  %v3300_v51 = vpack.c.bf16 %v407_v44, %v404_v43  ;;  %v104_v36 = vshrl.u32 %v103_v35, 7 }
  0x56   :  { %2435 = vmatpush1.bf16.msra.mxu0 %v3273_v22  ;;  %219 = vmatprep.mubr.f32.mxu0 %v3150_v0  ;;  %v430_v50 = vld [vmem:[#allocation9 + $0x110] sm:$0xff]  ;;  %v3304_v53 = vpack.c.bf16 %v423_v47, %v420_v46  ;;  %v413_v55 = vld [vmem:[#allocation9 + $0x88] sm:$0xff]  ;;  %v436_v60 = vld [vmem:[#allocation9 + $0x140] sm:$0xff] }
  0x57   :  { %2437 = vmatprep.subr.bf16.mxu0 %v3276_v23  ;;  %2427 = vmatpush3.bf16.msra.mxu1 %v2424_v32  ;;  %v91_v52 = vld [vmem:[#allocation4 + $0x20] sm:$0xff]  ;;  %v3307_v56 = vpack.c.bf16 %v430_v50, %v427_v49  ;;  %v429_v58 = vld [vmem:[#allocation9 + $0x108] sm:$0xff]  ;;  %v92_v62 = vld [vmem:[#allocation4 + $0x28] sm:$0xff]  ;;  %v113_v37 = vsub.s32 2, %v104_v36 }
  0x58   :  { %2460 = vmatprep.subr.bf16.mxu1 %v3151_v48  ;;  %v410_v54 = vld [vmem:[#allocation9 + $0x70] sm:$0xff]  ;;  %v433_v59 = vld [vmem:[#allocation9 + $0x128] sm:$0xff]  ;;  %v416_v1 = vld [vmem:[#allocation9 + $0xa0] sm:$0xff] }
  0x59   :  { %1894 = vmatmul.mubr.msk.f32.gmra.mrb[4].mxu0 %vm118_vm0, %v89_v30  ;;  %v426_v57 = vld [vmem:[#allocation9 + $0xf0] sm:$0xff]  ;;  %v3313_v61 = vpack.c.bf16 %v413_v55, %v410_v54  ;;  %v419_v2 = vld [vmem:[#allocation9 + $0xb8] sm:$0xff]  ;;  %v3320_v3 = vpack.c.bf16 %v436_v60, %v433_v59  ;;  %v432_v4 = vld [vmem:[#allocation9 + $0x120] sm:$0xff]  ;;  %v109_v55 = vsub.s32 1, %v104_v36 }
  0x5a   :  { %2439 = vmatpush1.bf16.msra.mxu0 %v3281_v31  ;;  %225 = vmatprep.mubr.f32.mxu0 %v3150_v0  ;;  %v3317_v63 = vpack.c.bf16 %v429_v58, %v426_v57  ;;  %v435_v5 = vld [vmem:[#allocation9 + $0x138] sm:$0xff]  ;;  %v442_v7 = vld [vmem:[#allocation9 + $0x170] sm:$0xff]  ;;  %v3326_v8 = vpack.c.bf16 %v419_v2, %v416_v1  ;;  %v93_v9 = vld [vmem:[#allocation4 + $0x30] sm:$0xff] }
  0x5b   :  { %2441 = vmatprep.subr.bf16.mxu0 %v3284_v33  ;;  %2094 = vmatmul.mubr.msk.f32.vlgmr.msra.gmra.mrb[0].mxu1 %vm118_vm0, %v88_v21  ;;  %v439_v6 = vld [vmem:[#allocation9 + $0x158] sm:$0xff]  ;;  %v3330_v10 = vpack.c.bf16 %v435_v5, %v432_v4  ;;  %v422_v11 = vld [vmem:[#allocation9 + $0xd0] sm:$0xff]  ;;  %v425_v13 = vld [vmem:[#allocation9 + $0xe8] sm:$0xff] }
  0x5c   :  { %2462 = vmatpush3.bf16.msra.mxu1 %v3287_v40  ;;  %2096 = vmatprep.mubr.msk.f32.mxu1 %vm118_vm0, %v89_v30  ;;  %v3333_v14 = vpack.c.bf16 %v442_v7, %v439_v6  ;;  %v438_v17 = vld [vmem:[#allocation9 + $0x150] sm:$0xff]  ;;  %v441_v18 = vld [vmem:[#allocation9 + $0x168] sm:$0xff]  ;;  %v3339_v19 = vpack.c.bf16 %v425_v13, %v422_v11  ;;  %v428_v24 = vld [vmem:[#allocation9 + $0x100] sm:$0xff] }
  0x5d   :  { %1895 = vmatmul.mubr.msk.f32.gmra.mrb[6].mxu0 %vm118_vm0, %v90_v41  ;;  %2463 = vmatprep.subr.bf16.mxu1 %v3151_v48  ;;  %v94_v20 = vld [vmem:[#allocation4 + $0x38] sm:$0xff]  ;;  %v3343_v21 = vpack.c.bf16 %v441_v18, %v438_v17  ;;  %v431_v25 = vld [vmem:[#allocation9 + $0x118] sm:$0xff]  ;;  %v434_v27 = vld [vmem:[#allocation9 + $0x130] sm:$0xff] }
  0x5e   :  { %2443 = vmatpush1.bf16.msra.mxu0 %v3291_v42  ;;  %231 = vmatprep.mubr.f32.mxu0 %v3150_v0  ;;  %v3350_v26 = vpack.c.bf16 %v431_v25, %v428_v24  ;;  %v437_v28 = vld [vmem:[#allocation9 + $0x148] sm:$0xff]  ;;  %v440_v30 = vld [vmem:[#allocation9 + $0x160] sm:$0xff]  ;;  %v443_v32 = vld [vmem:[#allocation9 + $0x178] sm:$0xff] }
  0x5f   :  { %2445 = vmatprep.subr.bf16.mxu0 %v3294_v45  ;;  %2097 = vmatmul.mubr.msk.f32.gmra.mrb[2].mxu1 %vm118_vm0, %v90_v41  ;;  %v3360_v29 = vpack.c.bf16 %v437_v28, %v434_v27  ;;  %v3369_v34 = vpack.c.bf16 %v443_v32, %v440_v30  ;;  %v101_v38 = vld [vmem:[%s3705_s3] sm:$0x7] }
  0x60   :  { %2465 = vmatpush3.bf16.msra.mxu1 %v3300_v51  ;;  %2099 = vmatprep.mubr.msk.f32.mxu1 %vm118_vm0, %v91_v52  ;;  %v114_v39 = vrot.slane %v101_v38, %v113_v37  ;;  %v3422_v2 = vrot.slane %v101_v38, %v109_v55  ;;  %v3433_v28 = vld [vmem:[%s3706_s4] ss:$0 sm:$0xff] }
  0x61   :  { %1896 = vmatmul.mubr.msk.f32.gmra.mrb[8].mxu0 %vm118_vm0, %v91_v52  ;;  %2466 = vmatprep.subr.bf16.mxu1 %v3151_v48  ;;  %v105_v52 = vsub.s32 0, %v104_v36 }
  0x62   :  { %2447 = vmatpush1.bf16.msra.mxu0 %v3304_v53  ;;  %237 = vmatprep.mubr.f32.mxu0 %v3150_v0 }
  0x63   :  { %2449 = vmatprep.subr.bf16.mxu0 %v3307_v56  ;;  %2100 = vmatmul.mubr.msk.f32.gmra.mrb[4].mxu1 %vm118_vm0, %v92_v62  ;;  %v3418_v59 = vrot.slane %v101_v38, %v105_v52 }
  0x64   :  { %2468 = vmatpush3.bf16.msra.mxu1 %v3313_v61  ;;  %2102 = vmatprep.mubr.msk.f32.mxu1 %vm118_vm0, %v93_v9 }
  0x65   :  { %1897 = vmatmul.mubr.msk.f32.gmra.mrb[10].mxu0 %vm118_vm0, %v92_v62  ;;  %2469 = vmatprep.subr.bf16.mxu1 %v3151_v48 }
  0x66   :  { %2451 = vmatpush1.bf16.msra.mxu0 %v3317_v63  ;;  %243 = vmatprep.mubr.f32.mxu0 %v3150_v0 }
  0x67   :  { %2453 = vmatprep.subr.bf16.mxu0 %v3320_v3  ;;  %2103 = vmatmul.mubr.msk.f32.gmra.mrb[6].mxu1 %vm118_vm0, %v94_v20 }
  0x68   :  { %2471 = vmatpush3.bf16.msra.mxu1 %v3326_v8  ;;  %2137 = vmatprep.mubr.msk.f32.mxu1 %vm3152_vm1, %v3150_v0 }
  0x69   :  { %1898 = vmatmul.mubr.msk.f32.gmra.mrb[12].mxu0 %vm118_vm0, %v93_v9  ;;  %2472 = vmatprep.subr.bf16.mxu1 %v3151_v48 }
  0x6a   :  { %2455 = vmatpush1.bf16.msra.mxu0 %v3330_v10  ;;  %249 = vmatprep.mubr.f32.mxu0 %v3150_v0 }
  0x6b   :  { %2457 = vmatprep.subr.bf16.mxu0 %v3333_v14 }
  0x6c   :  { %2474 = vmatpush3.bf16.msra.mxu1 %v3339_v19 }
  0x6d   :  { %1899 = vmatmul.mubr.msk.f32.gmra.mrb[14].mxu0 %vm118_vm0, %v94_v20  ;;  %2475 = vmatprep.subr.bf16.mxu1 %v3151_v48 }
  0x6e   :  { %2459 = vmatpush1.bf16.msra.mxu0 %v3343_v21  ;;  %508 = vmatprep.mubr.f32.mxu0 %v3150_v0 }
  0x6f   :  { %2485 = vmatprep.subr.bf16.mxu0 %v3263_v12 }
  0x70   :  { %2477 = vmatpush3.bf16.msra.mxu1 %v3350_v26 }
  0x71   :  { %509 = vmatmul.mubr.f32.vlgmr.msra.gmra.mrb[0].mxu0 %v3150_v0  ;;  %2478 = vmatprep.subr.bf16.mxu1 %v3151_v48 }
  0x72   :  { %2487 = vmatpush1.bf16.msra.mxu0 %v3265_v15  ;;  %675 = vmatprep.mubr.f32.mxu0 %v3150_v0 }
  0x73   :  { %2489 = vmatprep.subr.bf16.mxu0 %v3268_v16 }
  0x74   :  { %2480 = vmatpush3.bf16.msra.mxu1 %v3360_v29 }
  0x75   :  { %2481 = vmatprep.subr.bf16.mxu1 %v3151_v48 }
  0x76   :  { %2491 = vmatpush1.bf16.msra.mxu0 %v3273_v22 }
  0x77   :  { %2493 = vmatprep.subr.bf16.mxu0 %v3276_v23 }
  0x78   :  { %2483 = vmatpush3.bf16.msra.mxu1 %v3369_v34 }
  0x79   :  { %2516 = vmatprep.subr.bf16.mxu1 %v3151_v48 }
  0x7a   :  { %2495 = vmatpush1.bf16.msra.mxu0 %v3281_v31 }
  0x7b   :  { %2138 = vmatmul.mubr.f32.vlgmr.msra.gmra.mrb[8].mxu1 %v3150_v0  ;;  %2497 = vmatprep.subr.bf16.mxu0 %v3284_v33 }
  0x7c   :  { %2518 = vmatpush3.bf16.msra.mxu1 %v3287_v40  ;;  %2172 = vmatprep.mubr.msk.f32.mxu1 %vm3152_vm1, %v3150_v0 }
  0x7d   :  { %2519 = vmatprep.subr.bf16.mxu1 %v3151_v48 }
  0x7e   :  { %2499 = vmatpush1.bf16.msra.mxu0 %v3291_v42 }
  0x7f   :  { %2501 = vmatprep.subr.bf16.mxu0 %v3294_v45 }
  0x80   :  { %2521 = vmatpush3.bf16.msra.mxu1 %v3300_v51 }
  0x81   :  { %2522 = vmatprep.subr.bf16.mxu1 %v3151_v48 }
  0x82   :  { %2503 = vmatpush1.bf16.msra.mxu0 %v3304_v53 }
  0x83   :  { %2505 = vmatprep.subr.bf16.mxu0 %v3307_v56 }
  0x84   :  { %2524 = vmatpush3.bf16.msra.mxu1 %v3313_v61 }
  0x85   :  { %2525 = vmatprep.subr.bf16.mxu1 %v3151_v48 }
  0x86   :  { %2507 = vmatpush1.bf16.msra.mxu0 %v3317_v63 }
  0x87   :  { %2509 = vmatprep.subr.bf16.mxu0 %v3320_v3 }
  0x88   :  { %2527 = vmatpush3.bf16.msra.mxu1 %v3326_v8 }
  0x89   :  { %2528 = vmatprep.subr.bf16.mxu1 %v3151_v48 }
  0x8a   :  { %2511 = vmatpush1.bf16.msra.mxu0 %v3330_v10 }
  0x8b   :  { %2513 = vmatprep.subr.bf16.mxu0 %v3333_v14 }
  0x8c   :  { %2530 = vmatpush3.bf16.msra.mxu1 %v3339_v19 }
  0x8d   :  { %2531 = vmatprep.subr.bf16.mxu1 %v3151_v48 }
  0x8e   :  { %2515 = vmatpush1.bf16.msra.mxu0 %v3343_v21 }
  0x8f   :  { %2541 = vmatprep.subr.bf16.mxu0 %v3263_v12 }
  0x90   :  { %2533 = vmatpush3.bf16.msra.mxu1 %v3350_v26 }
  0x91   :  { %2534 = vmatprep.subr.bf16.mxu1 %v3151_v48 }
  0x94   :  { %2536 = vmatpush3.bf16.msra.mxu1 %v3360_v29 }
  0x95   :  { %2537 = vmatprep.subr.bf16.mxu1 %v3151_v48 }
  0x98   :  { %2539 = vmatpush3.bf16.msra.mxu1 %v3369_v34 }
  0x99   :  { %2572 = vmatprep.subr.bf16.mxu1 %v3151_v48 }
 0x12e   :  { %v2095_v41 = vpop.f32.mrb[0].mxu1 }
 0x12f   :  { %v3410_v43 = vadd.f32 %v2095_v41, %v114_v39  ;;  %v322_v44 = vpop.f32.mrb[1].mxu1 }
 0x130   :  { %v323_v36 = vadd.f32 %v322_v44, %v114_v39 }
 0x132   :  { %v2098_v46 = vpop.f32.mrb[2].mxu1 }
 0x133   :  { %v3412_v47 = vadd.f32 %v2098_v46, %v114_v39  ;;  %v332_v49 = vpop.f32.mrb[3].mxu1 }
 0x134   :  { %v3414_v50 = vadd.f32 %v332_v49, %v114_v39 }
 0x136   :  { %v2101_v54 = vpop.f32.mrb[4].mxu1 }
 0x137   :  { %v3416_v57 = vadd.f32 %v2101_v54, %v114_v39  ;;  %v342_v58 = vpop.f32.mrb[5].mxu1 }
 0x138   :  { %v3420_v60 = vadd.f32 %v342_v58, %v114_v39 }
 0x13a   :  { %v2104_v62 = vpop.f32.mrb[6].mxu1 }
 0x13b   :  { %v3424_v4 = vadd.f32 %v2104_v62, %v114_v39  ;;  %v352_v5 = vpop.f32.mrb[7].mxu1 }
 0x13c   :  { %v3427_v9 = vadd.f32 %v352_v5, %v114_v39 }
 0x144   :  { %v510_v1 = vpop.f32.mrb[0].mxu0 }
 0x145   :  { %v2900_v6 = vadd.f32 %v510_v1, %v3418_v59  ;;  %v512_v7 = vpop.f32.mrb[1].mxu0 }
 0x146   :  { %v2901_v13 = vadd.f32 %v512_v7, %v3422_v2 }
 0x147   :  { %v1909_v11 = vmul.f32 -1.442695, %v2900_v6 }
 0x148   :  { %v1910_v17 = vmul.f32 -1.442695, %v2901_v13 }
 0x149   :  { %2944 = vpow2.f32 %v1909_v11 }
 0x14a   :  { %2946 = vpow2.f32 %v1910_v17 }
 0x14e   :  { %v581_v18 = vpop.f32.mrb[8].mxu1 }
 0x14f   :  { %v2139_v20 = vpop.f32.mrb[9].mxu1  ;;  %v599_v32 = vadd.f32 %v3433_v28, %v581_v18 }
 0x153   :  { %v2945_v24 = vpop.eup %2944 }
 0x154   :  { %v589_v25 = vadd.f32 1.0, %v2945_v24  ;;  %v2947_v27 = vpop.eup %2946 }
 0x155   :  { %v596_v30 = vadd.f32 1.0, %v2947_v27 }
 0x156   :  { %2948 = vrcp.f32 %v589_v25 }
 0x157   :  { %2950 = vrcp.f32 %v596_v30 }
 0x160   :  { %v2949_v35 = vpop.eup %2948 }
 0x161   :  { %v600_v37 = vmul.f32 %v2949_v35, %v599_v32  ;;  %v2951_v41 = vpop.eup %2950 }
 0x162   :  { %v603_v46 = vsub.f32 1.0, %v2951_v41  ;;  %v605_v54 = vmul.f32 0.0, %v2951_v41 }
 0x163   :  { %v601_v38 = vadd.f32 %v600_v37, %v323_v36 }
 0x165   :  { %2952 = vtanh.f32 %v601_v38 }
 0x16f   :  { %v2953_v49 = vpop.eup %2952 }
 0x170   :  { %v604_v52 = vmul.f32 %v2953_v49, %v603_v46 }
 0x172   :  { %v606_v55 = vadd.f32 %v605_v54, %v604_v52 }
 0x174   :  { %676 = vmatmul.mubr.f32.vlgmr.msra.gmra.mrb[2].mxu0 %v606_v55  ;;  %2173 = vmatmul.mubr.f32.vlgmr.msra.gmra.mrb[10].mxu1 %v606_v55 }
 0x175   :  { %2543 = vmatpush1.bf16.msra.mxu0 %v3265_v15  ;;  %2574 = vmatpush3.bf16.msra.mxu1 %v3287_v40 }
 0x176   :  { %2545 = vmatprep.subr.bf16.mxu0 %v3268_v16  ;;  %2575 = vmatprep.subr.bf16.mxu1 %v3151_v48 }
 0x177   :  { %842 = vmatprep.mubr.f32.mxu0 %v3150_v0  ;;  %2207 = vmatprep.mubr.msk.f32.mxu1 %vm3152_vm1, %v3150_v0 }
 0x179   :  { %2547 = vmatpush1.bf16.msra.mxu0 %v3273_v22  ;;  %2577 = vmatpush3.bf16.msra.mxu1 %v3300_v51 }
 0x17a   :  { %2549 = vmatprep.subr.bf16.mxu0 %v3276_v23  ;;  %2578 = vmatprep.subr.bf16.mxu1 %v3151_v48 }
 0x17d   :  { %2551 = vmatpush1.bf16.msra.mxu0 %v3281_v31  ;;  %2580 = vmatpush3.bf16.msra.mxu1 %v3313_v61 }
 0x17e   :  { %2553 = vmatprep.subr.bf16.mxu0 %v3284_v33  ;;  %2581 = vmatprep.subr.bf16.mxu1 %v3151_v48 }
 0x181   :  { %2555 = vmatpush1.bf16.msra.mxu0 %v3291_v42  ;;  %2583 = vmatpush3.bf16.msra.mxu1 %v3326_v8 }
 0x182   :  { %2557 = vmatprep.subr.bf16.mxu0 %v3294_v45  ;;  %2584 = vmatprep.subr.bf16.mxu1 %v3151_v48 }
 0x185   :  { %2559 = vmatpush1.bf16.msra.mxu0 %v3304_v53  ;;  %2586 = vmatpush3.bf16.msra.mxu1 %v3339_v19 }
 0x186   :  { %2561 = vmatprep.subr.bf16.mxu0 %v3307_v56  ;;  %2587 = vmatprep.subr.bf16.mxu1 %v3151_v48 }
 0x189   :  { %2563 = vmatpush1.bf16.msra.mxu0 %v3317_v63  ;;  %2589 = vmatpush3.bf16.msra.mxu1 %v3350_v26 }
 0x18a   :  { %2565 = vmatprep.subr.bf16.mxu0 %v3320_v3  ;;  %2590 = vmatprep.subr.bf16.mxu1 %v3151_v48 }
 0x18d   :  { %2567 = vmatpush1.bf16.msra.mxu0 %v3330_v10  ;;  %2592 = vmatpush3.bf16.msra.mxu1 %v3360_v29 }
 0x18e   :  { %2569 = vmatprep.subr.bf16.mxu0 %v3333_v14  ;;  %2593 = vmatprep.subr.bf16.mxu1 %v3151_v48 }
 0x191   :  { %2571 = vmatpush1.bf16.msra.mxu0 %v3343_v21  ;;  %2595 = vmatpush3.bf16.msra.mxu1 %v3369_v34 }
 0x192   :  { %2597 = vmatprep.subr.bf16.mxu0 %v3263_v12  ;;  %2628 = vmatprep.subr.bf16.mxu1 %v3151_v48 }
 0x247   :  { %v677_v39 = vpop.f32.mrb[2].mxu0  ;;  %v748_v44 = vpop.f32.mrb[10].mxu1 }
 0x248   :  { %v2902_v58 = vadd.f32 %v677_v39, %v3418_v59  ;;  %v679_v62 = vpop.f32.mrb[3].mxu0  ;;  %v2174_v1 = vpop.f32.mrb[11].mxu1  ;;  %v766_v20 = vadd.f32 %v3433_v28, %v748_v44 }
 0x249   :  { %v2903_v6 = vadd.f32 %v679_v62, %v3422_v2 }
 0x24a   :  { %v1911_v5 = vmul.f32 -1.442695, %v2902_v58 }
 0x24b   :  { %v1912_v7 = vmul.f32 -1.442695, %v2903_v6 }
 0x24c   :  { %2954 = vpow2.f32 %v1911_v5 }
 0x24d   :  { %2956 = vpow2.f32 %v1912_v7 }
 0x256   :  { %v2955_v11 = vpop.eup %2954 }
 0x257   :  { %v756_v13 = vadd.f32 1.0, %v2955_v11  ;;  %v2957_v17 = vpop.eup %2956 }
 0x258   :  { %v763_v18 = vadd.f32 1.0, %v2957_v17 }
 0x259   :  { %2958 = vrcp.f32 %v756_v13 }
 0x25a   :  { %2960 = vrcp.f32 %v763_v18 }
 0x263   :  { %v2959_v24 = vpop.eup %2958 }
 0x264   :  { %v767_v25 = vmul.f32 %v2959_v24, %v766_v20  ;;  %v2961_v30 = vpop.eup %2960 }
 0x265   :  { %v770_v32 = vsub.f32 1.0, %v2961_v30  ;;  %v772_v37 = vmul.f32 %v2961_v30, %v606_v55 }
 0x266   :  { %v768_v27 = vadd.f32 %v767_v25, %v3410_v43 }
 0x268   :  { %2962 = vtanh.f32 %v768_v27 }
 0x272   :  { %v2963_v35 = vpop.eup %2962 }
 0x273   :  { %v771_v36 = vmul.f32 %v2963_v35, %v770_v32 }
 0x275   :  { %v773_v38 = vadd.f32 %v772_v37, %v771_v36 }
 0x277   :  { %843 = vmatmul.mubr.f32.vlgmr.msra.gmra.mrb[4].mxu0 %v773_v38  ;;  %2208 = vmatmul.mubr.f32.vlgmr.msra.gmra.mrb[12].mxu1 %v773_v38 }
 0x278   :  { %2599 = vmatpush1.bf16.msra.mxu0 %v3265_v15  ;;  %2630 = vmatpush3.bf16.msra.mxu1 %v3287_v40 }
 0x279   :  { %2601 = vmatprep.subr.bf16.mxu0 %v3268_v16  ;;  %2631 = vmatprep.subr.bf16.mxu1 %v3151_v48 }
 0x27a   :  { %1009 = vmatprep.mubr.f32.mxu0 %v3150_v0  ;;  %2242 = vmatprep.mubr.msk.f32.mxu1 %vm3152_vm1, %v3150_v0 }
 0x27c   :  { %2603 = vmatpush1.bf16.msra.mxu0 %v3273_v22  ;;  %2633 = vmatpush3.bf16.msra.mxu1 %v3300_v51 }
 0x27d   :  { %2605 = vmatprep.subr.bf16.mxu0 %v3276_v23  ;;  %2634 = vmatprep.subr.bf16.mxu1 %v3151_v48 }
 0x280   :  { %2607 = vmatpush1.bf16.msra.mxu0 %v3281_v31  ;;  %2636 = vmatpush3.bf16.msra.mxu1 %v3313_v61 }
 0x281   :  { %2609 = vmatprep.subr.bf16.mxu0 %v3284_v33  ;;  %2637 = vmatprep.subr.bf16.mxu1 %v3151_v48 }
 0x284   :  { %2611 = vmatpush1.bf16.msra.mxu0 %v3291_v42  ;;  %2639 = vmatpush3.bf16.msra.mxu1 %v3326_v8 }
 0x285   :  { %2613 = vmatprep.subr.bf16.mxu0 %v3294_v45  ;;  %2640 = vmatprep.subr.bf16.mxu1 %v3151_v48 }
 0x288   :  { %2615 = vmatpush1.bf16.msra.mxu0 %v3304_v53  ;;  %2642 = vmatpush3.bf16.msra.mxu1 %v3339_v19 }
 0x289   :  { %2617 = vmatprep.subr.bf16.mxu0 %v3307_v56  ;;  %2643 = vmatprep.subr.bf16.mxu1 %v3151_v48 }
 0x28c   :  { %2619 = vmatpush1.bf16.msra.mxu0 %v3317_v63  ;;  %2645 = vmatpush3.bf16.msra.mxu1 %v3350_v26 }
 0x28d   :  { %2621 = vmatprep.subr.bf16.mxu0 %v3320_v3  ;;  %2646 = vmatprep.subr.bf16.mxu1 %v3151_v48 }
 0x290   :  { %2623 = vmatpush1.bf16.msra.mxu0 %v3330_v10  ;;  %2648 = vmatpush3.bf16.msra.mxu1 %v3360_v29 }
 0x291   :  { %2625 = vmatprep.subr.bf16.mxu0 %v3333_v14  ;;  %2649 = vmatprep.subr.bf16.mxu1 %v3151_v48 }
 0x294   :  { %2627 = vmatpush1.bf16.msra.mxu0 %v3343_v21  ;;  %2651 = vmatpush3.bf16.msra.mxu1 %v3369_v34 }
 0x295   :  { %2653 = vmatprep.subr.bf16.mxu0 %v3263_v12  ;;  %2684 = vmatprep.subr.bf16.mxu1 %v3151_v48 }
 0x34a   :  { %v844_v43 = vpop.f32.mrb[4].mxu0  ;;  %v915_v41 = vpop.f32.mrb[12].mxu1 }
 0x34b   :  { %v2904_v46 = vadd.f32 %v844_v43, %v3418_v59  ;;  %v846_v49 = vpop.f32.mrb[5].mxu0  ;;  %v2209_v52 = vpop.f32.mrb[13].mxu1  ;;  %v933_v5 = vadd.f32 %v3433_v28, %v915_v41 }
 0x34c   :  { %v2905_v55 = vadd.f32 %v846_v49, %v3422_v2 }
 0x34d   :  { %v1913_v54 = vmul.f32 -1.442695, %v2904_v46 }
 0x34e   :  { %v1914_v39 = vmul.f32 -1.442695, %v2905_v55 }
 0x34f   :  { %2964 = vpow2.f32 %v1913_v54 }
 0x350   :  { %2966 = vpow2.f32 %v1914_v39 }
 0x359   :  { %v2965_v44 = vpop.eup %2964 }
 0x35a   :  { %v923_v58 = vadd.f32 1.0, %v2965_v44  ;;  %v2967_v62 = vpop.eup %2966 }
 0x35b   :  { %v930_v1 = vadd.f32 1.0, %v2967_v62 }
 0x35c   :  { %2968 = vrcp.f32 %v923_v58 }
 0x35d   :  { %2970 = vrcp.f32 %v930_v1 }
 0x366   :  { %v2969_v6 = vpop.eup %2968 }
 0x367   :  { %v934_v7 = vmul.f32 %v2969_v6, %v933_v5  ;;  %v2971_v13 = vpop.eup %2970 }
 0x368   :  { %v937_v17 = vsub.f32 1.0, %v2971_v13  ;;  %v939_v24 = vmul.f32 %v2971_v13, %v773_v38 }
 0x369   :  { %v935_v11 = vadd.f32 %v934_v7, %v3414_v50 }
 0x36b   :  { %2972 = vtanh.f32 %v935_v11 }
 0x375   :  { %v2973_v18 = vpop.eup %2972 }
 0x376   :  { %v938_v20 = vmul.f32 %v2973_v18, %v937_v17 }
 0x378   :  { %v940_v25 = vadd.f32 %v939_v24, %v938_v20 }
 0x37a   :  { %1010 = vmatmul.mubr.f32.vlgmr.msra.gmra.mrb[6].mxu0 %v940_v25  ;;  %2243 = vmatmul.mubr.f32.vlgmr.msra.gmra.mrb[14].mxu1 %v940_v25 }
 0x37b   :  { %2655 = vmatpush1.bf16.msra.mxu0 %v3265_v15  ;;  %2686 = vmatpush3.bf16.msra.mxu1 %v3287_v40 }
 0x37c   :  { %2657 = vmatprep.subr.bf16.mxu0 %v3268_v16  ;;  %2687 = vmatprep.subr.bf16.mxu1 %v3151_v48 }
 0x37d   :  { %1176 = vmatprep.mubr.f32.mxu0 %v3150_v0  ;;  %2277 = vmatprep.mubr.msk.f32.mxu1 %vm3152_vm1, %v3150_v0 }
 0x37f   :  { %2659 = vmatpush1.bf16.msra.mxu0 %v3273_v22  ;;  %2689 = vmatpush3.bf16.msra.mxu1 %v3300_v51 }
 0x380   :  { %2661 = vmatprep.subr.bf16.mxu0 %v3276_v23  ;;  %2690 = vmatprep.subr.bf16.mxu1 %v3151_v48 }
 0x383   :  { %2663 = vmatpush1.bf16.msra.mxu0 %v3281_v31  ;;  %2692 = vmatpush3.bf16.msra.mxu1 %v3313_v61 }
 0x384   :  { %2665 = vmatprep.subr.bf16.mxu0 %v3284_v33  ;;  %2693 = vmatprep.subr.bf16.mxu1 %v3151_v48 }
 0x387   :  { %2667 = vmatpush1.bf16.msra.mxu0 %v3291_v42  ;;  %2695 = vmatpush3.bf16.msra.mxu1 %v3326_v8 }
 0x388   :  { %2669 = vmatprep.subr.bf16.mxu0 %v3294_v45  ;;  %2696 = vmatprep.subr.bf16.mxu1 %v3151_v48 }
 0x38b   :  { %2671 = vmatpush1.bf16.msra.mxu0 %v3304_v53  ;;  %2698 = vmatpush3.bf16.msra.mxu1 %v3339_v19 }
 0x38c   :  { %2673 = vmatprep.subr.bf16.mxu0 %v3307_v56  ;;  %2699 = vmatprep.subr.bf16.mxu1 %v3151_v48 }
 0x38f   :  { %2675 = vmatpush1.bf16.msra.mxu0 %v3317_v63  ;;  %2701 = vmatpush3.bf16.msra.mxu1 %v3350_v26 }
 0x390   :  { %2677 = vmatprep.subr.bf16.mxu0 %v3320_v3  ;;  %2702 = vmatprep.subr.bf16.mxu1 %v3151_v48 }
 0x393   :  { %2679 = vmatpush1.bf16.msra.mxu0 %v3330_v10  ;;  %2704 = vmatpush3.bf16.msra.mxu1 %v3360_v29 }
 0x394   :  { %2681 = vmatprep.subr.bf16.mxu0 %v3333_v14  ;;  %2705 = vmatprep.subr.bf16.mxu1 %v3151_v48 }
 0x397   :  { %2683 = vmatpush1.bf16.msra.mxu0 %v3343_v21  ;;  %2707 = vmatpush3.bf16.msra.mxu1 %v3369_v34 }
 0x398   :  { %2709 = vmatprep.subr.bf16.mxu0 %v3263_v12  ;;  %2740 = vmatprep.subr.bf16.mxu1 %v3151_v48 }
 0x44d   :  { %v1011_v50 = vpop.f32.mrb[6].mxu0  ;;  %v1082_v27 = vpop.f32.mrb[14].mxu1 }
 0x44e   :  { %v2906_v30 = vadd.f32 %v1011_v50, %v3418_v59  ;;  %v1013_v32 = vpop.f32.mrb[7].mxu0  ;;  %v2244_v35 = vpop.f32.mrb[15].mxu1  ;;  %v1100_v52 = vadd.f32 %v3433_v28, %v1082_v27 }
 0x44f   :  { %v2907_v37 = vadd.f32 %v1013_v32, %v3422_v2 }
 0x450   :  { %v1915_v36 = vmul.f32 -1.442695, %v2906_v30 }
 0x451   :  { %v1916_v38 = vmul.f32 -1.442695, %v2907_v37 }
 0x452   :  { %2974 = vpow2.f32 %v1915_v36 }
 0x453   :  { %2976 = vpow2.f32 %v1916_v38 }
 0x45c   :  { %v2975_v43 = vpop.eup %2974 }
 0x45d   :  { %v1090_v41 = vadd.f32 1.0, %v2975_v43  ;;  %v2977_v46 = vpop.eup %2976 }
 0x45e   :  { %v1097_v49 = vadd.f32 1.0, %v2977_v46 }
 0x45f   :  { %2978 = vrcp.f32 %v1090_v41 }
 0x460   :  { %2980 = vrcp.f32 %v1097_v49 }
 0x469   :  { %v2979_v54 = vpop.eup %2978 }
 0x46a   :  { %v1101_v55 = vmul.f32 %v2979_v54, %v1100_v52  ;;  %v2981_v44 = vpop.eup %2980 }
 0x46b   :  { %v1104_v58 = vsub.f32 1.0, %v2981_v44  ;;  %v1106_v5 = vmul.f32 %v2981_v44, %v940_v25 }
 0x46c   :  { %v1102_v39 = vadd.f32 %v1101_v55, %v3412_v47 }
 0x46e   :  { %2982 = vtanh.f32 %v1102_v39 }
 0x478   :  { %v2983_v62 = vpop.eup %2982 }
 0x479   :  { %v1105_v1 = vmul.f32 %v2983_v62, %v1104_v58 }
 0x47b   :  { %v1107_v6 = vadd.f32 %v1106_v5, %v1105_v1 }
 0x47d   :  { %1177 = vmatmul.mubr.f32.vlgmr.msra.gmra.mrb[8].mxu0 %v1107_v6  ;;  %2278 = vmatmul.mubr.f32.vlgmr.msra.gmra.mrb[16].mxu1 %v1107_v6 }
 0x47e   :  { %2711 = vmatpush1.bf16.msra.mxu0 %v3265_v15  ;;  %2742 = vmatpush3.bf16.msra.mxu1 %v3287_v40 }
 0x47f   :  { %2713 = vmatprep.subr.bf16.mxu0 %v3268_v16  ;;  %2743 = vmatprep.subr.bf16.mxu1 %v3151_v48 }
 0x480   :  { %1343 = vmatprep.mubr.f32.mxu0 %v3150_v0  ;;  %2312 = vmatprep.mubr.msk.f32.mxu1 %vm3152_vm1, %v3150_v0 }
 0x482   :  { %2715 = vmatpush1.bf16.msra.mxu0 %v3273_v22  ;;  %2745 = vmatpush3.bf16.msra.mxu1 %v3300_v51 }
 0x483   :  { %2717 = vmatprep.subr.bf16.mxu0 %v3276_v23  ;;  %2746 = vmatprep.subr.bf16.mxu1 %v3151_v48 }
 0x486   :  { %2719 = vmatpush1.bf16.msra.mxu0 %v3281_v31  ;;  %2748 = vmatpush3.bf16.msra.mxu1 %v3313_v61 }
 0x487   :  { %2721 = vmatprep.subr.bf16.mxu0 %v3284_v33  ;;  %2749 = vmatprep.subr.bf16.mxu1 %v3151_v48 }
 0x48a   :  { %2723 = vmatpush1.bf16.msra.mxu0 %v3291_v42  ;;  %2751 = vmatpush3.bf16.msra.mxu1 %v3326_v8 }
 0x48b   :  { %2725 = vmatprep.subr.bf16.mxu0 %v3294_v45  ;;  %2752 = vmatprep.subr.bf16.mxu1 %v3151_v48 }
 0x48e   :  { %2727 = vmatpush1.bf16.msra.mxu0 %v3304_v53  ;;  %2754 = vmatpush3.bf16.msra.mxu1 %v3339_v19 }
 0x48f   :  { %2729 = vmatprep.subr.bf16.mxu0 %v3307_v56  ;;  %2755 = vmatprep.subr.bf16.mxu1 %v3151_v48 }
 0x492   :  { %2731 = vmatpush1.bf16.msra.mxu0 %v3317_v63  ;;  %2757 = vmatpush3.bf16.msra.mxu1 %v3350_v26 }
 0x493   :  { %2733 = vmatprep.subr.bf16.mxu0 %v3320_v3  ;;  %2758 = vmatprep.subr.bf16.mxu1 %v3151_v48 }
 0x496   :  { %2735 = vmatpush1.bf16.msra.mxu0 %v3330_v10  ;;  %2760 = vmatpush3.bf16.msra.mxu1 %v3360_v29 }
 0x497   :  { %2737 = vmatprep.subr.bf16.mxu0 %v3333_v14  ;;  %2761 = vmatprep.subr.bf16.mxu1 %v3151_v48 }
 0x49a   :  { %2739 = vmatpush1.bf16.msra.mxu0 %v3343_v21  ;;  %2763 = vmatpush3.bf16.msra.mxu1 %v3369_v34 }
 0x49b   :  { %2765 = vmatprep.subr.bf16.mxu0 %v3263_v12  ;;  %2796 = vmatprep.subr.bf16.mxu1 %v3151_v48 }
 0x550   :  { %v1178_v47 = vpop.f32.mrb[8].mxu0  ;;  %v1249_v7 = vpop.f32.mrb[16].mxu1 }
 0x551   :  { %v2908_v11 = vadd.f32 %v1178_v47, %v3418_v59  ;;  %v1180_v13 = vpop.f32.mrb[9].mxu0  ;;  %v2279_v17 = vpop.f32.mrb[17].mxu1  ;;  %v1267_v32 = vadd.f32 %v3433_v28, %v1249_v7 }
 0x552   :  { %v2909_v20 = vadd.f32 %v1180_v13, %v3422_v2 }
 0x553   :  { %v1917_v18 = vmul.f32 -1.442695, %v2908_v11 }
 0x554   :  { %v1918_v24 = vmul.f32 -1.442695, %v2909_v20 }
 0x555   :  { %2984 = vpow2.f32 %v1917_v18 }
 0x556   :  { %2986 = vpow2.f32 %v1918_v24 }
 0x55f   :  { %v2985_v25 = vpop.eup %2984 }
 0x560   :  { %v1257_v50 = vadd.f32 1.0, %v2985_v25  ;;  %v2987_v27 = vpop.eup %2986 }
 0x561   :  { %v1264_v30 = vadd.f32 1.0, %v2987_v27 }
 0x562   :  { %2988 = vrcp.f32 %v1257_v50 }
 0x563   :  { %2990 = vrcp.f32 %v1264_v30 }
 0x56c   :  { %v2989_v35 = vpop.eup %2988 }
 0x56d   :  { %v1268_v36 = vmul.f32 %v2989_v35, %v1267_v32  ;;  %v2991_v38 = vpop.eup %2990  ;;  %v1784_v32 = vld [vmem:[#allocation10 + $0x18] sm:$0xff] }
 0x56e   :  { %v1271_v43 = vsub.f32 1.0, %v2991_v38  ;;  %v1273_v49 = vmul.f32 %v2991_v38, %v1107_v6 }
 0x56f   :  { %v1269_v37 = vadd.f32 %v1268_v36, %v3420_v60  ;;  %v1785_v36 = vld [vmem:[#allocation10 + $0x20] sm:$0xff] }
 0x571   :  { %2992 = vtanh.f32 %v1269_v37  ;;  %v1786_v37 = vld [vmem:[#allocation10 + $0x28] sm:$0xff] }
 0x572   :  { %v2883_v38 = vpack.c.bf16 %v1786_v37, %v1785_v36 }
 0x57b   :  { %v2993_v41 = vpop.eup %2992 }
 0x57c   :  { %v1272_v46 = vmul.f32 %v2993_v41, %v1271_v43  ;;  %v1787_v43 = vld [vmem:[#allocation10 + $0x30] sm:$0xff] }
 0x57e   :  { %v1274_v52 = vadd.f32 %v1273_v49, %v1272_v46  ;;  %v1789_v46 = vld [vmem:[#allocation10 + $0x40] sm:$0xff]  ;;  %v1790_v49 = vld [vmem:[#allocation10 + $0x48] sm:$0xff] }
 0x580   :  { %1344 = vmatmul.mubr.f32.vlgmr.msra.gmra.mrb[10].mxu0 %v1274_v52  ;;  %2313 = vmatmul.mubr.f32.vlgmr.msra.gmra.mrb[18].mxu1 %v1274_v52 }
 0x581   :  { %2767 = vmatpush1.bf16.msra.mxu0 %v3265_v15  ;;  %2798 = vmatpush3.bf16.msra.mxu1 %v3287_v40 }
 0x582   :  { %2769 = vmatprep.subr.bf16.mxu0 %v3268_v16  ;;  %2799 = vmatprep.subr.bf16.mxu1 %v3151_v48 }
 0x583   :  { %1510 = vmatprep.mubr.f32.mxu0 %v3150_v0  ;;  %2347 = vmatprep.mubr.msk.f32.mxu1 %vm3152_vm1, %v3150_v0 }
 0x585   :  { %2771 = vmatpush1.bf16.msra.mxu0 %v3273_v22  ;;  %2801 = vmatpush3.bf16.msra.mxu1 %v3300_v51 }
 0x586   :  { %2773 = vmatprep.subr.bf16.mxu0 %v3276_v23  ;;  %2802 = vmatprep.subr.bf16.mxu1 %v3151_v48 }
 0x589   :  { %2775 = vmatpush1.bf16.msra.mxu0 %v3281_v31  ;;  %2804 = vmatpush3.bf16.msra.mxu1 %v3313_v61 }
 0x58a   :  { %2777 = vmatprep.subr.bf16.mxu0 %v3284_v33  ;;  %2805 = vmatprep.subr.bf16.mxu1 %v3151_v48 }
 0x58d   :  { %2779 = vmatpush1.bf16.msra.mxu0 %v3291_v42  ;;  %2807 = vmatpush3.bf16.msra.mxu1 %v3326_v8 }
 0x58e   :  { %2781 = vmatprep.subr.bf16.mxu0 %v3294_v45  ;;  %2808 = vmatprep.subr.bf16.mxu1 %v3151_v48 }
 0x591   :  { %2783 = vmatpush1.bf16.msra.mxu0 %v3304_v53  ;;  %2810 = vmatpush3.bf16.msra.mxu1 %v3339_v19 }
 0x592   :  { %2785 = vmatprep.subr.bf16.mxu0 %v3307_v56  ;;  %2811 = vmatprep.subr.bf16.mxu1 %v3151_v48 }
 0x595   :  { %2787 = vmatpush1.bf16.msra.mxu0 %v3317_v63  ;;  %2813 = vmatpush3.bf16.msra.mxu1 %v3350_v26 }
 0x596   :  { %2789 = vmatprep.subr.bf16.mxu0 %v3320_v3  ;;  %2814 = vmatprep.subr.bf16.mxu1 %v3151_v48 }
 0x599   :  { %2791 = vmatpush1.bf16.msra.mxu0 %v3330_v10  ;;  %2816 = vmatpush3.bf16.msra.mxu1 %v3360_v29 }
 0x59a   :  { %2793 = vmatprep.subr.bf16.mxu0 %v3333_v14  ;;  %2817 = vmatprep.subr.bf16.mxu1 %v3151_v48 }
 0x59d   :  { %2795 = vmatpush1.bf16.msra.mxu0 %v3343_v21  ;;  %2819 = vmatpush3.bf16.msra.mxu1 %v3369_v34 }
 0x59e   :  { %2821 = vmatprep.subr.bf16.mxu0 %v3263_v12  ;;  %2852 = vmatprep.subr.bf16.mxu1 %v3151_v48 }
 0x653   :  { %v1345_v60 = vpop.f32.mrb[10].mxu0  ;;  %v1416_v54 = vpop.f32.mrb[18].mxu1 }
 0x654   :  { %v2910_v55 = vadd.f32 %v1345_v60, %v3418_v59  ;;  %v1347_v39 = vpop.f32.mrb[11].mxu0  ;;  %v2314_v44 = vpop.f32.mrb[19].mxu1  ;;  %v1434_v12 = vadd.f32 %v3433_v28, %v1416_v54  ;;  %v1791_v60 = vld [vmem:[#allocation10 + $0x50] sm:$0xff]  ;;  %v1792_v54 = vld [vmem:[#allocation10 + $0x58] sm:$0xff] }
 0x655   :  { %v2911_v62 = vadd.f32 %v1347_v39, %v3422_v2  ;;  %v1793_v39 = vld [vmem:[#allocation10 + $0x60] sm:$0xff]  ;;  %v1794_v44 = vld [vmem:[#allocation10 + $0x68] sm:$0xff] }
 0x656   :  { %v1919_v58 = vmul.f32 -1.442695, %v2910_v55  ;;  %v2892_v55 = vpack.c.bf16 %v1792_v54, %v1791_v60 }
 0x657   :  { %v1920_v1 = vmul.f32 -1.442695, %v2911_v62  ;;  %v1795_v62 = vld [vmem:[#allocation10 + $0x70] sm:$0xff] }
 0x658   :  { %2994 = vpow2.f32 %v1919_v58  ;;  %v2895_v58 = vpack.c.bf16 %v1794_v44, %v1793_v39 }
 0x659   :  { %2996 = vpow2.f32 %v1920_v1  ;;  %v1796_v1 = vld [vmem:[#allocation10 + $0x78] sm:$0xff] }
 0x662   :  { %v2995_v5 = vpop.eup %2994 }
 0x663   :  { %v1424_v6 = vadd.f32 1.0, %v2995_v5  ;;  %v2997_v47 = vpop.eup %2996  ;;  %v2898_v5 = vpack.c.bf16 %v1796_v1, %v1795_v62 }
 0x664   :  { %v1431_v7 = vadd.f32 1.0, %v2997_v47 }
 0x665   :  { %2998 = vrcp.f32 %v1424_v6 }
 0x666   :  { %3000 = vrcp.f32 %v1431_v7 }
 0x66f   :  { %v2999_v11 = vpop.eup %2998 }
 0x670   :  { %v1435_v13 = vmul.f32 %v2999_v11, %v1434_v12  ;;  %v3001_v18 = vpop.eup %3000 }
 0x671   :  { %v1438_v20 = vsub.f32 1.0, %v3001_v18  ;;  %v1440_v50 = vmul.f32 %v3001_v18, %v1274_v52  ;;  %v2889_v52 = vpack.c.bf16 %v1790_v49, %v1789_v46 }
 0x672   :  { %v1436_v17 = vadd.f32 %v1435_v13, %v3416_v57  ;;  %v1782_v57 = vld [vmem:[#allocation10 + $0x8] sm:$0xff] }
 0x674   :  { %3002 = vtanh.f32 %v1436_v17 }
 0x67e   :  { %v3003_v24 = vpop.eup %3002 }
 0x67f   :  { %v1439_v25 = vmul.f32 %v3003_v24, %v1438_v20 }
 0x681   :  { %v1441_v27 = vadd.f32 %v1440_v50, %v1439_v25 }
 0x683   :  { %1511 = vmatmul.mubr.f32.vlgmr.msra.gmra.mrb[12].mxu0 %v1441_v27  ;;  %2348 = vmatmul.mubr.f32.vlgmr.msra.gmra.mrb[20].mxu1 %v1441_v27 }
 0x684   :  { %2823 = vmatpush1.bf16.msra.mxu0 %v3265_v15  ;;  %2854 = vmatpush3.bf16.msra.mxu1 %v3287_v40 }
 0x685   :  { %2825 = vmatprep.subr.bf16.mxu0 %v3268_v16  ;;  %2855 = vmatprep.subr.bf16.mxu1 %v3151_v48 }
 0x686   :  { %1677 = vmatprep.mubr.f32.mxu0 %v3150_v0  ;;  %2382 = vmatprep.mubr.msk.f32.mxu1 %vm3152_vm1, %v3150_v0 }
 0x688   :  { %2827 = vmatpush1.bf16.msra.mxu0 %v3273_v22  ;;  %2857 = vmatpush3.bf16.msra.mxu1 %v3300_v51 }
 0x689   :  { %2829 = vmatprep.subr.bf16.mxu0 %v3276_v23  ;;  %2858 = vmatprep.subr.bf16.mxu1 %v3151_v48 }
 0x68c   :  { %2831 = vmatpush1.bf16.msra.mxu0 %v3281_v31  ;;  %2860 = vmatpush3.bf16.msra.mxu1 %v3313_v61 }
 0x68d   :  { %2833 = vmatprep.subr.bf16.mxu0 %v3284_v33  ;;  %2861 = vmatprep.subr.bf16.mxu1 %v3151_v48 }
 0x690   :  { %2835 = vmatpush1.bf16.msra.mxu0 %v3291_v42  ;;  %2863 = vmatpush3.bf16.msra.mxu1 %v3326_v8 }
 0x691   :  { %2837 = vmatprep.subr.bf16.mxu0 %v3294_v45  ;;  %2864 = vmatprep.subr.bf16.mxu1 %v3151_v48 }
 0x694   :  { %2839 = vmatpush1.bf16.msra.mxu0 %v3304_v53  ;;  %2866 = vmatpush3.bf16.msra.mxu1 %v3339_v19 }
 0x695   :  { %2841 = vmatprep.subr.bf16.mxu0 %v3307_v56  ;;  %2867 = vmatprep.subr.bf16.mxu1 %v3151_v48 }
 0x698   :  { %2843 = vmatpush1.bf16.msra.mxu0 %v3317_v63  ;;  %2869 = vmatpush3.bf16.msra.mxu1 %v3350_v26 }
 0x699   :  { %2845 = vmatprep.subr.bf16.mxu0 %v3320_v3  ;;  %2870 = vmatprep.subr.bf16.mxu1 %v3151_v48 }
 0x69c   :  { %2847 = vmatpush1.bf16.msra.mxu0 %v3330_v10  ;;  %2872 = vmatpush3.bf16.msra.mxu1 %v3360_v29 }
 0x69d   :  { %2849 = vmatprep.subr.bf16.mxu0 %v3333_v14  ;;  %2873 = vmatprep.subr.bf16.mxu1 %v3151_v48 }
 0x6a0   :  { %2851 = vmatpush1.bf16.msra.mxu0 %v3343_v21  ;;  %2875 = vmatpush3.bf16.msra.mxu1 %v3369_v34  ;;  %v1781_v34 = vld [vmem:[#allocation10] sm:$0xff] }
 0x6a1   :  { %2876 = vmatprep.subr.bf16.mxu0 %v3151_v48  ;;  %v2877_v30 = vpack.c.bf16 %v1782_v57, %v1781_v34 }
 0x756   :  { %v1512_v15 = vpop.f32.mrb[12].mxu0  ;;  %v1583_v16 = vpop.f32.mrb[20].mxu1 }
 0x757   :  { %v2912_v22 = vadd.f32 %v1512_v15, %v3418_v59  ;;  %v1514_v23 = vpop.f32.mrb[13].mxu0  ;;  %v2349_v31 = vpop.f32.mrb[21].mxu1  ;;  %v1601_v61 = vadd.f32 %v3433_v28, %v1583_v16 }
 0x758   :  { %v2913_v40 = vadd.f32 %v1514_v23, %v3422_v2 }
 0x759   :  { %v1921_v33 = vmul.f32 -1.442695, %v2912_v22 }
 0x75a   :  { %v1922_v42 = vmul.f32 -1.442695, %v2913_v40  ;;  %v1925_v40 = vld [vmem:[%s3708_s6] ss:$0 sm:$0xff] }
 0x75b   :  { %3004 = vpow2.f32 %v1921_v33 }
 0x75c   :  { %3006 = vpow2.f32 %v1922_v42 }
 0x765   :  { %v3005_v45 = vpop.eup %3004 }
 0x766   :  { %v1591_v51 = vadd.f32 1.0, %v3005_v45  ;;  %v3007_v53 = vpop.eup %3006 }
 0x767   :  { %v1598_v56 = vadd.f32 1.0, %v3007_v53 }
 0x768   :  { %3008 = vrcp.f32 %v1591_v51 }
 0x769   :  { %3010 = vrcp.f32 %v1598_v56 }
 0x772   :  { %v3009_v63 = vpop.eup %3008 }
 0x773   :  { %v1602_v3 = vmul.f32 %v3009_v63, %v1601_v61  ;;  %v3011_v10 = vpop.eup %3010 }
 0x774   :  { %v1605_v14 = vsub.f32 1.0, %v3011_v10  ;;  %v1607_v26 = vmul.f32 %v3011_v10, %v1441_v27 }
 0x775   :  { %v1603_v8 = vadd.f32 %v1602_v3, %v3427_v9  ;;  %v1783_v9 = vld [vmem:[#allocation10 + $0x10] sm:$0xff] }
 0x776   :  { %v2880_v35 = vpack.c.bf16 %v1784_v32, %v1783_v9 }
 0x777   :  { %3012 = vtanh.f32 %v1603_v8 }
 0x781   :  { %v3013_v19 = vpop.eup %3012 }
 0x782   :  { %v1606_v21 = vmul.f32 %v3013_v19, %v1605_v14 }
 0x784   :  { %v3669_v29 = vadd.f32 %v1607_v26, %v1606_v21 }
 0x786   :  { %1678 = vmatmul.mubr.f32.vlgmr.msra.gmra.mrb[14].mxu0 %v3669_v29  ;;  %2383 = vmatmul.mubr.f32.vlgmr.msra.gmra.mrb[22].mxu1 %v3669_v29 }
 0x787   :  { %2417 = vmatprep.mubr.msk.f32.mxu0 %vm3152_vm1, %v3150_v0  ;;  %2878 = vmatpush3.bf16.msra.mxu0 %v2877_v30  ;;  %v1788_v0 = vld [vmem:[#allocation10 + $0x38] sm:$0xff] }
 0x788   :  { %2879 = vmatprep.subr.bf16.mxu0 %v3151_v48  ;;  %v2886_v41 = vpack.c.bf16 %v1788_v0, %v1787_v43 }
 0x78b   :  { %2881 = vmatpush3.bf16.msra.mxu0 %v2880_v35 }
 0x78c   :  { %2882 = vmatprep.subr.bf16.mxu0 %v3151_v48 }
 0x78f   :  { %2884 = vmatpush3.bf16.msra.mxu0 %v2883_v38 }
 0x790   :  { %2885 = vmatprep.subr.bf16.mxu0 %v3151_v48 }
 0x793   :  { %2887 = vmatpush3.bf16.msra.mxu0 %v2886_v41 }
 0x794   :  { %2888 = vmatprep.subr.bf16.mxu0 %v3151_v48 }
 0x797   :  { %2890 = vmatpush3.bf16.msra.mxu0 %v2889_v52 }
 0x798   :  { %2891 = vmatprep.subr.bf16.mxu0 %v3151_v48 }
 0x79b   :  { %2893 = vmatpush3.bf16.msra.mxu0 %v2892_v55 }
 0x79c   :  { %2894 = vmatprep.subr.bf16.mxu0 %v3151_v48 }
 0x79f   :  { %2896 = vmatpush3.bf16.msra.mxu0 %v2895_v58 }
 0x7a0   :  { %2897 = vmatprep.subr.bf16.mxu0 %v3151_v48 }
 0x7a3   :  { %2899 = vmatpush3.bf16.msra.mxu0 %v2898_v5 }
 0x859   :  { %v1679_v6 = vpop.f32.mrb[14].mxu0  ;;  %v1750_v47 = vpop.f32.mrb[22].mxu1 }
 0x85a   :  { %v2914_v7 = vadd.f32 %v1679_v6, %v3418_v59  ;;  %v1681_v12 = vpop.f32.mrb[15].mxu0  ;;  %v2384_v11 = vpop.f32.mrb[23].mxu1  ;;  %v1768_v48 = vadd.f32 %v3433_v28, %v1750_v47 }
 0x85b   :  { %v2915_v17 = vadd.f32 %v1681_v12, %v3422_v2 }
 0x85c   :  { %v1923_v13 = vmul.f32 -1.442695, %v2914_v7 }
 0x85d   :  { %v1924_v18 = vmul.f32 -1.442695, %v2915_v17 }
 0x85e   :  { %3014 = vpow2.f32 %v1923_v13 }
 0x85f   :  { %3016 = vpow2.f32 %v1924_v18 }
 0x868   :  { %v3015_v20 = vpop.eup %3014 }
 0x869   :  { %v1758_v24 = vadd.f32 1.0, %v3015_v20  ;;  %v3017_v25 = vpop.eup %3016 }
 0x86a   :  { %v1765_v50 = vadd.f32 1.0, %v3017_v25 }
 0x86b   :  { %3018 = vrcp.f32 %v1758_v24 }
 0x86c   :  { %3020 = vrcp.f32 %v1765_v50 }
 0x875   :  { %v3019_v27 = vpop.eup %3018 }
 0x876   :  { %v1769_v15 = vmul.f32 %v3019_v27, %v1768_v48  ;;  %v3021_v16 = vpop.eup %3020 }
 0x877   :  { %v1772_v22 = vsub.f32 1.0, %v3021_v16  ;;  %v1774_v31 = vmul.f32 %v3021_v16, %v3669_v29 }
 0x878   :  { %v1770_v59 = vadd.f32 %v1769_v15, %v3424_v4 }
 0x87a   :  { %3022 = vtanh.f32 %v1770_v59 }
 0x884   :  { %v3023_v23 = vpop.eup %3022 }
 0x885   :  { %v1773_v2 = vmul.f32 %v3023_v23, %v1772_v22 }
 0x887   :  { %v1775_v33 = vadd.f32 %v1774_v31, %v1773_v2 }
 0x889   :  { %2418 = vmatmul.mubr.f32.vlgmr.msra.gmra.mrb[16].mxu0 %v1775_v33 }
 0x95c   :  { %v1870_v28 = vpop.f32.mrb[16].mxu0 }
 0x95d   :  { %v1871_v42 = vadd.f32 %v1925_v40, %v1870_v28  ;;  %v2419_v45 = vpop.f32.mrb[17].mxu0 }
 0x95f   :  { %1874 = vst [vmem:[#allocation12] sm:$0xff] %v1871_v42 }
 0x960   :  { %3123 = shalt.err (!%p3120_p8)
}
 0x961   :  { %s3124_s13 = scalar_lea.hbm %s3709_s7, 128 }
 0x962   :  { %p3125_p9 = scmp.ne.s32.totalorder %s3709_s7, %s3124_s13  ;;  %p3128_p10 = scmp.lt.u32.totalorder %s3124_s13, %s3709_s7 }
 0x964   :  { %p3130_p11 = pnand %p3128_p10, %p3125_p9 }
 0x966   :  { %3133 = shalt.err (!%p3130_p11)
}
 0x967   :  { %1884 = dma.vmem_to_hbm [thread:$0]  %s1882_s30, 128, %s3709_s7, [#allocation6]  }
 0x968   :  { %3140 = dma.done.wait [#allocation6], 128  }
 0x969   :  { %3141 = vsyncadd [#allocation6], 4294967168 }
 0x96a   :  { %1888 = vsyncpa [#allocation5], 1 }
 0x96b   :  { %1889 = vsyncpa [#allocation8], 1 }
 0x96c   :  { %1890 = vsyncpa [#allocation11], 1 }
 0x96d   :  { %1891 = vsyncpa [#allocation6], 1 }

// kernel: tpu_custom_call.1
= control target key start
LH: loop header
LB: loop body
LE: loop exit
PB: predicated region body
PF: predicated region fallthrough
CT: control target
= control target key end

     0   :  { %12 = vsyncpa [#allocation5], 0  ;;  %s3702_s0 = inlined_call_operand.hbm [shape: f32[8,8,16], index: 0, kind: input, shape index: {}]   ;;  %s3703_s1 = inlined_call_operand.hbm [shape: f32[16,384], index: 1, kind: input, shape index: {}]   ;;  %s3704_s2 = inlined_call_operand.hbm [shape: f32[128,384], index: 2, kind: input, shape index: {}]   ;;  %s3705_s3 = inlined_call_operand.vmem [shape: f32[1,384], index: 3, kind: input, shape index: {}]   ;;  %s3706_s4 = inlined_call_operand.vmem [shape: f32[1,128], index: 4, kind: input, shape index: {}]   ;;  %s3707_s5 = inlined_call_operand.hbm [shape: f32[128,128], index: 5, kind: input, shape index: {}]   ;;  %s3708_s6 = inlined_call_operand.vmem [shape: f32[1,128], index: 6, kind: input, shape index: {}]   ;;  %s3709_s7 = inlined_call_operand.hbm [shape: f32[8,128], index: 7, kind: output, shape index: {}]  }
   0x1   :  { %13 = vsyncpa [#allocation8], 0 }
   0x2   :  { %14 = vsyncpa [#allocation11], 0 }
   0x3   :  { %15 = vsyncpa [#allocation6], 0  ;;  %s3142_s24 = smov [#allocation7]   ;;  %s3024_s28 = scalar_lea.hbm %s3703_s1, 768 }
   0x4   :  { %s33_s25 = sshll.u32 %s3142_s24, 4  ;;  %p3025_p0 = scmp.ne.s32.totalorder %s3703_s1, %s3024_s28  ;;  %s34_s25 = int_to_ptr.vmem [resolvable:$true] %s33_s25 }
   0x5   :  { %p3028_p1 = scmp.lt.u32.totalorder %s3024_s28, %s3703_s1 }
   0x7   :  { %p3030_p2 = pnand %p3028_p1, %p3025_p0 }
   0x9   :  { %3033 = shalt.err (!%p3030_p2)
}
   0xa   :  { %s3034_s10 = scalar_lea.vmem %s34_s25, 768  ;;  %p3039_p4 = scmp.lt.s32.totalorder %s34_s25, %s34_s25 }
   0xb   :  { %p3035_p3 = scmp.ne.s32.totalorder %s34_s25, %s3034_s10  ;;  %p3040_p5 = scmp.lt.s32.totalorder %s3034_s10, %s3034_s10 }
   0xd   :  { %p3041_p6 = por %p3040_p5, %p3039_p4 }
   0xf   :  { %p3042_p7 = pnand %p3041_p6, %p3035_p3 }
  0x11   :  { %3045 = shalt.err (!%p3042_p7)
}
  0x12   :  { %s3143_s11 = smov 384   ;;  %s3144_s12 = smov 24  }
  0x13   :  { %39 = dma.hbm_to_vmem [thread:$0]  %s3703_s1, 768, %s34_s25, [#allocation8], %s3143_s11, %s3143_s11, %s3144_s12  }
  0x14   :  { %s3145_s15 = smov [#allocation4]   ;;  %s3046_s19 = scalar_lea.hbm %s3702_s0, 1024 }
  0x15   :  { %s21_s16 = sshll.u32 %s3145_s15, 4  ;;  %p3047_p8 = scmp.ne.s32.totalorder %s3702_s0, %s3046_s19  ;;  %s22_s16 = int_to_ptr.vmem [resolvable:$true] %s21_s16 }
  0x16   :  { %p3050_p9 = scmp.lt.u32.totalorder %s3046_s19, %s3702_s0 }
  0x18   :  { %p3052_p10 = pnand %p3050_p9, %p3047_p8 }
  0x1a   :  { %3055 = shalt.err (!%p3052_p10)
}
  0x1b   :  { %s3056_s24 = scalar_lea.vmem %s22_s16, 1024  ;;  %p3061_p12 = scmp.lt.s32.totalorder %s22_s16, %s22_s16 }
  0x1c   :  { %p3057_p11 = scmp.ne.s32.totalorder %s22_s16, %s3056_s24  ;;  %p3062_p13 = scmp.lt.s32.totalorder %s3056_s24, %s3056_s24 }
  0x1e   :  { %p3063_p0 = por %p3062_p13, %p3061_p12 }
  0x20   :  { %p3064_p1 = pnand %p3063_p0, %p3057_p11 }
  0x22   :  { %3067 = shalt.err (!%p3064_p1)
}
  0x23   :  { %s3146_s1 = smov 128   ;;  %s3147_s25 = smov 8  }
  0x24   :  { %27 = dma.hbm_to_vmem [thread:$0]  %s3702_s0, 1024, %s22_s16, [#allocation5], %s3146_s1, %s3146_s1, %s3147_s25  }
  0x25   :  { %s3148_s28 = smov [#allocation9]   ;;  %s3149_s30 = smov [#allocation10]  }
  0x26   :  { %s45_s29 = sshll.u32 %s3148_s28, 4  ;;  %s61_s8 = sshll.u32 %s3149_s30, 4  ;;  %s46_s29 = int_to_ptr.vmem [resolvable:$true] %s45_s29  ;;  %s3224_s8 = int_to_ptr.vmem [resolvable:$true] %s61_s8 }
  0x27   :  { %s3068_s13 = scalar_lea.hbm %s3704_s2, 6144 }
  0x28   :  { %p3069_p2 = scmp.ne.s32.totalorder %s3704_s2, %s3068_s13  ;;  %p3072_p3 = scmp.lt.u32.totalorder %s3068_s13, %s3704_s2 }
  0x2a   :  { %p3074_p4 = pnand %p3072_p3, %p3069_p2 }
  0x2c   :  { %3077 = shalt.err (!%p3074_p4)
}
  0x2d   :  { %s3078_s0 = scalar_lea.vmem %s46_s29, 6144  ;;  %p3083_p6 = scmp.lt.s32.totalorder %s46_s29, %s46_s29 }
  0x2e   :  { %p3079_p5 = scmp.ne.s32.totalorder %s46_s29, %s3078_s0  ;;  %p3084_p7 = scmp.lt.s32.totalorder %s3078_s0, %s3078_s0 }
  0x30   :  { %p3085_p8 = por %p3084_p7, %p3083_p6 }
  0x32   :  { %p3086_p9 = pnand %p3085_p8, %p3079_p5 }
  0x34   :  { %3089 = shalt.err (!%p3086_p9)
}
  0x35   :  { %51 = dma.hbm_to_vmem [thread:$0]  %s3704_s2, 6144, %s46_s29, [#allocation8], %s3143_s11, %s3143_s11, %s3144_s12  }
  0x36   :  { %s3090_s22 = scalar_lea.hbm %s3707_s5, 2048 }
  0x37   :  { %p3091_p10 = scmp.ne.s32.totalorder %s3707_s5, %s3090_s22  ;;  %p3094_p11 = scmp.lt.u32.totalorder %s3090_s22, %s3707_s5 }
  0x39   :  { %p3096_p12 = pnand %p3094_p11, %p3091_p10 }
  0x3b   :  { %3099 = shalt.err (!%p3096_p12)
}
  0x3c   :  { %s3100_s28 = scalar_lea.vmem %s3224_s8, 2048  ;;  %p3105_p0 = scmp.lt.s32.totalorder %s3224_s8, %s3224_s8 }
  0x3d   :  { %p3101_p13 = scmp.ne.s32.totalorder %s3224_s8, %s3100_s28  ;;  %p3106_p1 = scmp.lt.s32.totalorder %s3100_s28, %s3100_s28 }
  0x3f   :  { %p3107_p2 = por %p3106_p1, %p3105_p0 }
  0x41   :  { %p3108_p3 = pnand %p3107_p2, %p3101_p13 }
  0x43   :  { %3111 = shalt.err (!%p3108_p3)
}
  0x44   :  { %67 = dma.hbm_to_vmem [thread:$0]  %s3707_s5, 2048, %s3224_s8, [#allocation11], %s3146_s1, %s3146_s1, %s3147_s25  }
  0x45   :  { %3134 = dma.done.wait [#allocation5], 1024  }
  0x46   :  { %3135 = vsyncadd [#allocation5], 4294966272 }
  0x47   :  { %3136 = dma.done.wait [#allocation8], 6912  }
  0x48   :  { %3137 = vsyncadd [#allocation8], 4294960384 }
  0x49   :  { %3138 = dma.done.wait [#allocation11], 2048  }
  0x4a   :  { %3139 = vsyncadd [#allocation11], 4294965248  ;;  %v3150_v0 = vmov 0.0   ;;  %v96_v1 = vld [vmem:[#allocation7 + $0x8] sm:$0xff]  ;;  %v99_v2 = vld [vmem:[#allocation7 + $0x20] sm:$0xff]  ;;  %vm118_vm0 = vcmask 130048  }
  0x4b   :  { %207 = vmatprep.mubr.f32.mxu0 %v3150_v0  ;;  %v95_v3 = vld [vmem:[#allocation7] sm:$0xff]  ;;  %v2420_v4 = vpack.c.bf16 %v99_v2, %v96_v1  ;;  %v98_v5 = vld [vmem:[#allocation7 + $0x18] sm:$0xff]  ;;  %v400_v9 = vld [vmem:[#allocation9 + $0x20] sm:$0xff]  ;;  %v3151_v48 = vmov 0.0|0.0   ;;  %vm3152_vm1 = vmmov 0   ;;  %s3153_s29 = smov [#allocation12]  }
  0x4c   :  { %v87_v6 = vld [vmem:[#allocation4] sm:$0xff]  ;;  %v397_v7 = vld [vmem:[#allocation9 + $0x8] sm:$0xff]  ;;  %v2422_v8 = vpack.c.bf16 %v98_v5, %v95_v3  ;;  %v396_v10 = vld [vmem:[#allocation9] sm:$0xff]  ;;  %s1881_s30 = sshll.u32 %s3153_s29, 4  ;;  %s1882_s30 = int_to_ptr.vmem [resolvable:$true] %s1881_s30 }
  0x4d   :  { %v399_v11 = vld [vmem:[#allocation9 + $0x18] sm:$0xff]  ;;  %2093 = vmatprep.mubr.msk.f32.mxu1 %vm118_vm0, %v87_v6  ;;  %2421 = vmatprep.subr.bf16.mxu0 %v2420_v4  ;;  %v3263_v12 = vpack.c.bf16 %v400_v9, %v397_v7  ;;  %v406_v14 = vld [vmem:[#allocation9 + $0x50] sm:$0xff]  ;;  %v405_v18 = vld [vmem:[#allocation9 + $0x48] sm:$0xff]  ;;  %s3112_s8 = scalar_lea.vmem %s1882_s30, 128  ;;  %p3117_p5 = scmp.lt.s32.totalorder %s1882_s30, %s1882_s30 }
  0x4e   :  { %v403_v13 = vld [vmem:[#allocation9 + $0x38] sm:$0xff]  ;;  %2423 = vmatpush1.bf16.msra.mxu0 %v2422_v8  ;;  %v3265_v15 = vpack.c.bf16 %v399_v11, %v396_v10  ;;  %v402_v17 = vld [vmem:[#allocation9 + $0x30] sm:$0xff]  ;;  %v409_v19 = vld [vmem:[#allocation9 + $0x68] sm:$0xff]  ;;  %p3113_p4 = scmp.ne.s32.totalorder %s1882_s30, %s3112_s8  ;;  %p3118_p6 = scmp.lt.s32.totalorder %s3112_s8, %s3112_s8 }
  0x4f   :  { %2429 = vmatprep.subr.bf16.mxu0 %v3263_v12  ;;  %v3268_v16 = vpack.c.bf16 %v406_v14, %v403_v13  ;;  %v412_v20 = vld [vmem:[#allocation9 + $0x80] sm:$0xff]  ;;  %v88_v21 = vld [vmem:[#allocation4 + $0x8] sm:$0xff]  ;;  %v3273_v22 = vpack.c.bf16 %v405_v18, %v402_v17  ;;  %v418_v27 = vld [vmem:[#allocation9 + $0xb0] sm:$0xff] }
  0x50   :  { %v3276_v23 = vpack.c.bf16 %v412_v20, %v409_v19  ;;  %v408_v24 = vld [vmem:[#allocation9 + $0x60] sm:$0xff]  ;;  %v411_v25 = vld [vmem:[#allocation9 + $0x78] sm:$0xff]  ;;  %v414_v34 = vld [vmem:[#allocation9 + $0x90] sm:$0xff]  ;;  %p3119_p7 = por %p3118_p6, %p3117_p5 }
  0x51   :  { %1892 = vmatmul.mubr.msk.f32.vlgmr.msra.gmra.mrb[0].mxu0 %vm118_vm0, %v87_v6  ;;  %v415_v26 = vld [vmem:[#allocation9 + $0x98] sm:$0xff]  ;;  %v97_v28 = vld [vmem:[#allocation7 + $0x10] sm:$0xff]  ;;  %v3281_v31 = vpack.c.bf16 %v411_v25, %v408_v24  ;;  %v417_v35 = vld [vmem:[#allocation9 + $0xa8] sm:$0xff] }
  0x52   :  { %2431 = vmatpush1.bf16.msra.mxu0 %v3265_v15  ;;  %213 = vmatprep.mubr.f32.mxu0 %v3150_v0  ;;  %v100_v29 = vld [vmem:[#allocation7 + $0x28] sm:$0xff]  ;;  %v89_v30 = vld [vmem:[#allocation4 + $0x10] sm:$0xff]  ;;  %v3284_v33 = vpack.c.bf16 %v418_v27, %v415_v26  ;;  %v398_v36 = vld [vmem:[#allocation9 + $0x10] sm:$0xff]  ;;  %v3291_v42 = vpack.c.bf16 %v417_v35, %v414_v34  ;;  %v103_v35 = vlaneseq  ;;  %p3120_p8 = pnand %p3119_p7, %p3113_p4 }
  0x53   :  { %2433 = vmatprep.subr.bf16.mxu0 %v3268_v16  ;;  %v2424_v32 = vpack.c.bf16 %v100_v29, %v97_v28  ;;  %v421_v37 = vld [vmem:[#allocation9 + $0xc8] sm:$0xff]  ;;  %v424_v38 = vld [vmem:[#allocation9 + $0xe0] sm:$0xff]  ;;  %v407_v44 = vld [vmem:[#allocation9 + $0x58] sm:$0xff] }
  0x54   :  { %v401_v39 = vld [vmem:[#allocation9 + $0x28] sm:$0xff]  ;;  %v404_v43 = vld [vmem:[#allocation9 + $0x40] sm:$0xff]  ;;  %v3294_v45 = vpack.c.bf16 %v424_v38, %v421_v37  ;;  %v423_v47 = vld [vmem:[#allocation9 + $0xd8] sm:$0xff] }
  0x55   :  { %1893 = vmatmul.mubr.msk.f32.gmra.mrb[2].mxu0 %vm118_vm0, %v88_v21  ;;  %2425 = vmatprep.subr.bf16.mxu1 %v2424_v32  ;;  %v3287_v40 = vpack.c.bf16 %v401_v39, %v398_v36  ;;  %v90_v41 = vld [vmem:[#allocation4 + $0x18] sm:$0xff]  ;;  %v420_v46 = vld [vmem:[#allocation9 + $0xc0] sm:$0xff]  ;;  %v427_v49 = vld [vmem:[#allocation9 + $0xf8] sm:$0xff]  ;;  %v3300_v51 = vpack.c.bf16 %v407_v44, %v404_v43  ;;  %v104_v36 = vshrl.u32 %v103_v35, 7 }
  0x56   :  { %2435 = vmatpush1.bf16.msra.mxu0 %v3273_v22  ;;  %219 = vmatprep.mubr.f32.mxu0 %v3150_v0  ;;  %v430_v50 = vld [vmem:[#allocation9 + $0x110] sm:$0xff]  ;;  %v3304_v53 = vpack.c.bf16 %v423_v47, %v420_v46  ;;  %v413_v55 = vld [vmem:[#allocation9 + $0x88] sm:$0xff]  ;;  %v436_v60 = vld [vmem:[#allocation9 + $0x140] sm:$0xff] }
  0x57   :  { %2437 = vmatprep.subr.bf16.mxu0 %v3276_v23  ;;  %2427 = vmatpush3.bf16.msra.mxu1 %v2424_v32  ;;  %v91_v52 = vld [vmem:[#allocation4 + $0x20] sm:$0xff]  ;;  %v3307_v56 = vpack.c.bf16 %v430_v50, %v427_v49  ;;  %v429_v58 = vld [vmem:[#allocation9 + $0x108] sm:$0xff]  ;;  %v92_v62 = vld [vmem:[#allocation4 + $0x28] sm:$0xff]  ;;  %v113_v37 = vsub.s32 2, %v104_v36 }
  0x58   :  { %2460 = vmatprep.subr.bf16.mxu1 %v3151_v48  ;;  %v410_v54 = vld [vmem:[#allocation9 + $0x70] sm:$0xff]  ;;  %v433_v59 = vld [vmem:[#allocation9 + $0x128] sm:$0xff]  ;;  %v416_v1 = vld [vmem:[#allocation9 + $0xa0] sm:$0xff] }
  0x59   :  { %1894 = vmatmul.mubr.msk.f32.gmra.mrb[4].mxu0 %vm118_vm0, %v89_v30  ;;  %v426_v57 = vld [vmem:[#allocation9 + $0xf0] sm:$0xff]  ;;  %v3313_v61 = vpack.c.bf16 %v413_v55, %v410_v54  ;;  %v419_v2 = vld [vmem:[#allocation9 + $0xb8] sm:$0xff]  ;;  %v3320_v3 = vpack.c.bf16 %v436_v60, %v433_v59  ;;  %v432_v4 = vld [vmem:[#allocation9 + $0x120] sm:$0xff]  ;;  %v109_v55 = vsub.s32 1, %v104_v36 }
  0x5a   :  { %2439 = vmatpush1.bf16.msra.mxu0 %v3281_v31  ;;  %225 = vmatprep.mubr.f32.mxu0 %v3150_v0  ;;  %v3317_v63 = vpack.c.bf16 %v429_v58, %v426_v57  ;;  %v435_v5 = vld [vmem:[#allocation9 + $0x138] sm:$0xff]  ;;  %v442_v7 = vld [vmem:[#allocation9 + $0x170] sm:$0xff]  ;;  %v3326_v8 = vpack.c.bf16 %v419_v2, %v416_v1  ;;  %v93_v9 = vld [vmem:[#allocation4 + $0x30] sm:$0xff] }
  0x5b   :  { %2441 = vmatprep.subr.bf16.mxu0 %v3284_v33  ;;  %2094 = vmatmul.mubr.msk.f32.vlgmr.msra.gmra.mrb[0].mxu1 %vm118_vm0, %v88_v21  ;;  %v439_v6 = vld [vmem:[#allocation9 + $0x158] sm:$0xff]  ;;  %v3330_v10 = vpack.c.bf16 %v435_v5, %v432_v4  ;;  %v422_v11 = vld [vmem:[#allocation9 + $0xd0] sm:$0xff]  ;;  %v425_v13 = vld [vmem:[#allocation9 + $0xe8] sm:$0xff] }
  0x5c   :  { %2462 = vmatpush3.bf16.msra.mxu1 %v3287_v40  ;;  %2096 = vmatprep.mubr.msk.f32.mxu1 %vm118_vm0, %v89_v30  ;;  %v3333_v14 = vpack.c.bf16 %v442_v7, %v439_v6  ;;  %v438_v17 = vld [vmem:[#allocation9 + $0x150] sm:$0xff]  ;;  %v441_v18 = vld [vmem:[#allocation9 + $0x168] sm:$0xff]  ;;  %v3339_v19 = vpack.c.bf16 %v425_v13, %v422_v11  ;;  %v428_v24 = vld [vmem:[#allocation9 + $0x100] sm:$0xff] }
  0x5d   :  { %1895 = vmatmul.mubr.msk.f32.gmra.mrb[6].mxu0 %vm118_vm0, %v90_v41  ;;  %2463 = vmatprep.subr.bf16.mxu1 %v3151_v48  ;;  %v94_v20 = vld [vmem:[#allocation4 + $0x38] sm:$0xff]  ;;  %v3343_v21 = vpack.c.bf16 %v441_v18, %v438_v17  ;;  %v431_v25 = vld [vmem:[#allocation9 + $0x118] sm:$0xff]  ;;  %v434_v27 = vld [vmem:[#allocation9 + $0x130] sm:$0xff] }
  0x5e   :  { %2443 = vmatpush1.bf16.msra.mxu0 %v3291_v42  ;;  %231 = vmatprep.mubr.f32.mxu0 %v3150_v0  ;;  %v3350_v26 = vpack.c.bf16 %v431_v25, %v428_v24  ;;  %v437_v28 = vld [vmem:[#allocation9 + $0x148] sm:$0xff]  ;;  %v440_v30 = vld [vmem:[#allocation9 + $0x160] sm:$0xff]  ;;  %v443_v32 = vld [vmem:[#allocation9 + $0x178] sm:$0xff] }
  0x5f   :  { %2445 = vmatprep.subr.bf16.mxu0 %v3294_v45  ;;  %2097 = vmatmul.mubr.msk.f32.gmra.mrb[2].mxu1 %vm118_vm0, %v90_v41  ;;  %v3360_v29 = vpack.c.bf16 %v437_v28, %v434_v27  ;;  %v3369_v34 = vpack.c.bf16 %v443_v32, %v440_v30  ;;  %v101_v38 = vld [vmem:[%s3705_s3] sm:$0x7] }
  0x60   :  { %2465 = vmatpush3.bf16.msra.mxu1 %v3300_v51  ;;  %2099 = vmatprep.mubr.msk.f32.mxu1 %vm118_vm0, %v91_v52  ;;  %v114_v39 = vrot.slane %v101_v38, %v113_v37  ;;  %v3422_v2 = vrot.slane %v101_v38, %v109_v55  ;;  %v3433_v28 = vld [vmem:[%s3706_s4] ss:$0 sm:$0xff] }
  0x61   :  { %1896 = vmatmul.mubr.msk.f32.gmra.mrb[8].mxu0 %vm118_vm0, %v91_v52  ;;  %2466 = vmatprep.subr.bf16.mxu1 %v3151_v48  ;;  %v105_v52 = vsub.s32 0, %v104_v36 }
  0x62   :  { %2447 = vmatpush1.bf16.msra.mxu0 %v3304_v53  ;;  %237 = vmatprep.mubr.f32.mxu0 %v3150_v0 }
  0x63   :  { %2449 = vmatprep.subr.bf16.mxu0 %v3307_v56  ;;  %2100 = vmatmul.mubr.msk.f32.gmra.mrb[4].mxu1 %vm118_vm0, %v92_v62  ;;  %v3418_v59 = vrot.slane %v101_v38, %v105_v52 }
  0x64   :  { %2468 = vmatpush3.bf16.msra.mxu1 %v3313_v61  ;;  %2102 = vmatprep.mubr.msk.f32.mxu1 %vm118_vm0, %v93_v9 }
  0x65   :  { %1897 = vmatmul.mubr.msk.f32.gmra.mrb[10].mxu0 %vm118_vm0, %v92_v62  ;;  %2469 = vmatprep.subr.bf16.mxu1 %v3151_v48 }
  0x66   :  { %2451 = vmatpush1.bf16.msra.mxu0 %v3317_v63  ;;  %243 = vmatprep.mubr.f32.mxu0 %v3150_v0 }
  0x67   :  { %2453 = vmatprep.subr.bf16.mxu0 %v3320_v3  ;;  %2103 = vmatmul.mubr.msk.f32.gmra.mrb[6].mxu1 %vm118_vm0, %v94_v20 }
  0x68   :  { %2471 = vmatpush3.bf16.msra.mxu1 %v3326_v8  ;;  %2137 = vmatprep.mubr.msk.f32.mxu1 %vm3152_vm1, %v3150_v0 }
  0x69   :  { %1898 = vmatmul.mubr.msk.f32.gmra.mrb[12].mxu0 %vm118_vm0, %v93_v9  ;;  %2472 = vmatprep.subr.bf16.mxu1 %v3151_v48 }
  0x6a   :  { %2455 = vmatpush1.bf16.msra.mxu0 %v3330_v10  ;;  %249 = vmatprep.mubr.f32.mxu0 %v3150_v0 }
  0x6b   :  { %2457 = vmatprep.subr.bf16.mxu0 %v3333_v14 }
  0x6c   :  { %2474 = vmatpush3.bf16.msra.mxu1 %v3339_v19 }
  0x6d   :  { %1899 = vmatmul.mubr.msk.f32.gmra.mrb[14].mxu0 %vm118_vm0, %v94_v20  ;;  %2475 = vmatprep.subr.bf16.mxu1 %v3151_v48 }
  0x6e   :  { %2459 = vmatpush1.bf16.msra.mxu0 %v3343_v21  ;;  %508 = vmatprep.mubr.f32.mxu0 %v3150_v0 }
  0x6f   :  { %2485 = vmatprep.subr.bf16.mxu0 %v3263_v12 }
  0x70   :  { %2477 = vmatpush3.bf16.msra.mxu1 %v3350_v26 }
  0x71   :  { %509 = vmatmul.mubr.f32.vlgmr.msra.gmra.mrb[0].mxu0 %v3150_v0  ;;  %2478 = vmatprep.subr.bf16.mxu1 %v3151_v48 }
  0x72   :  { %2487 = vmatpush1.bf16.msra.mxu0 %v3265_v15  ;;  %675 = vmatprep.mubr.f32.mxu0 %v3150_v0 }
  0x73   :  { %2489 = vmatprep.subr.bf16.mxu0 %v3268_v16 }
  0x74   :  { %2480 = vmatpush3.bf16.msra.mxu1 %v3360_v29 }
  0x75   :  { %2481 = vmatprep.subr.bf16.mxu1 %v3151_v48 }
  0x76   :  { %2491 = vmatpush1.bf16.msra.mxu0 %v3273_v22 }
  0x77   :  { %2493 = vmatprep.subr.bf16.mxu0 %v3276_v23 }
  0x78   :  { %2483 = vmatpush3.bf16.msra.mxu1 %v3369_v34 }
  0x79   :  { %2516 = vmatprep.subr.bf16.mxu1 %v3151_v48 }
  0x7a   :  { %2495 = vmatpush1.bf16.msra.mxu0 %v3281_v31 }
  0x7b   :  { %2138 = vmatmul.mubr.f32.vlgmr.msra.gmra.mrb[8].mxu1 %v3150_v0  ;;  %2497 = vmatprep.subr.bf16.mxu0 %v3284_v33 }
  0x7c   :  { %2518 = vmatpush3.bf16.msra.mxu1 %v3287_v40  ;;  %2172 = vmatprep.mubr.msk.f32.mxu1 %vm3152_vm1, %v3150_v0 }
  0x7d   :  { %2519 = vmatprep.subr.bf16.mxu1 %v3151_v48 }
  0x7e   :  { %2499 = vmatpush1.bf16.msra.mxu0 %v3291_v42 }
  0x7f   :  { %2501 = vmatprep.subr.bf16.mxu0 %v3294_v45 }
  0x80   :  { %2521 = vmatpush3.bf16.msra.mxu1 %v3300_v51 }
  0x81   :  { %2522 = vmatprep.subr.bf16.mxu1 %v3151_v48 }
  0x82   :  { %2503 = vmatpush1.bf16.msra.mxu0 %v3304_v53 }
  0x83   :  { %2505 = vmatprep.subr.bf16.mxu0 %v3307_v56 }
  0x84   :  { %2524 = vmatpush3.bf16.msra.mxu1 %v3313_v61 }
  0x85   :  { %2525 = vmatprep.subr.bf16.mxu1 %v3151_v48 }
  0x86   :  { %2507 = vmatpush1.bf16.msra.mxu0 %v3317_v63 }
  0x87   :  { %2509 = vmatprep.subr.bf16.mxu0 %v3320_v3 }
  0x88   :  { %2527 = vmatpush3.bf16.msra.mxu1 %v3326_v8 }
  0x89   :  { %2528 = vmatprep.subr.bf16.mxu1 %v3151_v48 }
  0x8a   :  { %2511 = vmatpush1.bf16.msra.mxu0 %v3330_v10 }
  0x8b   :  { %2513 = vmatprep.subr.bf16.mxu0 %v3333_v14 }
  0x8c   :  { %2530 = vmatpush3.bf16.msra.mxu1 %v3339_v19 }
  0x8d   :  { %2531 = vmatprep.subr.bf16.mxu1 %v3151_v48 }
  0x8e   :  { %2515 = vmatpush1.bf16.msra.mxu0 %v3343_v21 }
  0x8f   :  { %2541 = vmatprep.subr.bf16.mxu0 %v3263_v12 }
  0x90   :  { %2533 = vmatpush3.bf16.msra.mxu1 %v3350_v26 }
  0x91   :  { %2534 = vmatprep.subr.bf16.mxu1 %v3151_v48 }
  0x94   :  { %2536 = vmatpush3.bf16.msra.mxu1 %v3360_v29 }
  0x95   :  { %2537 = vmatprep.subr.bf16.mxu1 %v3151_v48 }
  0x98   :  { %2539 = vmatpush3.bf16.msra.mxu1 %v3369_v34 }
  0x99   :  { %2572 = vmatprep.subr.bf16.mxu1 %v3151_v48 }
 0x12e   :  { %v2095_v41 = vpop.f32.mrb[0].mxu1 }
 0x12f   :  { %v3410_v43 = vadd.f32 %v2095_v41, %v114_v39  ;;  %v322_v44 = vpop.f32.mrb[1].mxu1 }
 0x130   :  { %v323_v36 = vadd.f32 %v322_v44, %v114_v39 }
 0x132   :  { %v2098_v46 = vpop.f32.mrb[2].mxu1 }
 0x133   :  { %v3412_v47 = vadd.f32 %v2098_v46, %v114_v39  ;;  %v332_v49 = vpop.f32.mrb[3].mxu1 }
 0x134   :  { %v3414_v50 = vadd.f32 %v332_v49, %v114_v39 }
 0x136   :  { %v2101_v54 = vpop.f32.mrb[4].mxu1 }
 0x137   :  { %v3416_v57 = vadd.f32 %v2101_v54, %v114_v39  ;;  %v342_v58 = vpop.f32.mrb[5].mxu1 }
 0x138   :  { %v3420_v60 = vadd.f32 %v342_v58, %v114_v39 }
 0x13a   :  { %v2104_v62 = vpop.f32.mrb[6].mxu1 }
 0x13b   :  { %v3424_v4 = vadd.f32 %v2104_v62, %v114_v39  ;;  %v352_v5 = vpop.f32.mrb[7].mxu1 }
 0x13c   :  { %v3427_v9 = vadd.f32 %v352_v5, %v114_v39 }
 0x144   :  { %v510_v1 = vpop.f32.mrb[0].mxu0 }
 0x145   :  { %v2900_v6 = vadd.f32 %v510_v1, %v3418_v59  ;;  %v512_v7 = vpop.f32.mrb[1].mxu0 }
 0x146   :  { %v2901_v13 = vadd.f32 %v512_v7, %v3422_v2 }
 0x147   :  { %v1909_v11 = vmul.f32 -1.442695, %v2900_v6 }
 0x148   :  { %v1910_v17 = vmul.f32 -1.442695, %v2901_v13 }
 0x149   :  { %2944 = vpow2.f32 %v1909_v11 }
 0x14a   :  { %2946 = vpow2.f32 %v1910_v17 }
 0x14e   :  { %v581_v18 = vpop.f32.mrb[8].mxu1 }
 0x14f   :  { %v2139_v20 = vpop.f32.mrb[9].mxu1  ;;  %v599_v32 = vadd.f32 %v3433_v28, %v581_v18 }
 0x153   :  { %v2945_v24 = vpop.eup %2944 }
 0x154   :  { %v589_v25 = vadd.f32 1.0, %v2945_v24  ;;  %v2947_v27 = vpop.eup %2946 }
 0x155   :  { %v596_v30 = vadd.f32 1.0, %v2947_v27 }
 0x156   :  { %2948 = vrcp.f32 %v589_v25 }
 0x157   :  { %2950 = vrcp.f32 %v596_v30 }
 0x160   :  { %v2949_v35 = vpop.eup %2948 }
 0x161   :  { %v600_v37 = vmul.f32 %v2949_v35, %v599_v32  ;;  %v2951_v41 = vpop.eup %2950 }
 0x162   :  { %v603_v46 = vsub.f32 1.0, %v2951_v41  ;;  %v605_v54 = vmul.f32 0.0, %v2951_v41 }
 0x163   :  { %v601_v38 = vadd.f32 %v600_v37, %v323_v36 }
 0x165   :  { %2952 = vtanh.f32 %v601_v38 }
 0x16f   :  { %v2953_v49 = vpop.eup %2952 }
 0x170   :  { %v604_v52 = vmul.f32 %v2953_v49, %v603_v46 }
 0x172   :  { %v606_v55 = vadd.f32 %v605_v54, %v604_v52 }
 0x174   :  { %676 = vmatmul.mubr.f32.vlgmr.msra.gmra.mrb[2].mxu0 %v606_v55  ;;  %2173 = vmatmul.mubr.f32.vlgmr.msra.gmra.mrb[10].mxu1 %v606_v55 }
 0x175   :  { %2543 = vmatpush1.bf16.msra.mxu0 %v3265_v15  ;;  %2574 = vmatpush3.bf16.msra.mxu1 %v3287_v40 }
 0x176   :  { %2545 = vmatprep.subr.bf16.mxu0 %v3268_v16  ;;  %2575 = vmatprep.subr.bf16.mxu1 %v3151_v48 }
 0x177   :  { %842 = vmatprep.mubr.f32.mxu0 %v3150_v0  ;;  %2207 = vmatprep.mubr.msk.f32.mxu1 %vm3152_vm1, %v3150_v0 }
 0x179   :  { %2547 = vmatpush1.bf16.msra.mxu0 %v3273_v22  ;;  %2577 = vmatpush3.bf16.msra.mxu1 %v3300_v51 }
 0x17a   :  { %2549 = vmatprep.subr.bf16.mxu0 %v3276_v23  ;;  %2578 = vmatprep.subr.bf16.mxu1 %v3151_v48 }
 0x17d   :  { %2551 = vmatpush1.bf16.msra.mxu0 %v3281_v31  ;;  %2580 = vmatpush3.bf16.msra.mxu1 %v3313_v61 }
 0x17e   :  { %2553 = vmatprep.subr.bf16.mxu0 %v3284_v33  ;;  %2581 = vmatprep.subr.bf16.mxu1 %v3151_v48 }
 0x181   :  { %2555 = vmatpush1.bf16.msra.mxu0 %v3291_v42  ;;  %2583 = vmatpush3.bf16.msra.mxu1 %v3326_v8 }
 0x182   :  { %2557 = vmatprep.subr.bf16.mxu0 %v3294_v45  ;;  %2584 = vmatprep.subr.bf16.mxu1 %v3151_v48 }
 0x185   :  { %2559 = vmatpush1.bf16.msra.mxu0 %v3304_v53  ;;  %2586 = vmatpush3.bf16.msra.mxu1 %v3339_v19 }
 0x186   :  { %2561 = vmatprep.subr.bf16.mxu0 %v3307_v56  ;;  %2587 = vmatprep.subr.bf16.mxu1 %v3151_v48 }
 0x189   :  { %2563 = vmatpush1.bf16.msra.mxu0 %v3317_v63  ;;  %2589 = vmatpush3.bf16.msra.mxu1 %v3350_v26 }
 0x18a   :  { %2565 = vmatprep.subr.bf16.mxu0 %v3320_v3  ;;  %2590 = vmatprep.subr.bf16.mxu1 %v3151_v48 }
 0x18d   :  { %2567 = vmatpush1.bf16.msra.mxu0 %v3330_v10  ;;  %2592 = vmatpush3.bf16.msra.mxu1 %v3360_v29 }
 0x18e   :  { %2569 = vmatprep.subr.bf16.mxu0 %v3333_v14  ;;  %2593 = vmatprep.subr.bf16.mxu1 %v3151_v48 }
 0x191   :  { %2571 = vmatpush1.bf16.msra.mxu0 %v3343_v21  ;;  %2595 = vmatpush3.bf16.msra.mxu1 %v3369_v34 }
 0x192   :  { %2597 = vmatprep.subr.bf16.mxu0 %v3263_v12  ;;  %2628 = vmatprep.subr.bf16.mxu1 %v3151_v48 }
 0x247   :  { %v677_v39 = vpop.f32.mrb[2].mxu0  ;;  %v748_v44 = vpop.f32.mrb[10].mxu1 }
 0x248   :  { %v2902_v58 = vadd.f32 %v677_v39, %v3418_v59  ;;  %v679_v62 = vpop.f32.mrb[3].mxu0  ;;  %v2174_v1 = vpop.f32.mrb[11].mxu1  ;;  %v766_v20 = vadd.f32 %v3433_v28, %v748_v44 }
 0x249   :  { %v2903_v6 = vadd.f32 %v679_v62, %v3422_v2 }
 0x24a   :  { %v1911_v5 = vmul.f32 -1.442695, %v2902_v58 }
 0x24b   :  { %v1912_v7 = vmul.f32 -1.442695, %v2903_v6 }
 0x24c   :  { %2954 = vpow2.f32 %v1911_v5 }
 0x24d   :  { %2956 = vpow2.f32 %v1912_v7 }
 0x256   :  { %v2955_v11 = vpop.eup %2954 }
 0x257   :  { %v756_v13 = vadd.f32 1.0, %v2955_v11  ;;  %v2957_v17 = vpop.eup %2956 }
 0x258   :  { %v763_v18 = vadd.f32 1.0, %v2957_v17 }
 0x259   :  { %2958 = vrcp.f32 %v756_v13 }
 0x25a   :  { %2960 = vrcp.f32 %v763_v18 }
 0x263   :  { %v2959_v24 = vpop.eup %2958 }
 0x264   :  { %v767_v25 = vmul.f32 %v2959_v24, %v766_v20  ;;  %v2961_v30 = vpop.eup %2960 }
 0x265   :  { %v770_v32 = vsub.f32 1.0, %v2961_v30  ;;  %v772_v37 = vmul.f32 %v2961_v30, %v606_v55 }
 0x266   :  { %v768_v27 = vadd.f32 %v767_v25, %v3410_v43 }
 0x268   :  { %2962 = vtanh.f32 %v768_v27 }
 0x272   :  { %v2963_v35 = vpop.eup %2962 }
 0x273   :  { %v771_v36 = vmul.f32 %v2963_v35, %v770_v32 }
 0x275   :  { %v773_v38 = vadd.f32 %v772_v37, %v771_v36 }
 0x277   :  { %843 = vmatmul.mubr.f32.vlgmr.msra.gmra.mrb[4].mxu0 %v773_v38  ;;  %2208 = vmatmul.mubr.f32.vlgmr.msra.gmra.mrb[12].mxu1 %v773_v38 }
 0x278   :  { %2599 = vmatpush1.bf16.msra.mxu0 %v3265_v15  ;;  %2630 = vmatpush3.bf16.msra.mxu1 %v3287_v40 }
 0x279   :  { %2601 = vmatprep.subr.bf16.mxu0 %v3268_v16  ;;  %2631 = vmatprep.subr.bf16.mxu1 %v3151_v48 }
 0x27a   :  { %1009 = vmatprep.mubr.f32.mxu0 %v3150_v0  ;;  %2242 = vmatprep.mubr.msk.f32.mxu1 %vm3152_vm1, %v3150_v0 }
 0x27c   :  { %2603 = vmatpush1.bf16.msra.mxu0 %v3273_v22  ;;  %2633 = vmatpush3.bf16.msra.mxu1 %v3300_v51 }
 0x27d   :  { %2605 = vmatprep.subr.bf16.mxu0 %v3276_v23  ;;  %2634 = vmatprep.subr.bf16.mxu1 %v3151_v48 }
 0x280   :  { %2607 = vmatpush1.bf16.msra.mxu0 %v3281_v31  ;;  %2636 = vmatpush3.bf16.msra.mxu1 %v3313_v61 }
 0x281   :  { %2609 = vmatprep.subr.bf16.mxu0 %v3284_v33  ;;  %2637 = vmatprep.subr.bf16.mxu1 %v3151_v48 }
 0x284   :  { %2611 = vmatpush1.bf16.msra.mxu0 %v3291_v42  ;;  %2639 = vmatpush3.bf16.msra.mxu1 %v3326_v8 }
 0x285   :  { %2613 = vmatprep.subr.bf16.mxu0 %v3294_v45  ;;  %2640 = vmatprep.subr.bf16.mxu1 %v3151_v48 }
 0x288   :  { %2615 = vmatpush1.bf16.msra.mxu0 %v3304_v53  ;;  %2642 = vmatpush3.bf16.msra.mxu1 %v3339_v19 }
 0x289   :  { %2617 = vmatprep.subr.bf16.mxu0 %v3307_v56  ;;  %2643 = vmatprep.subr.bf16.mxu1 %v3151_v48 }
 0x28c   :  { %2619 = vmatpush1.bf16.msra.mxu0 %v3317_v63  ;;  %2645 = vmatpush3.bf16.msra.mxu1 %v3350_v26 }
 0x28d   :  { %2621 = vmatprep.subr.bf16.mxu0 %v3320_v3  ;;  %2646 = vmatprep.subr.bf16.mxu1 %v3151_v48 }
 0x290   :  { %2623 = vmatpush1.bf16.msra.mxu0 %v3330_v10  ;;  %2648 = vmatpush3.bf16.msra.mxu1 %v3360_v29 }
 0x291   :  { %2625 = vmatprep.subr.bf16.mxu0 %v3333_v14  ;;  %2649 = vmatprep.subr.bf16.mxu1 %v3151_v48 }
 0x294   :  { %2627 = vmatpush1.bf16.msra.mxu0 %v3343_v21  ;;  %2651 = vmatpush3.bf16.msra.mxu1 %v3369_v34 }
 0x295   :  { %2653 = vmatprep.subr.bf16.mxu0 %v3263_v12  ;;  %2684 = vmatprep.subr.bf16.mxu1 %v3151_v48 }
 0x34a   :  { %v844_v43 = vpop.f32.mrb[4].mxu0  ;;  %v915_v41 = vpop.f32.mrb[12].mxu1 }
 0x34b   :  { %v2904_v46 = vadd.f32 %v844_v43, %v3418_v59  ;;  %v846_v49 = vpop.f32.mrb[5].mxu0  ;;  %v2209_v52 = vpop.f32.mrb[13].mxu1  ;;  %v933_v5 = vadd.f32 %v3433_v28, %v915_v41 }
 0x34c   :  { %v2905_v55 = vadd.f32 %v846_v49, %v3422_v2 }
 0x34d   :  { %v1913_v54 = vmul.f32 -1.442695, %v2904_v46 }
 0x34e   :  { %v1914_v39 = vmul.f32 -1.442695, %v2905_v55 }
 0x34f   :  { %2964 = vpow2.f32 %v1913_v54 }
 0x350   :  { %2966 = vpow2.f32 %v1914_v39 }
 0x359   :  { %v2965_v44 = vpop.eup %2964 }
 0x35a   :  { %v923_v58 = vadd.f32 1.0, %v2965_v44  ;;  %v2967_v62 = vpop.eup %2966 }
 0x35b   :  { %v930_v1 = vadd.f32 1.0, %v2967_v62 }
 0x35c   :  { %2968 = vrcp.f32 %v923_v58 }
 0x35d   :  { %2970 = vrcp.f32 %v930_v1 }
 0x366   :  { %v2969_v6 = vpop.eup %2968 }
 0x367   :  { %v934_v7 = vmul.f32 %v2969_v6, %v933_v5  ;;  %v2971_v13 = vpop.eup %2970 }
 0x368   :  { %v937_v17 = vsub.f32 1.0, %v2971_v13  ;;  %v939_v24 = vmul.f32 %v2971_v13, %v773_v38 }
 0x369   :  { %v935_v11 = vadd.f32 %v934_v7, %v3414_v50 }
 0x36b   :  { %2972 = vtanh.f32 %v935_v11 }
 0x375   :  { %v2973_v18 = vpop.eup %2972 }
 0x376   :  { %v938_v20 = vmul.f32 %v2973_v18, %v937_v17 }
 0x378   :  { %v940_v25 = vadd.f32 %v939_v24, %v938_v20 }
 0x37a   :  { %1010 = vmatmul.mubr.f32.vlgmr.msra.gmra.mrb[6].mxu0 %v940_v25  ;;  %2243 = vmatmul.mubr.f32.vlgmr.msra.gmra.mrb[14].mxu1 %v940_v25 }
 0x37b   :  { %2655 = vmatpush1.bf16.msra.mxu0 %v3265_v15  ;;  %2686 = vmatpush3.bf16.msra.mxu1 %v3287_v40 }
 0x37c   :  { %2657 = vmatprep.subr.bf16.mxu0 %v3268_v16  ;;  %2687 = vmatprep.subr.bf16.mxu1 %v3151_v48 }
 0x37d   :  { %1176 = vmatprep.mubr.f32.mxu0 %v3150_v0  ;;  %2277 = vmatprep.mubr.msk.f32.mxu1 %vm3152_vm1, %v3150_v0 }
 0x37f   :  { %2659 = vmatpush1.bf16.msra.mxu0 %v3273_v22  ;;  %2689 = vmatpush3.bf16.msra.mxu1 %v3300_v51 }
 0x380   :  { %2661 = vmatprep.subr.bf16.mxu0 %v3276_v23  ;;  %2690 = vmatprep.subr.bf16.mxu1 %v3151_v48 }
 0x383   :  { %2663 = vmatpush1.bf16.msra.mxu0 %v3281_v31  ;;  %2692 = vmatpush3.bf16.msra.mxu1 %v3313_v61 }
 0x384   :  { %2665 = vmatprep.subr.bf16.mxu0 %v3284_v33  ;;  %2693 = vmatprep.subr.bf16.mxu1 %v3151_v48 }
 0x387   :  { %2667 = vmatpush1.bf16.msra.mxu0 %v3291_v42  ;;  %2695 = vmatpush3.bf16.msra.mxu1 %v3326_v8 }
 0x388   :  { %2669 = vmatprep.subr.bf16.mxu0 %v3294_v45  ;;  %2696 = vmatprep.subr.bf16.mxu1 %v3151_v48 }
 0x38b   :  { %2671 = vmatpush1.bf16.msra.mxu0 %v3304_v53  ;;  %2698 = vmatpush3.bf16.msra.mxu1 %v3339_v19 }
 0x38c   :  { %2673 = vmatprep.subr.bf16.mxu0 %v3307_v56  ;;  %2699 = vmatprep.subr.bf16.mxu1 %v3151_v48 }
 0x38f   :  { %2675 = vmatpush1.bf16.msra.mxu0 %v3317_v63  ;;  %2701 = vmatpush3.bf16.msra.mxu1 %v3350_v26 }
 0x390   :  { %2677 = vmatprep.subr.bf16.mxu0 %v3320_v3  ;;  %2702 = vmatprep.subr.bf16.mxu1 %v3151_v48 }
 0x393   :  { %2679 = vmatpush1.bf16.msra.mxu0 %v3330_v10  ;;  %2704 = vmatpush3.bf16.msra.mxu1 %v3360_v29 }
 0x394   :  { %2681 = vmatprep.subr.bf16.mxu0 %v3333_v14  ;;  %2705 = vmatprep.subr.bf16.mxu1 %v3151_v48 }
 0x397   :  { %2683 = vmatpush1.bf16.msra.mxu0 %v3343_v21  ;;  %2707 = vmatpush3.bf16.msra.mxu1 %v3369_v34 }
 0x398   :  { %2709 = vmatprep.subr.bf16.mxu0 %v3263_v12  ;;  %2740 = vmatprep.subr.bf16.mxu1 %v3151_v48 }
 0x44d   :  { %v1011_v50 = vpop.f32.mrb[6].mxu0  ;;  %v1082_v27 = vpop.f32.mrb[14].mxu1 }
 0x44e   :  { %v2906_v30 = vadd.f32 %v1011_v50, %v3418_v59  ;;  %v1013_v32 = vpop.f32.mrb[7].mxu0  ;;  %v2244_v35 = vpop.f32.mrb[15].mxu1  ;;  %v1100_v52 = vadd.f32 %v3433_v28, %v1082_v27 }
 0x44f   :  { %v2907_v37 = vadd.f32 %v1013_v32, %v3422_v2 }
 0x450   :  { %v1915_v36 = vmul.f32 -1.442695, %v2906_v30 }
 0x451   :  { %v1916_v38 = vmul.f32 -1.442695, %v2907_v37 }
 0x452   :  { %2974 = vpow2.f32 %v1915_v36 }
 0x453   :  { %2976 = vpow2.f32 %v1916_v38 }
 0x45c   :  { %v2975_v43 = vpop.eup %2974 }
 0x45d   :  { %v1090_v41 = vadd.f32 1.0, %v2975_v43  ;;  %v2977_v46 = vpop.eup %2976 }
 0x45e   :  { %v1097_v49 = vadd.f32 1.0, %v2977_v46 }
 0x45f   :  { %2978 = vrcp.f32 %v1090_v41 }
 0x460   :  { %2980 = vrcp.f32 %v1097_v49 }
 0x469   :  { %v2979_v54 = vpop.eup %2978 }
 0x46a   :  { %v1101_v55 = vmul.f32 %v2979_v54, %v1100_v52  ;;  %v2981_v44 = vpop.eup %2980 }
 0x46b   :  { %v1104_v58 = vsub.f32 1.0, %v2981_v44  ;;  %v1106_v5 = vmul.f32 %v2981_v44, %v940_v25 }
 0x46c   :  { %v1102_v39 = vadd.f32 %v1101_v55, %v3412_v47 }
 0x46e   :  { %2982 = vtanh.f32 %v1102_v39 }
 0x478   :  { %v2983_v62 = vpop.eup %2982 }
 0x479   :  { %v1105_v1 = vmul.f32 %v2983_v62, %v1104_v58 }
 0x47b   :  { %v1107_v6 = vadd.f32 %v1106_v5, %v1105_v1 }
 0x47d   :  { %1177 = vmatmul.mubr.f32.vlgmr.msra.gmra.mrb[8].mxu0 %v1107_v6  ;;  %2278 = vmatmul.mubr.f32.vlgmr.msra.gmra.mrb[16].mxu1 %v1107_v6 }
 0x47e   :  { %2711 = vmatpush1.bf16.msra.mxu0 %v3265_v15  ;;  %2742 = vmatpush3.bf16.msra.mxu1 %v3287_v40 }
 0x47f   :  { %2713 = vmatprep.subr.bf16.mxu0 %v3268_v16  ;;  %2743 = vmatprep.subr.bf16.mxu1 %v3151_v48 }
 0x480   :  { %1343 = vmatprep.mubr.f32.mxu0 %v3150_v0  ;;  %2312 = vmatprep.mubr.msk.f32.mxu1 %vm3152_vm1, %v3150_v0 }
 0x482   :  { %2715 = vmatpush1.bf16.msra.mxu0 %v3273_v22  ;;  %2745 = vmatpush3.bf16.msra.mxu1 %v3300_v51 }
 0x483   :  { %2717 = vmatprep.subr.bf16.mxu0 %v3276_v23  ;;  %2746 = vmatprep.subr.bf16.mxu1 %v3151_v48 }
 0x486   :  { %2719 = vmatpush1.bf16.msra.mxu0 %v3281_v31  ;;  %2748 = vmatpush3.bf16.msra.mxu1 %v3313_v61 }
 0x487   :  { %2721 = vmatprep.subr.bf16.mxu0 %v3284_v33  ;;  %2749 = vmatprep.subr.bf16.mxu1 %v3151_v48 }
 0x48a   :  { %2723 = vmatpush1.bf16.msra.mxu0 %v3291_v42  ;;  %2751 = vmatpush3.bf16.msra.mxu1 %v3326_v8 }
 0x48b   :  { %2725 = vmatprep.subr.bf16.mxu0 %v3294_v45  ;;  %2752 = vmatprep.subr.bf16.mxu1 %v3151_v48 }
 0x48e   :  { %2727 = vmatpush1.bf16.msra.mxu0 %v3304_v53  ;;  %2754 = vmatpush3.bf16.msra.mxu1 %v3339_v19 }
 0x48f   :  { %2729 = vmatprep.subr.bf16.mxu0 %v3307_v56  ;;  %2755 = vmatprep.subr.bf16.mxu1 %v3151_v48 }
 0x492   :  { %2731 = vmatpush1.bf16.msra.mxu0 %v3317_v63  ;;  %2757 = vmatpush3.bf16.msra.mxu1 %v3350_v26 }
 0x493   :  { %2733 = vmatprep.subr.bf16.mxu0 %v3320_v3  ;;  %2758 = vmatprep.subr.bf16.mxu1 %v3151_v48 }
 0x496   :  { %2735 = vmatpush1.bf16.msra.mxu0 %v3330_v10  ;;  %2760 = vmatpush3.bf16.msra.mxu1 %v3360_v29 }
 0x497   :  { %2737 = vmatprep.subr.bf16.mxu0 %v3333_v14  ;;  %2761 = vmatprep.subr.bf16.mxu1 %v3151_v48 }
 0x49a   :  { %2739 = vmatpush1.bf16.msra.mxu0 %v3343_v21  ;;  %2763 = vmatpush3.bf16.msra.mxu1 %v3369_v34 }
 0x49b   :  { %2765 = vmatprep.subr.bf16.mxu0 %v3263_v12  ;;  %2796 = vmatprep.subr.bf16.mxu1 %v3151_v48 }
 0x550   :  { %v1178_v47 = vpop.f32.mrb[8].mxu0  ;;  %v1249_v7 = vpop.f32.mrb[16].mxu1 }
 0x551   :  { %v2908_v11 = vadd.f32 %v1178_v47, %v3418_v59  ;;  %v1180_v13 = vpop.f32.mrb[9].mxu0  ;;  %v2279_v17 = vpop.f32.mrb[17].mxu1  ;;  %v1267_v32 = vadd.f32 %v3433_v28, %v1249_v7 }
 0x552   :  { %v2909_v20 = vadd.f32 %v1180_v13, %v3422_v2 }
 0x553   :  { %v1917_v18 = vmul.f32 -1.442695, %v2908_v11 }
 0x554   :  { %v1918_v24 = vmul.f32 -1.442695, %v2909_v20 }
 0x555   :  { %2984 = vpow2.f32 %v1917_v18 }
 0x556   :  { %2986 = vpow2.f32 %v1918_v24 }
 0x55f   :  { %v2985_v25 = vpop.eup %2984 }
 0x560   :  { %v1257_v50 = vadd.f32 1.0, %v2985_v25  ;;  %v2987_v27 = vpop.eup %2986 }
 0x561   :  { %v1264_v30 = vadd.f32 1.0, %v2987_v27 }
 0x562   :  { %2988 = vrcp.f32 %v1257_v50 }
 0x563   :  { %2990 = vrcp.f32 %v1264_v30 }
 0x56c   :  { %v2989_v35 = vpop.eup %2988 }
 0x56d   :  { %v1268_v36 = vmul.f32 %v2989_v35, %v1267_v32  ;;  %v2991_v38 = vpop.eup %2990  ;;  %v1784_v32 = vld [vmem:[#allocation10 + $0x18] sm:$0xff] }
 0x56e   :  { %v1271_v43 = vsub.f32 1.0, %v2991_v38  ;;  %v1273_v49 = vmul.f32 %v2991_v38, %v1107_v6 }
 0x56f   :  { %v1269_v37 = vadd.f32 %v1268_v36, %v3420_v60  ;;  %v1785_v36 = vld [vmem:[#allocation10 + $0x20] sm:$0xff] }
 0x571   :  { %2992 = vtanh.f32 %v1269_v37  ;;  %v1786_v37 = vld [vmem:[#allocation10 + $0x28] sm:$0xff] }
 0x572   :  { %v2883_v38 = vpack.c.bf16 %v1786_v37, %v1785_v36 }
 0x57b   :  { %v2993_v41 = vpop.eup %2992 }
 0x57c   :  { %v1272_v46 = vmul.f32 %v2993_v41, %v1271_v43  ;;  %v1787_v43 = vld [vmem:[#allocation10 + $0x30] sm:$0xff] }
 0x57e   :  { %v1274_v52 = vadd.f32 %v1273_v49, %v1272_v46  ;;  %v1789_v46 = vld [vmem:[#allocation10 + $0x40] sm:$0xff]  ;;  %v1790_v49 = vld [vmem:[#allocation10 + $0x48] sm:$0xff] }
 0x580   :  { %1344 = vmatmul.mubr.f32.vlgmr.msra.gmra.mrb[10].mxu0 %v1274_v52  ;;  %2313 = vmatmul.mubr.f32.vlgmr.msra.gmra.mrb[18].mxu1 %v1274_v52 }
 0x581   :  { %2767 = vmatpush1.bf16.msra.mxu0 %v3265_v15  ;;  %2798 = vmatpush3.bf16.msra.mxu1 %v3287_v40 }
 0x582   :  { %2769 = vmatprep.subr.bf16.mxu0 %v3268_v16  ;;  %2799 = vmatprep.subr.bf16.mxu1 %v3151_v48 }
 0x583   :  { %1510 = vmatprep.mubr.f32.mxu0 %v3150_v0  ;;  %2347 = vmatprep.mubr.msk.f32.mxu1 %vm3152_vm1, %v3150_v0 }
 0x585   :  { %2771 = vmatpush1.bf16.msra.mxu0 %v3273_v22  ;;  %2801 = vmatpush3.bf16.msra.mxu1 %v3300_v51 }
 0x586   :  { %2773 = vmatprep.subr.bf16.mxu0 %v3276_v23  ;;  %2802 = vmatprep.subr.bf16.mxu1 %v3151_v48 }
 0x589   :  { %2775 = vmatpush1.bf16.msra.mxu0 %v3281_v31  ;;  %2804 = vmatpush3.bf16.msra.mxu1 %v3313_v61 }
 0x58a   :  { %2777 = vmatprep.subr.bf16.mxu0 %v3284_v33  ;;  %2805 = vmatprep.subr.bf16.mxu1 %v3151_v48 }
 0x58d   :  { %2779 = vmatpush1.bf16.msra.mxu0 %v3291_v42  ;;  %2807 = vmatpush3.bf16.msra.mxu1 %v3326_v8 }
 0x58e   :  { %2781 = vmatprep.subr.bf16.mxu0 %v3294_v45  ;;  %2808 = vmatprep.subr.bf16.mxu1 %v3151_v48 }
 0x591   :  { %2783 = vmatpush1.bf16.msra.mxu0 %v3304_v53  ;;  %2810 = vmatpush3.bf16.msra.mxu1 %v3339_v19 }
 0x592   :  { %2785 = vmatprep.subr.bf16.mxu0 %v3307_v56  ;;  %2811 = vmatprep.subr.bf16.mxu1 %v3151_v48 }
 0x595   :  { %2787 = vmatpush1.bf16.msra.mxu0 %v3317_v63  ;;  %2813 = vmatpush3.bf16.msra.mxu1 %v3350_v26 }
 0x596   :  { %2789 = vmatprep.subr.bf16.mxu0 %v3320_v3  ;;  %2814 = vmatprep.subr.bf16.mxu1 %v3151_v48 }
 0x599   :  { %2791 = vmatpush1.bf16.msra.mxu0 %v3330_v10  ;;  %2816 = vmatpush3.bf16.msra.mxu1 %v3360_v29 }
 0x59a   :  { %2793 = vmatprep.subr.bf16.mxu0 %v3333_v14  ;;  %2817 = vmatprep.subr.bf16.mxu1 %v3151_v48 }
 0x59d   :  { %2795 = vmatpush1.bf16.msra.mxu0 %v3343_v21  ;;  %2819 = vmatpush3.bf16.msra.mxu1 %v3369_v34 }
 0x59e   :  { %2821 = vmatprep.subr.bf16.mxu0 %v3263_v12  ;;  %2852 = vmatprep.subr.bf16.mxu1 %v3151_v48 }
 0x653   :  { %v1345_v60 = vpop.f32.mrb[10].mxu0  ;;  %v1416_v54 = vpop.f32.mrb[18].mxu1 }
 0x654   :  { %v2910_v55 = vadd.f32 %v1345_v60, %v3418_v59  ;;  %v1347_v39 = vpop.f32.mrb[11].mxu0  ;;  %v2314_v44 = vpop.f32.mrb[19].mxu1  ;;  %v1434_v12 = vadd.f32 %v3433_v28, %v1416_v54  ;;  %v1791_v60 = vld [vmem:[#allocation10 + $0x50] sm:$0xff]  ;;  %v1792_v54 = vld [vmem:[#allocation10 + $0x58] sm:$0xff] }
 0x655   :  { %v2911_v62 = vadd.f32 %v1347_v39, %v3422_v2  ;;  %v1793_v39 = vld [vmem:[#allocation10 + $0x60] sm:$0xff]  ;;  %v1794_v44 = vld [vmem:[#allocation10 + $0x68] sm:$0xff] }
 0x656   :  { %v1919_v58 = vmul.f32 -1.442695, %v2910_v55  ;;  %v2892_v55 = vpack.c.bf16 %v1792_v54, %v1791_v60 }
 0x657   :  { %v1920_v1 = vmul.f32 -1.442695, %v2911_v62  ;;  %v1795_v62 = vld [vmem:[#allocation10 + $0x70] sm:$0xff] }
 0x658   :  { %2994 = vpow2.f32 %v1919_v58  ;;  %v2895_v58 = vpack.c.bf16 %v1794_v44, %v1793_v39 }
 0x659   :  { %2996 = vpow2.f32 %v1920_v1  ;;  %v1796_v1 = vld [vmem:[#allocation10 + $0x78] sm:$0xff] }
 0x662   :  { %v2995_v5 = vpop.eup %2994 }
 0x663   :  { %v1424_v6 = vadd.f32 1.0, %v2995_v5  ;;  %v2997_v47 = vpop.eup %2996  ;;  %v2898_v5 = vpack.c.bf16 %v1796_v1, %v1795_v62 }
 0x664   :  { %v1431_v7 = vadd.f32 1.0, %v2997_v47 }
 0x665   :  { %2998 = vrcp.f32 %v1424_v6 }
 0x666   :  { %3000 = vrcp.f32 %v1431_v7 }
 0x66f   :  { %v2999_v11 = vpop.eup %2998 }
 0x670   :  { %v1435_v13 = vmul.f32 %v2999_v11, %v1434_v12  ;;  %v3001_v18 = vpop.eup %3000 }
 0x671   :  { %v1438_v20 = vsub.f32 1.0, %v3001_v18  ;;  %v1440_v50 = vmul.f32 %v3001_v18, %v1274_v52  ;;  %v2889_v52 = vpack.c.bf16 %v1790_v49, %v1789_v46 }
 0x672   :  { %v1436_v17 = vadd.f32 %v1435_v13, %v3416_v57  ;;  %v1782_v57 = vld [vmem:[#allocation10 + $0x8] sm:$0xff] }
 0x674   :  { %3002 = vtanh.f32 %v1436_v17 }
 0x67e   :  { %v3003_v24 = vpop.eup %3002 }
 0x67f   :  { %v1439_v25 = vmul.f32 %v3003_v24, %v1438_v20 }
 0x681   :  { %v1441_v27 = vadd.f32 %v1440_v50, %v1439_v25 }
 0x683   :  { %1511 = vmatmul.mubr.f32.vlgmr.msra.gmra.mrb[12].mxu0 %v1441_v27  ;;  %2348 = vmatmul.mubr.f32.vlgmr.msra.gmra.mrb[20].mxu1 %v1441_v27 }
 0x684   :  { %2823 = vmatpush1.bf16.msra.mxu0 %v3265_v15  ;;  %2854 = vmatpush3.bf16.msra.mxu1 %v3287_v40 }
 0x685   :  { %2825 = vmatprep.subr.bf16.mxu0 %v3268_v16  ;;  %2855 = vmatprep.subr.bf16.mxu1 %v3151_v48 }
 0x686   :  { %1677 = vmatprep.mubr.f32.mxu0 %v3150_v0  ;;  %2382 = vmatprep.mubr.msk.f32.mxu1 %vm3152_vm1, %v3150_v0 }
 0x688   :  { %2827 = vmatpush1.bf16.msra.mxu0 %v3273_v22  ;;  %2857 = vmatpush3.bf16.msra.mxu1 %v3300_v51 }
 0x689   :  { %2829 = vmatprep.subr.bf16.mxu0 %v3276_v23  ;;  %2858 = vmatprep.subr.bf16.mxu1 %v3151_v48 }
 0x68c   :  { %2831 = vmatpush1.bf16.msra.mxu0 %v3281_v31  ;;  %2860 = vmatpush3.bf16.msra.mxu1 %v3313_v61 }
 0x68d   :  { %2833 = vmatprep.subr.bf16.mxu0 %v3284_v33  ;;  %2861 = vmatprep.subr.bf16.mxu1 %v3151_v48 }
 0x690   :  { %2835 = vmatpush1.bf16.msra.mxu0 %v3291_v42  ;;  %2863 = vmatpush3.bf16.msra.mxu1 %v3326_v8 }
 0x691   :  { %2837 = vmatprep.subr.bf16.mxu0 %v3294_v45  ;;  %2864 = vmatprep.subr.bf16.mxu1 %v3151_v48 }
 0x694   :  { %2839 = vmatpush1.bf16.msra.mxu0 %v3304_v53  ;;  %2866 = vmatpush3.bf16.msra.mxu1 %v3339_v19 }
 0x695   :  { %2841 = vmatprep.subr.bf16.mxu0 %v3307_v56  ;;  %2867 = vmatprep.subr.bf16.mxu1 %v3151_v48 }
 0x698   :  { %2843 = vmatpush1.bf16.msra.mxu0 %v3317_v63  ;;  %2869 = vmatpush3.bf16.msra.mxu1 %v3350_v26 }
 0x699   :  { %2845 = vmatprep.subr.bf16.mxu0 %v3320_v3  ;;  %2870 = vmatprep.subr.bf16.mxu1 %v3151_v48 }
 0x69c   :  { %2847 = vmatpush1.bf16.msra.mxu0 %v3330_v10  ;;  %2872 = vmatpush3.bf16.msra.mxu1 %v3360_v29 }
 0x69d   :  { %2849 = vmatprep.subr.bf16.mxu0 %v3333_v14  ;;  %2873 = vmatprep.subr.bf16.mxu1 %v3151_v48 }
 0x6a0   :  { %2851 = vmatpush1.bf16.msra.mxu0 %v3343_v21  ;;  %2875 = vmatpush3.bf16.msra.mxu1 %v3369_v34  ;;  %v1781_v34 = vld [vmem:[#allocation10] sm:$0xff] }
 0x6a1   :  { %2876 = vmatprep.subr.bf16.mxu0 %v3151_v48  ;;  %v2877_v30 = vpack.c.bf16 %v1782_v57, %v1781_v34 }
 0x756   :  { %v1512_v15 = vpop.f32.mrb[12].mxu0  ;;  %v1583_v16 = vpop.f32.mrb[20].mxu1 }
 0x757   :  { %v2912_v22 = vadd.f32 %v1512_v15, %v3418_v59  ;;  %v1514_v23 = vpop.f32.mrb[13].mxu0  ;;  %v2349_v31 = vpop.f32.mrb[21].mxu1  ;;  %v1601_v61 = vadd.f32 %v3433_v28, %v1583_v16 }
 0x758   :  { %v2913_v40 = vadd.f32 %v1514_v23, %v3422_v2 }
 0x759   :  { %v1921_v33 = vmul.f32 -1.442695, %v2912_v22 }
 0x75a   :  { %v1922_v42 = vmul.f32 -1.442695, %v2913_v40  ;;  %v1925_v40 = vld [vmem:[%s3708_s6] ss:$0 sm:$0xff] }
 0x75b   :  { %3004 = vpow2.f32 %v1921_v33 }
 0x75c   :  { %3006 = vpow2.f32 %v1922_v42 }
 0x765   :  { %v3005_v45 = vpop.eup %3004 }
 0x766   :  { %v1591_v51 = vadd.f32 1.0, %v3005_v45  ;;  %v3007_v53 = vpop.eup %3006 }
 0x767   :  { %v1598_v56 = vadd.f32 1.0, %v3007_v53 }
 0x768   :  { %3008 = vrcp.f32 %v1591_v51 }
 0x769   :  { %3010 = vrcp.f32 %v1598_v56 }
 0x772   :  { %v3009_v63 = vpop.eup %3008 }
 0x773   :  { %v1602_v3 = vmul.f32 %v3009_v63, %v1601_v61  ;;  %v3011_v10 = vpop.eup %3010 }
 0x774   :  { %v1605_v14 = vsub.f32 1.0, %v3011_v10  ;;  %v1607_v26 = vmul.f32 %v3011_v10, %v1441_v27 }
 0x775   :  { %v1603_v8 = vadd.f32 %v1602_v3, %v3427_v9  ;;  %v1783_v9 = vld [vmem:[#allocation10 + $0x10] sm:$0xff] }
 0x776   :  { %v2880_v35 = vpack.c.bf16 %v1784_v32, %v1783_v9 }
 0x777   :  { %3012 = vtanh.f32 %v1603_v8 }
 0x781   :  { %v3013_v19 = vpop.eup %3012 }
 0x782   :  { %v1606_v21 = vmul.f32 %v3013_v19, %v1605_v14 }
 0x784   :  { %v3669_v29 = vadd.f32 %v1607_v26, %v1606_v21 }
 0x786   :  { %1678 = vmatmul.mubr.f32.vlgmr.msra.gmra.mrb[14].mxu0 %v3669_v29  ;;  %2383 = vmatmul.mubr.f32.vlgmr.msra.gmra.mrb[22].mxu1 %v3669_v29 }
 0x787   :  { %2417 = vmatprep.mubr.msk.f32.mxu0 %vm3152_vm1, %v3150_v0  ;;  %2878 = vmatpush3.bf16.msra.mxu0 %v2877_v30  ;;  %v1788_v0 = vld [vmem:[#allocation10 + $0x38] sm:$0xff] }
 0x788   :  { %2879 = vmatprep.subr.bf16.mxu0 %v3151_v48  ;;  %v2886_v41 = vpack.c.bf16 %v1788_v0, %v1787_v43 }
 0x78b   :  { %2881 = vmatpush3.bf16.msra.mxu0 %v2880_v35 }
 0x78c   :  { %2882 = vmatprep.subr.bf16.mxu0 %v3151_v48 }
 0x78f   :  { %2884 = vmatpush3.bf16.msra.mxu0 %v2883_v38 }
 0x790   :  { %2885 = vmatprep.subr.bf16.mxu0 %v3151_v48 }
 0x793   :  { %2887 = vmatpush3.bf16.msra.mxu0 %v2886_v41 }
 0x794   :  { %2888 = vmatprep.subr.bf16.mxu0 %v3151_v48 }
 0x797   :  { %2890 = vmatpush3.bf16.msra.mxu0 %v2889_v52 }
 0x798   :  { %2891 = vmatprep.subr.bf16.mxu0 %v3151_v48 }
 0x79b   :  { %2893 = vmatpush3.bf16.msra.mxu0 %v2892_v55 }
 0x79c   :  { %2894 = vmatprep.subr.bf16.mxu0 %v3151_v48 }
 0x79f   :  { %2896 = vmatpush3.bf16.msra.mxu0 %v2895_v58 }
 0x7a0   :  { %2897 = vmatprep.subr.bf16.mxu0 %v3151_v48 }
 0x7a3   :  { %2899 = vmatpush3.bf16.msra.mxu0 %v2898_v5 }
 0x859   :  { %v1679_v6 = vpop.f32.mrb[14].mxu0  ;;  %v1750_v47 = vpop.f32.mrb[22].mxu1 }
 0x85a   :  { %v2914_v7 = vadd.f32 %v1679_v6, %v3418_v59  ;;  %v1681_v12 = vpop.f32.mrb[15].mxu0  ;;  %v2384_v11 = vpop.f32.mrb[23].mxu1  ;;  %v1768_v48 = vadd.f32 %v3433_v28, %v1750_v47 }
 0x85b   :  { %v2915_v17 = vadd.f32 %v1681_v12, %v3422_v2 }
 0x85c   :  { %v1923_v13 = vmul.f32 -1.442695, %v2914_v7 }
 0x85d   :  { %v1924_v18 = vmul.f32 -1.442695, %v2915_v17 }
 0x85e   :  { %3014 = vpow2.f32 %v1923_v13 }
 0x85f   :  { %3016 = vpow2.f32 %v1924_v18 }
 0x868   :  { %v3015_v20 = vpop.eup %3014 }
 0x869   :  { %v1758_v24 = vadd.f32 1.0, %v3015_v20  ;;  %v3017_v25 = vpop.eup %3016 }
 0x86a   :  { %v1765_v50 = vadd.f32 1.0, %v3017_v25 }
 0x86b   :  { %3018 = vrcp.f32 %v1758_v24 }
 0x86c   :  { %3020 = vrcp.f32 %v1765_v50 }
 0x875   :  { %v3019_v27 = vpop.eup %3018 }
 0x876   :  { %v1769_v15 = vmul.f32 %v3019_v27, %v1768_v48  ;;  %v3021_v16 = vpop.eup %3020 }
 0x877   :  { %v1772_v22 = vsub.f32 1.0, %v3021_v16  ;;  %v1774_v31 = vmul.f32 %v3021_v16, %v3669_v29 }
 0x878   :  { %v1770_v59 = vadd.f32 %v1769_v15, %v3424_v4 }
 0x87a   :  { %3022 = vtanh.f32 %v1770_v59 }
 0x884   :  { %v3023_v23 = vpop.eup %3022 }
 0x885   :  { %v1773_v2 = vmul.f32 %v3023_v23, %v1772_v22 }
 0x887   :  { %v1775_v33 = vadd.f32 %v1774_v31, %v1773_v2 }
 0x889   :  { %2418 = vmatmul.mubr.f32.vlgmr.msra.gmra.mrb[16].mxu0 %v1775_v33 }
 0x95c   :  { %v1870_v28 = vpop.f32.mrb[16].mxu0 }
 0x95d   :  { %v1871_v42 = vadd.f32 %v1925_v40, %v1870_v28  ;;  %v2419_v45 = vpop.f32.mrb[17].mxu0 }
 0x95f   :  { %1874 = vst [vmem:[#allocation12] sm:$0xff] %v1871_v42 }
 0x960   :  { %3123 = shalt.err (!%p3120_p8)
}
 0x961   :  { %s3124_s13 = scalar_lea.hbm %s3709_s7, 128 }
 0x962   :  { %p3125_p9 = scmp.ne.s32.totalorder %s3709_s7, %s3124_s13  ;;  %p3128_p10 = scmp.lt.u32.totalorder %s3124_s13, %s3709_s7 }
 0x964   :  { %p3130_p11 = pnand %p3128_p10, %p3125_p9 }
 0x966   :  { %3133 = shalt.err (!%p3130_p11)
}
 0x967   :  { %1884 = dma.vmem_to_hbm [thread:$0]  %s1882_s30, 128, %s3709_s7, [#allocation6]  }
 0x968   :  { %3140 = dma.done.wait [#allocation6], 128  }
 0x969   :  { %3141 = vsyncadd [#allocation6], 4294967168 }
 0x96a   :  { %1888 = vsyncpa [#allocation5], 1 }
 0x96b   :  { %1889 = vsyncpa [#allocation8], 1 }
 0x96c   :  { %1890 = vsyncpa [#allocation11], 1 }
 0x96d   :  { %1891 = vsyncpa [#allocation6], 1 }

</bundles_post_ra>
